<compile_context>
chip_gen: v7x
topology: tpu7x:2x2x1
jax: 0.10.0
libtpu: 0.0.40
codegen_flags: <defaults>
</compile_context>

<pallas_src>
import jax
import jax.numpy as jnp
from jax.experimental import pallas as pl
from jax.experimental.pallas import tpu as pltpu

KERNEL_SIZES = (2, 3, 5, 7)
KERNEL_NUM = 30
EMBED_DIM = 50
CLASS_NUM = 2


def textcnn_kernel(tokens_ref,            # SMEM (B*L,) int32
                   emb_hbm,               # ANY/HBM (VOCAB, D) f32
                   w2_ref, w3_ref, w5_ref, w7_ref,   # VMEM (ks*D, K) each
                   b2_ref, b3_ref, b5_ref, b7_ref,   # VMEM (1, K) each
                   fw2_ref, fw3_ref, fw5_ref, fw7_ref,  # VMEM (K, C) each
                   fcb_ref,               # VMEM (1, C)
                   out_ref,               # VMEM (B, C)
                   x_buf,                 # VMEM scratch (B*L, D)
                   sem):                  # DMA sems (B*L,)
    BL, D = x_buf.shape
    B, C = out_ref.shape
    L = BL // B

    # ---- fused embedding gather: one row DMA per token, all overlapped ----
    copies = []
    for i in range(BL):                     # static unroll, BL = 32
        tok = tokens_ref[i]
        cp = pltpu.make_async_copy(emb_hbm.at[pl.ds(tok, 1)],
                                   x_buf.at[pl.ds(i, 1)],
                                   sem.at[i])
        cp.start()
        copies.append(cp)
    for cp in copies:
        cp.wait()

    x = x_buf[...]                          # (B*L, D) f32 embeddings

    w_refs = (w2_ref, w3_ref, w5_ref, w7_ref)
    b_refs = (b2_ref, b3_ref, b5_ref, b7_ref)
    fw_refs = (fw2_ref, fw3_ref, fw5_ref, fw7_ref)

    logits = None
    for ks, w_ref, b_ref, fw_ref in zip(KERNEL_SIZES, w_refs, b_refs, fw_refs):
        Lout = L - ks + 1
        # im2col LHS: row (b, l) = [x[b, l], x[b, l+1], ..., x[b, l+ks-1]]
        lhs = jnp.concatenate(
            [jnp.concatenate(
                [x[b * L + j: b * L + j + Lout, :] for j in range(ks)], axis=1)
             for b in range(B)],
            axis=0)                                            # (B*Lout, ks*D)
        # conv == single matmul against the (ks*D, K) reshaped weight
        z = jnp.dot(lhs, w_ref[...],
                    preferred_element_type=jnp.float32) + b_ref[...]
        z = jnp.maximum(z, 0.0)                                # bias + ReLU
        # global max-pool over the sequence, per batch row -> (B, K)
        pooled = jnp.concatenate(
            [jnp.max(z[b * Lout:(b + 1) * Lout, :], axis=0, keepdims=True)
             for b in range(B)],
            axis=0)
        # fc contribution of this branch (fc weight pre-split per branch)
        contrib = jnp.dot(pooled, fw_ref[...],
                          preferred_element_type=jnp.float32)
        logits = contrib if logits is None else logits + contrib

    # dropout: eval-mode identity (PyTorch nn.Dropout is a no-op in eval)
    logits = logits + fcb_ref[...]
    m = jnp.max(logits, axis=1, keepdims=True)
    lse = m + jnp.log(jnp.sum(jnp.exp(logits - m), axis=1, keepdims=True))
    out_ref[...] = logits - lse                                # log_softmax


@jax.jit
def textcnn_forward(tokens, emb_table, conv_ws, conv_bs, fc_w, fc_b):
    B, L = tokens.shape
    tok_flat = tokens.reshape(B * L).astype(jnp.int32)

    # (ks, D, K) -> (ks*D, K): one matmul per kernel size against im2col LHS.
    w_mats = tuple(w.reshape(w.shape[0] * w.shape[1], w.shape[2])
                   for w in conv_ws)
    # Split fc weight per kernel-size block: avoids in-kernel feature concat.
    fc_chunks = tuple(fc_w[i * KERNEL_NUM:(i + 1) * KERNEL_NUM, :]
                      for i in range(len(KERNEL_SIZES)))

    smem = pl.BlockSpec(memory_space=pltpu.MemorySpace.SMEM)
    hbm = pl.BlockSpec(memory_space=pl.ANY)
    vmem = pl.BlockSpec(memory_space=pltpu.MemorySpace.VMEM)
    n_vmem_in = len(w_mats) + len(conv_bs) + len(fc_chunks) + 1

    # NOTE: for large B/L this would get a batch grid (BlockSpec over B,
    # dimension_semantics=("parallel",), weights with constant index_maps so
    # they stay VMEM-resident); at B=2, L=16 a single gridless program is best.
    return pl.pallas_call(
        textcnn_kernel,
        out_shape=jax.ShapeDtypeStruct((B, CLASS_NUM), jnp.float32),
        in_specs=[smem, hbm] + [vmem] * n_vmem_in,
        out_specs=vmem,
        scratch_shapes=[pltpu.VMEM((B * L, EMBED_DIM), jnp.float32),
                        pltpu.SemaphoreType.DMA((B * L,))],
    )(tok_flat, emb_table, *w_mats, *conv_bs, *fc_chunks, fc_b)


def reference(tokens, emb_table, conv_ws, conv_bs, fc_w, fc_b):
    x = jnp.take(emb_table, tokens.astype(jnp.int32), axis=0)  # (B, L, D)
    feats = []
    for ks, W, b in zip(KERNEL_SIZES, conv_ws, conv_bs):
        Lout = x.shape[1] - ks + 1
        acc = jnp.zeros((x.shape[0], Lout, KERNEL_NUM), jnp.float32)
        for j in range(ks):
            acc = acc + jnp.einsum('bld,dk->blk', x[:, j:j + Lout, :], W[j])
        acc = jax.nn.relu(acc + b[0])
        feats.append(acc.max(axis=1))
    feat = jnp.concatenate(feats, axis=1)
    logits = feat @ fc_w + fc_b
    return jax.nn.log_softmax(logits, axis=1)


if __name__ == "__main__":
    B, L = 2, 16
    VOCAB = 100  # synthetic word table (stand-in for get_word_table / w2v vecs)

    key = jax.random.PRNGKey(0)
    keys = jax.random.split(key, 12)
    emb_table = 0.1 * jax.random.normal(keys[0], (VOCAB, EMBED_DIM), jnp.float32)
    conv_ws = tuple(
        0.1 * jax.random.normal(keys[1 + i], (ks, EMBED_DIM, KERNEL_NUM), jnp.float32)
        for i, ks in enumerate(KERNEL_SIZES))
    conv_bs = tuple(
        0.1 * jax.random.normal(keys[5 + i], (1, KERNEL_NUM), jnp.float32)
        for i in range(len(KERNEL_SIZES)))
    fc_w = 0.1 * jax.random.normal(
        keys[9], (len(KERNEL_SIZES) * KERNEL_NUM, CLASS_NUM), jnp.float32)
    fc_b = 0.1 * jax.random.normal(keys[10], (1, CLASS_NUM), jnp.float32)
    tokens = jax.random.randint(keys[11], (B, L), 0, VOCAB, jnp.int32)

    out = textcnn_forward(tokens, emb_table, conv_ws, conv_bs, fc_w, fc_b)
    jax.block_until_ready(out)

    ref = reference(tokens, emb_table, conv_ws, conv_bs, fc_w, fc_b)
    assert out.shape == (B, CLASS_NUM)
    assert jnp.allclose(out, ref, atol=1e-4, rtol=1e-4), (out, ref)

    # TODO(synk): training-mode dropout (p=0.3) not implemented; eval-mode
    # identity semantics are used, matching module.eval().
    print("KERNEL_OK")
</pallas_src>

<mosaic_0001>
module attributes {stable_mosaic.version = 11 : i64} {
  func.func @textcnn_kernel(%arg0: memref<32xi32, #tpu.memory_space<smem>>, %arg1: memref<100x50xf32, #tpu.memory_space<any>>, %arg2: memref<100x30xf32, #tpu.memory_space<vmem>>, %arg3: memref<150x30xf32, #tpu.memory_space<vmem>>, %arg4: memref<250x30xf32, #tpu.memory_space<vmem>>, %arg5: memref<350x30xf32, #tpu.memory_space<vmem>>, %arg6: memref<1x30xf32, #tpu.memory_space<vmem>>, %arg7: memref<1x30xf32, #tpu.memory_space<vmem>>, %arg8: memref<1x30xf32, #tpu.memory_space<vmem>>, %arg9: memref<1x30xf32, #tpu.memory_space<vmem>>, %arg10: memref<30x2xf32, #tpu.memory_space<vmem>>, %arg11: memref<30x2xf32, #tpu.memory_space<vmem>>, %arg12: memref<30x2xf32, #tpu.memory_space<vmem>>, %arg13: memref<30x2xf32, #tpu.memory_space<vmem>>, %arg14: memref<1x2xf32, #tpu.memory_space<vmem>>, %arg15: memref<2x2xf32, #tpu.memory_space<vmem>>, %arg16: memref<32x50xf32, #tpu.memory_space<vmem>>, %arg17: memref<32x!tpu.dma_semaphore, #tpu.memory_space<semaphore_mem>>) attributes {dimension_semantics = [], scalar_prefetch = 0 : i64, scratch_operands = 2 : i64, tpu.core_type = #tpu.core_type<tc>} {
    %c0 = arith.constant 0 : index
    %0 = memref.load %arg0[%c0] : memref<32xi32, #tpu.memory_space<smem>>
    %c0_i32 = arith.constant 0 : i32
    %c0_i32_0 = arith.constant 0 : i32
    %1 = tpu.memref_slice %arg1[%0, %c0_i32_0] : memref<100x50xf32, #tpu.memory_space<any>> -> memref<1x50xf32, #tpu.memory_space<any>>
    %c0_i32_1 = arith.constant 0 : i32
    %c0_i32_2 = arith.constant 0 : i32
    %2 = tpu.memref_slice %arg16[%c0_i32_1, %c0_i32_2] : memref<32x50xf32, #tpu.memory_space<vmem>> -> memref<1x50xf32, #tpu.memory_space<vmem>>
    %3 = tpu.memref_slice %arg17[%c0_i32] : memref<32x!tpu.dma_semaphore, #tpu.memory_space<semaphore_mem>> -> memref<1x!tpu.dma_semaphore, #tpu.memory_space<semaphore_mem>>
    %4 = tpu.memref_squeeze %3 : memref<1x!tpu.dma_semaphore, #tpu.memory_space<semaphore_mem>> -> memref<!tpu.dma_semaphore, #tpu.memory_space<semaphore_mem>>
    tpu.enqueue_dma source(%1 : memref<1x50xf32, #tpu.memory_space<any>>) target(%2 : memref<1x50xf32, #tpu.memory_space<vmem>>) target_semaphore(%4 : memref<!tpu.dma_semaphore, #tpu.memory_space<semaphore_mem>>)
    %c1 = arith.constant 1 : index
    %5 = memref.load %arg0[%c1] : memref<32xi32, #tpu.memory_space<smem>>
    %c1_i32 = arith.constant 1 : i32
    %c0_i32_3 = arith.constant 0 : i32
    %6 = tpu.memref_slice %arg1[%5, %c0_i32_3] : memref<100x50xf32, #tpu.memory_space<any>> -> memref<1x50xf32, #tpu.memory_space<any>>
    %c1_i32_4 = arith.constant 1 : i32
    %c0_i32_5 = arith.constant 0 : i32
    %7 = tpu.memref_slice %arg16[%c1_i32_4, %c0_i32_5] : memref<32x50xf32, #tpu.memory_space<vmem>> -> memref<1x50xf32, #tpu.memory_space<vmem>>
    %8 = tpu.memref_slice %arg17[%c1_i32] : memref<32x!tpu.dma_semaphore, #tpu.memory_space<semaphore_mem>> -> memref<1x!tpu.dma_semaphore, #tpu.memory_space<semaphore_mem>>
    %9 = tpu.memref_squeeze %8 : memref<1x!tpu.dma_semaphore, #tpu.memory_space<semaphore_mem>> -> memref<!tpu.dma_semaphore, #tpu.memory_space<semaphore_mem>>
    tpu.enqueue_dma source(%6 : memref<1x50xf32, #tpu.memory_space<any>>) target(%7 : memref<1x50xf32, #tpu.memory_space<vmem>>) target_semaphore(%9 : memref<!tpu.dma_semaphore, #tpu.memory_space<semaphore_mem>>)
    %c2 = arith.constant 2 : index
    %10 = memref.load %arg0[%c2] : memref<32xi32, #tpu.memory_space<smem>>
    %c2_i32 = arith.constant 2 : i32
    %c0_i32_6 = arith.constant 0 : i32
    %11 = tpu.memref_slice %arg1[%10, %c0_i32_6] : memref<100x50xf32, #tpu.memory_space<any>> -> memref<1x50xf32, #tpu.memory_space<any>>
    %c2_i32_7 = arith.constant 2 : i32
    %c0_i32_8 = arith.constant 0 : i32
    %12 = tpu.memref_slice %arg16[%c2_i32_7, %c0_i32_8] : memref<32x50xf32, #tpu.memory_space<vmem>> -> memref<1x50xf32, #tpu.memory_space<vmem>>
    %13 = tpu.memref_slice %arg17[%c2_i32] : memref<32x!tpu.dma_semaphore, #tpu.memory_space<semaphore_mem>> -> memref<1x!tpu.dma_semaphore, #tpu.memory_space<semaphore_mem>>
    %14 = tpu.memref_squeeze %13 : memref<1x!tpu.dma_semaphore, #tpu.memory_space<semaphore_mem>> -> memref<!tpu.dma_semaphore, #tpu.memory_space<semaphore_mem>>
    tpu.enqueue_dma source(%11 : memref<1x50xf32, #tpu.memory_space<any>>) target(%12 : memref<1x50xf32, #tpu.memory_space<vmem>>) target_semaphore(%14 : memref<!tpu.dma_semaphore, #tpu.memory_space<semaphore_mem>>)
    %c3 = arith.constant 3 : index
    %15 = memref.load %arg0[%c3] : memref<32xi32, #tpu.memory_space<smem>>
    %c3_i32 = arith.constant 3 : i32
    %c0_i32_9 = arith.constant 0 : i32
    %16 = tpu.memref_slice %arg1[%15, %c0_i32_9] : memref<100x50xf32, #tpu.memory_space<any>> -> memref<1x50xf32, #tpu.memory_space<any>>
    %c3_i32_10 = arith.constant 3 : i32
    %c0_i32_11 = arith.constant 0 : i32
    %17 = tpu.memref_slice %arg16[%c3_i32_10, %c0_i32_11] : memref<32x50xf32, #tpu.memory_space<vmem>> -> memref<1x50xf32, #tpu.memory_space<vmem>>
    %18 = tpu.memref_slice %arg17[%c3_i32] : memref<32x!tpu.dma_semaphore, #tpu.memory_space<semaphore_mem>> -> memref<1x!tpu.dma_semaphore, #tpu.memory_space<semaphore_mem>>
    %19 = tpu.memref_squeeze %18 : memref<1x!tpu.dma_semaphore, #tpu.memory_space<semaphore_mem>> -> memref<!tpu.dma_semaphore, #tpu.memory_space<semaphore_mem>>
    tpu.enqueue_dma source(%16 : memref<1x50xf32, #tpu.memory_space<any>>) target(%17 : memref<1x50xf32, #tpu.memory_space<vmem>>) target_semaphore(%19 : memref<!tpu.dma_semaphore, #tpu.memory_space<semaphore_mem>>)
    %c4 = arith.constant 4 : index
    %20 = memref.load %arg0[%c4] : memref<32xi32, #tpu.memory_space<smem>>
    %c4_i32 = arith.constant 4 : i32
    %c0_i32_12 = arith.constant 0 : i32
    %21 = tpu.memref_slice %arg1[%20, %c0_i32_12] : memref<100x50xf32, #tpu.memory_space<any>> -> memref<1x50xf32, #tpu.memory_space<any>>
    %c4_i32_13 = arith.constant 4 : i32
    %c0_i32_14 = arith.constant 0 : i32
    %22 = tpu.memref_slice %arg16[%c4_i32_13, %c0_i32_14] : memref<32x50xf32, #tpu.memory_space<vmem>> -> memref<1x50xf32, #tpu.memory_space<vmem>>
    %23 = tpu.memref_slice %arg17[%c4_i32] : memref<32x!tpu.dma_semaphore, #tpu.memory_space<semaphore_mem>> -> memref<1x!tpu.dma_semaphore, #tpu.memory_space<semaphore_mem>>
    %24 = tpu.memref_squeeze %23 : memref<1x!tpu.dma_semaphore, #tpu.memory_space<semaphore_mem>> -> memref<!tpu.dma_semaphore, #tpu.memory_space<semaphore_mem>>
    tpu.enqueue_dma source(%21 : memref<1x50xf32, #tpu.memory_space<any>>) target(%22 : memref<1x50xf32, #tpu.memory_space<vmem>>) target_semaphore(%24 : memref<!tpu.dma_semaphore, #tpu.memory_space<semaphore_mem>>)
    %c5 = arith.constant 5 : index
    %25 = memref.load %arg0[%c5] : memref<32xi32, #tpu.memory_space<smem>>
    %c5_i32 = arith.constant 5 : i32
    %c0_i32_15 = arith.constant 0 : i32
    %26 = tpu.memref_slice %arg1[%25, %c0_i32_15] : memref<100x50xf32, #tpu.memory_space<any>> -> memref<1x50xf32, #tpu.memory_space<any>>
    %c5_i32_16 = arith.constant 5 : i32
    %c0_i32_17 = arith.constant 0 : i32
    %27 = tpu.memref_slice %arg16[%c5_i32_16, %c0_i32_17] : memref<32x50xf32, #tpu.memory_space<vmem>> -> memref<1x50xf32, #tpu.memory_space<vmem>>
    %28 = tpu.memref_slice %arg17[%c5_i32] : memref<32x!tpu.dma_semaphore, #tpu.memory_space<semaphore_mem>> -> memref<1x!tpu.dma_semaphore, #tpu.memory_space<semaphore_mem>>
    %29 = tpu.memref_squeeze %28 : memref<1x!tpu.dma_semaphore, #tpu.memory_space<semaphore_mem>> -> memref<!tpu.dma_semaphore, #tpu.memory_space<semaphore_mem>>
    tpu.enqueue_dma source(%26 : memref<1x50xf32, #tpu.memory_space<any>>) target(%27 : memref<1x50xf32, #tpu.memory_space<vmem>>) target_semaphore(%29 : memref<!tpu.dma_semaphore, #tpu.memory_space<semaphore_mem>>)
    %c6 = arith.constant 6 : index
    %30 = memref.load %arg0[%c6] : memref<32xi32, #tpu.memory_space<smem>>
    %c6_i32 = arith.constant 6 : i32
    %c0_i32_18 = arith.constant 0 : i32
    %31 = tpu.memref_slice %arg1[%30, %c0_i32_18] : memref<100x50xf32, #tpu.memory_space<any>> -> memref<1x50xf32, #tpu.memory_space<any>>
    %c6_i32_19 = arith.constant 6 : i32
    %c0_i32_20 = arith.constant 0 : i32
    %32 = tpu.memref_slice %arg16[%c6_i32_19, %c0_i32_20] : memref<32x50xf32, #tpu.memory_space<vmem>> -> memref<1x50xf32, #tpu.memory_space<vmem>>
    %33 = tpu.memref_slice %arg17[%c6_i32] : memref<32x!tpu.dma_semaphore, #tpu.memory_space<semaphore_mem>> -> memref<1x!tpu.dma_semaphore, #tpu.memory_space<semaphore_mem>>
    %34 = tpu.memref_squeeze %33 : memref<1x!tpu.dma_semaphore, #tpu.memory_space<semaphore_mem>> -> memref<!tpu.dma_semaphore, #tpu.memory_space<semaphore_mem>>
    tpu.enqueue_dma source(%31 : memref<1x50xf32, #tpu.memory_space<any>>) target(%32 : memref<1x50xf32, #tpu.memory_space<vmem>>) target_semaphore(%34 : memref<!tpu.dma_semaphore, #tpu.memory_space<semaphore_mem>>)
    %c7 = arith.constant 7 : index
    %35 = memref.load %arg0[%c7] : memref<32xi32, #tpu.memory_space<smem>>
    %c7_i32 = arith.constant 7 : i32
    %c0_i32_21 = arith.constant 0 : i32
    %36 = tpu.memref_slice %arg1[%35, %c0_i32_21] : memref<100x50xf32, #tpu.memory_space<any>> -> memref<1x50xf32, #tpu.memory_space<any>>
    %c7_i32_22 = arith.constant 7 : i32
    %c0_i32_23 = arith.constant 0 : i32
    %37 = tpu.memref_slice %arg16[%c7_i32_22, %c0_i32_23] : memref<32x50xf32, #tpu.memory_space<vmem>> -> memref<1x50xf32, #tpu.memory_space<vmem>>
    %38 = tpu.memref_slice %arg17[%c7_i32] : memref<32x!tpu.dma_semaphore, #tpu.memory_space<semaphore_mem>> -> memref<1x!tpu.dma_semaphore, #tpu.memory_space<semaphore_mem>>
    %39 = tpu.memref_squeeze %38 : memref<1x!tpu.dma_semaphore, #tpu.memory_space<semaphore_mem>> -> memref<!tpu.dma_semaphore, #tpu.memory_space<semaphore_mem>>
    tpu.enqueue_dma source(%36 : memref<1x50xf32, #tpu.memory_space<any>>) target(%37 : memref<1x50xf32, #tpu.memory_space<vmem>>) target_semaphore(%39 : memref<!tpu.dma_semaphore, #tpu.memory_space<semaphore_mem>>)
    %c8 = arith.constant 8 : index
    %40 = memref.load %arg0[%c8] : memref<32xi32, #tpu.memory_space<smem>>
    %c8_i32 = arith.constant 8 : i32
    %c0_i32_24 = arith.constant 0 : i32
    %41 = tpu.memref_slice %arg1[%40, %c0_i32_24] : memref<100x50xf32, #tpu.memory_space<any>> -> memref<1x50xf32, #tpu.memory_space<any>>
    %c8_i32_25 = arith.constant 8 : i32
    %c0_i32_26 = arith.constant 0 : i32
    %42 = tpu.memref_slice %arg16[%c8_i32_25, %c0_i32_26] : memref<32x50xf32, #tpu.memory_space<vmem>> -> memref<1x50xf32, #tpu.memory_space<vmem>>
    %43 = tpu.memref_slice %arg17[%c8_i32] : memref<32x!tpu.dma_semaphore, #tpu.memory_space<semaphore_mem>> -> memref<1x!tpu.dma_semaphore, #tpu.memory_space<semaphore_mem>>
    %44 = tpu.memref_squeeze %43 : memref<1x!tpu.dma_semaphore, #tpu.memory_space<semaphore_mem>> -> memref<!tpu.dma_semaphore, #tpu.memory_space<semaphore_mem>>
    tpu.enqueue_dma source(%41 : memref<1x50xf32, #tpu.memory_space<any>>) target(%42 : memref<1x50xf32, #tpu.memory_space<vmem>>) target_semaphore(%44 : memref<!tpu.dma_semaphore, #tpu.memory_space<semaphore_mem>>)
    %c9 = arith.constant 9 : index
    %45 = memref.load %arg0[%c9] : memref<32xi32, #tpu.memory_space<smem>>
    %c9_i32 = arith.constant 9 : i32
    %c0_i32_27 = arith.constant 0 : i32
    %46 = tpu.memref_slice %arg1[%45, %c0_i32_27] : memref<100x50xf32, #tpu.memory_space<any>> -> memref<1x50xf32, #tpu.memory_space<any>>
    %c9_i32_28 = arith.constant 9 : i32
    %c0_i32_29 = arith.constant 0 : i32
    %47 = tpu.memref_slice %arg16[%c9_i32_28, %c0_i32_29] : memref<32x50xf32, #tpu.memory_space<vmem>> -> memref<1x50xf32, #tpu.memory_space<vmem>>
    %48 = tpu.memref_slice %arg17[%c9_i32] : memref<32x!tpu.dma_semaphore, #tpu.memory_space<semaphore_mem>> -> memref<1x!tpu.dma_semaphore, #tpu.memory_space<semaphore_mem>>
    %49 = tpu.memref_squeeze %48 : memref<1x!tpu.dma_semaphore, #tpu.memory_space<semaphore_mem>> -> memref<!tpu.dma_semaphore, #tpu.memory_space<semaphore_mem>>
    tpu.enqueue_dma source(%46 : memref<1x50xf32, #tpu.memory_space<any>>) target(%47 : memref<1x50xf32, #tpu.memory_space<vmem>>) target_semaphore(%49 : memref<!tpu.dma_semaphore, #tpu.memory_space<semaphore_mem>>)
    %c10 = arith.constant 10 : index
    %50 = memref.load %arg0[%c10] : memref<32xi32, #tpu.memory_space<smem>>
    %c10_i32 = arith.constant 10 : i32
    %c0_i32_30 = arith.constant 0 : i32
    %51 = tpu.memref_slice %arg1[%50, %c0_i32_30] : memref<100x50xf32, #tpu.memory_space<any>> -> memref<1x50xf32, #tpu.memory_space<any>>
    %c10_i32_31 = arith.constant 10 : i32
    %c0_i32_32 = arith.constant 0 : i32
    %52 = tpu.memref_slice %arg16[%c10_i32_31, %c0_i32_32] : memref<32x50xf32, #tpu.memory_space<vmem>> -> memref<1x50xf32, #tpu.memory_space<vmem>>
    %53 = tpu.memref_slice %arg17[%c10_i32] : memref<32x!tpu.dma_semaphore, #tpu.memory_space<semaphore_mem>> -> memref<1x!tpu.dma_semaphore, #tpu.memory_space<semaphore_mem>>
    %54 = tpu.memref_squeeze %53 : memref<1x!tpu.dma_semaphore, #tpu.memory_space<semaphore_mem>> -> memref<!tpu.dma_semaphore, #tpu.memory_space<semaphore_mem>>
    tpu.enqueue_dma source(%51 : memref<1x50xf32, #tpu.memory_space<any>>) target(%52 : memref<1x50xf32, #tpu.memory_space<vmem>>) target_semaphore(%54 : memref<!tpu.dma_semaphore, #tpu.memory_space<semaphore_mem>>)
    %c11 = arith.constant 11 : index
    %55 = memref.load %arg0[%c11] : memref<32xi32, #tpu.memory_space<smem>>
    %c11_i32 = arith.constant 11 : i32
    %c0_i32_33 = arith.constant 0 : i32
    %56 = tpu.memref_slice %arg1[%55, %c0_i32_33] : memref<100x50xf32, #tpu.memory_space<any>> -> memref<1x50xf32, #tpu.memory_space<any>>
    %c11_i32_34 = arith.constant 11 : i32
    %c0_i32_35 = arith.constant 0 : i32
    %57 = tpu.memref_slice %arg16[%c11_i32_34, %c0_i32_35] : memref<32x50xf32, #tpu.memory_space<vmem>> -> memref<1x50xf32, #tpu.memory_space<vmem>>
    %58 = tpu.memref_slice %arg17[%c11_i32] : memref<32x!tpu.dma_semaphore, #tpu.memory_space<semaphore_mem>> -> memref<1x!tpu.dma_semaphore, #tpu.memory_space<semaphore_mem>>
    %59 = tpu.memref_squeeze %58 : memref<1x!tpu.dma_semaphore, #tpu.memory_space<semaphore_mem>> -> memref<!tpu.dma_semaphore, #tpu.memory_space<semaphore_mem>>
    tpu.enqueue_dma source(%56 : memref<1x50xf32, #tpu.memory_space<any>>) target(%57 : memref<1x50xf32, #tpu.memory_space<vmem>>) target_semaphore(%59 : memref<!tpu.dma_semaphore, #tpu.memory_space<semaphore_mem>>)
    %c12 = arith.constant 12 : index
    %60 = memref.load %arg0[%c12] : memref<32xi32, #tpu.memory_space<smem>>
    %c12_i32 = arith.constant 12 : i32
    %c0_i32_36 = arith.constant 0 : i32
    %61 = tpu.memref_slice %arg1[%60, %c0_i32_36] : memref<100x50xf32, #tpu.memory_space<any>> -> memref<1x50xf32, #tpu.memory_space<any>>
    %c12_i32_37 = arith.constant 12 : i32
    %c0_i32_38 = arith.constant 0 : i32
    %62 = tpu.memref_slice %arg16[%c12_i32_37, %c0_i32_38] : memref<32x50xf32, #tpu.memory_space<vmem>> -> memref<1x50xf32, #tpu.memory_space<vmem>>
    %63 = tpu.memref_slice %arg17[%c12_i32] : memref<32x!tpu.dma_semaphore, #tpu.memory_space<semaphore_mem>> -> memref<1x!tpu.dma_semaphore, #tpu.memory_space<semaphore_mem>>
    %64 = tpu.memref_squeeze %63 : memref<1x!tpu.dma_semaphore, #tpu.memory_space<semaphore_mem>> -> memref<!tpu.dma_semaphore, #tpu.memory_space<semaphore_mem>>
    tpu.enqueue_dma source(%61 : memref<1x50xf32, #tpu.memory_space<any>>) target(%62 : memref<1x50xf32, #tpu.memory_space<vmem>>) target_semaphore(%64 : memref<!tpu.dma_semaphore, #tpu.memory_space<semaphore_mem>>)
    %c13 = arith.constant 13 : index
    %65 = memref.load %arg0[%c13] : memref<32xi32, #tpu.memory_space<smem>>
    %c13_i32 = arith.constant 13 : i32
    %c0_i32_39 = arith.constant 0 : i32
    %66 = tpu.memref_slice %arg1[%65, %c0_i32_39] : memref<100x50xf32, #tpu.memory_space<any>> -> memref<1x50xf32, #tpu.memory_space<any>>
    %c13_i32_40 = arith.constant 13 : i32
    %c0_i32_41 = arith.constant 0 : i32
    %67 = tpu.memref_slice %arg16[%c13_i32_40, %c0_i32_41] : memref<32x50xf32, #tpu.memory_space<vmem>> -> memref<1x50xf32, #tpu.memory_space<vmem>>
    %68 = tpu.memref_slice %arg17[%c13_i32] : memref<32x!tpu.dma_semaphore, #tpu.memory_space<semaphore_mem>> -> memref<1x!tpu.dma_semaphore, #tpu.memory_space<semaphore_mem>>
    %69 = tpu.memref_squeeze %68 : memref<1x!tpu.dma_semaphore, #tpu.memory_space<semaphore_mem>> -> memref<!tpu.dma_semaphore, #tpu.memory_space<semaphore_mem>>
    tpu.enqueue_dma source(%66 : memref<1x50xf32, #tpu.memory_space<any>>) target(%67 : memref<1x50xf32, #tpu.memory_space<vmem>>) target_semaphore(%69 : memref<!tpu.dma_semaphore, #tpu.memory_space<semaphore_mem>>)
    %c14 = arith.constant 14 : index
    %70 = memref.load %arg0[%c14] : memref<32xi32, #tpu.memory_space<smem>>
    %c14_i32 = arith.constant 14 : i32
    %c0_i32_42 = arith.constant 0 : i32
    %71 = tpu.memref_slice %arg1[%70, %c0_i32_42] : memref<100x50xf32, #tpu.memory_space<any>> -> memref<1x50xf32, #tpu.memory_space<any>>
    %c14_i32_43 = arith.constant 14 : i32
    %c0_i32_44 = arith.constant 0 : i32
    %72 = tpu.memref_slice %arg16[%c14_i32_43, %c0_i32_44] : memref<32x50xf32, #tpu.memory_space<vmem>> -> memref<1x50xf32, #tpu.memory_space<vmem>>
    %73 = tpu.memref_slice %arg17[%c14_i32] : memref<32x!tpu.dma_semaphore, #tpu.memory_space<semaphore_mem>> -> memref<1x!tpu.dma_semaphore, #tpu.memory_space<semaphore_mem>>
    %74 = tpu.memref_squeeze %73 : memref<1x!tpu.dma_semaphore, #tpu.memory_space<semaphore_mem>> -> memref<!tpu.dma_semaphore, #tpu.memory_space<semaphore_mem>>
    tpu.enqueue_dma source(%71 : memref<1x50xf32, #tpu.memory_space<any>>) target(%72 : memref<1x50xf32, #tpu.memory_space<vmem>>) target_semaphore(%74 : memref<!tpu.dma_semaphore, #tpu.memory_space<semaphore_mem>>)
    %c15 = arith.constant 15 : index
    %75 = memref.load %arg0[%c15] : memref<32xi32, #tpu.memory_space<smem>>
    %c15_i32 = arith.constant 15 : i32
    %c0_i32_45 = arith.constant 0 : i32
    %76 = tpu.memref_slice %arg1[%75, %c0_i32_45] : memref<100x50xf32, #tpu.memory_space<any>> -> memref<1x50xf32, #tpu.memory_space<any>>
    %c15_i32_46 = arith.constant 15 : i32
    %c0_i32_47 = arith.constant 0 : i32
    %77 = tpu.memref_slice %arg16[%c15_i32_46, %c0_i32_47] : memref<32x50xf32, #tpu.memory_space<vmem>> -> memref<1x50xf32, #tpu.memory_space<vmem>>
    %78 = tpu.memref_slice %arg17[%c15_i32] : memref<32x!tpu.dma_semaphore, #tpu.memory_space<semaphore_mem>> -> memref<1x!tpu.dma_semaphore, #tpu.memory_space<semaphore_mem>>
    %79 = tpu.memref_squeeze %78 : memref<1x!tpu.dma_semaphore, #tpu.memory_space<semaphore_mem>> -> memref<!tpu.dma_semaphore, #tpu.memory_space<semaphore_mem>>
    tpu.enqueue_dma source(%76 : memref<1x50xf32, #tpu.memory_space<any>>) target(%77 : memref<1x50xf32, #tpu.memory_space<vmem>>) target_semaphore(%79 : memref<!tpu.dma_semaphore, #tpu.memory_space<semaphore_mem>>)
    %c16 = arith.constant 16 : index
    %80 = memref.load %arg0[%c16] : memref<32xi32, #tpu.memory_space<smem>>
    %c16_i32 = arith.constant 16 : i32
    %c0_i32_48 = arith.constant 0 : i32
    %81 = tpu.memref_slice %arg1[%80, %c0_i32_48] : memref<100x50xf32, #tpu.memory_space<any>> -> memref<1x50xf32, #tpu.memory_space<any>>
    %c16_i32_49 = arith.constant 16 : i32
    %c0_i32_50 = arith.constant 0 : i32
    %82 = tpu.memref_slice %arg16[%c16_i32_49, %c0_i32_50] : memref<32x50xf32, #tpu.memory_space<vmem>> -> memref<1x50xf32, #tpu.memory_space<vmem>>
    %83 = tpu.memref_slice %arg17[%c16_i32] : memref<32x!tpu.dma_semaphore, #tpu.memory_space<semaphore_mem>> -> memref<1x!tpu.dma_semaphore, #tpu.memory_space<semaphore_mem>>
    %84 = tpu.memref_squeeze %83 : memref<1x!tpu.dma_semaphore, #tpu.memory_space<semaphore_mem>> -> memref<!tpu.dma_semaphore, #tpu.memory_space<semaphore_mem>>
    tpu.enqueue_dma source(%81 : memref<1x50xf32, #tpu.memory_space<any>>) target(%82 : memref<1x50xf32, #tpu.memory_space<vmem>>) target_semaphore(%84 : memref<!tpu.dma_semaphore, #tpu.memory_space<semaphore_mem>>)
    %c17 = arith.constant 17 : index
    %85 = memref.load %arg0[%c17] : memref<32xi32, #tpu.memory_space<smem>>
    %c17_i32 = arith.constant 17 : i32
    %c0_i32_51 = arith.constant 0 : i32
    %86 = tpu.memref_slice %arg1[%85, %c0_i32_51] : memref<100x50xf32, #tpu.memory_space<any>> -> memref<1x50xf32, #tpu.memory_space<any>>
    %c17_i32_52 = arith.constant 17 : i32
    %c0_i32_53 = arith.constant 0 : i32
    %87 = tpu.memref_slice %arg16[%c17_i32_52, %c0_i32_53] : memref<32x50xf32, #tpu.memory_space<vmem>> -> memref<1x50xf32, #tpu.memory_space<vmem>>
    %88 = tpu.memref_slice %arg17[%c17_i32] : memref<32x!tpu.dma_semaphore, #tpu.memory_space<semaphore_mem>> -> memref<1x!tpu.dma_semaphore, #tpu.memory_space<semaphore_mem>>
    %89 = tpu.memref_squeeze %88 : memref<1x!tpu.dma_semaphore, #tpu.memory_space<semaphore_mem>> -> memref<!tpu.dma_semaphore, #tpu.memory_space<semaphore_mem>>
    tpu.enqueue_dma source(%86 : memref<1x50xf32, #tpu.memory_space<any>>) target(%87 : memref<1x50xf32, #tpu.memory_space<vmem>>) target_semaphore(%89 : memref<!tpu.dma_semaphore, #tpu.memory_space<semaphore_mem>>)
    %c18 = arith.constant 18 : index
    %90 = memref.load %arg0[%c18] : memref<32xi32, #tpu.memory_space<smem>>
    %c18_i32 = arith.constant 18 : i32
    %c0_i32_54 = arith.constant 0 : i32
    %91 = tpu.memref_slice %arg1[%90, %c0_i32_54] : memref<100x50xf32, #tpu.memory_space<any>> -> memref<1x50xf32, #tpu.memory_space<any>>
    %c18_i32_55 = arith.constant 18 : i32
    %c0_i32_56 = arith.constant 0 : i32
    %92 = tpu.memref_slice %arg16[%c18_i32_55, %c0_i32_56] : memref<32x50xf32, #tpu.memory_space<vmem>> -> memref<1x50xf32, #tpu.memory_space<vmem>>
    %93 = tpu.memref_slice %arg17[%c18_i32] : memref<32x!tpu.dma_semaphore, #tpu.memory_space<semaphore_mem>> -> memref<1x!tpu.dma_semaphore, #tpu.memory_space<semaphore_mem>>
    %94 = tpu.memref_squeeze %93 : memref<1x!tpu.dma_semaphore, #tpu.memory_space<semaphore_mem>> -> memref<!tpu.dma_semaphore, #tpu.memory_space<semaphore_mem>>
    tpu.enqueue_dma source(%91 : memref<1x50xf32, #tpu.memory_space<any>>) target(%92 : memref<1x50xf32, #tpu.memory_space<vmem>>) target_semaphore(%94 : memref<!tpu.dma_semaphore, #tpu.memory_space<semaphore_mem>>)
    %c19 = arith.constant 19 : index
    %95 = memref.load %arg0[%c19] : memref<32xi32, #tpu.memory_space<smem>>
    %c19_i32 = arith.constant 19 : i32
    %c0_i32_57 = arith.constant 0 : i32
    %96 = tpu.memref_slice %arg1[%95, %c0_i32_57] : memref<100x50xf32, #tpu.memory_space<any>> -> memref<1x50xf32, #tpu.memory_space<any>>
    %c19_i32_58 = arith.constant 19 : i32
    %c0_i32_59 = arith.constant 0 : i32
    %97 = tpu.memref_slice %arg16[%c19_i32_58, %c0_i32_59] : memref<32x50xf32, #tpu.memory_space<vmem>> -> memref<1x50xf32, #tpu.memory_space<vmem>>
    %98 = tpu.memref_slice %arg17[%c19_i32] : memref<32x!tpu.dma_semaphore, #tpu.memory_space<semaphore_mem>> -> memref<1x!tpu.dma_semaphore, #tpu.memory_space<semaphore_mem>>
    %99 = tpu.memref_squeeze %98 : memref<1x!tpu.dma_semaphore, #tpu.memory_space<semaphore_mem>> -> memref<!tpu.dma_semaphore, #tpu.memory_space<semaphore_mem>>
    tpu.enqueue_dma source(%96 : memref<1x50xf32, #tpu.memory_space<any>>) target(%97 : memref<1x50xf32, #tpu.memory_space<vmem>>) target_semaphore(%99 : memref<!tpu.dma_semaphore, #tpu.memory_space<semaphore_mem>>)
    %c20 = arith.constant 20 : index
    %100 = memref.load %arg0[%c20] : memref<32xi32, #tpu.memory_space<smem>>
    %c20_i32 = arith.constant 20 : i32
    %c0_i32_60 = arith.constant 0 : i32
    %101 = tpu.memref_slice %arg1[%100, %c0_i32_60] : memref<100x50xf32, #tpu.memory_space<any>> -> memref<1x50xf32, #tpu.memory_space<any>>
    %c20_i32_61 = arith.constant 20 : i32
    %c0_i32_62 = arith.constant 0 : i32
    %102 = tpu.memref_slice %arg16[%c20_i32_61, %c0_i32_62] : memref<32x50xf32, #tpu.memory_space<vmem>> -> memref<1x50xf32, #tpu.memory_space<vmem>>
    %103 = tpu.memref_slice %arg17[%c20_i32] : memref<32x!tpu.dma_semaphore, #tpu.memory_space<semaphore_mem>> -> memref<1x!tpu.dma_semaphore, #tpu.memory_space<semaphore_mem>>
    %104 = tpu.memref_squeeze %103 : memref<1x!tpu.dma_semaphore, #tpu.memory_space<semaphore_mem>> -> memref<!tpu.dma_semaphore, #tpu.memory_space<semaphore_mem>>
    tpu.enqueue_dma source(%101 : memref<1x50xf32, #tpu.memory_space<any>>) target(%102 : memref<1x50xf32, #tpu.memory_space<vmem>>) target_semaphore(%104 : memref<!tpu.dma_semaphore, #tpu.memory_space<semaphore_mem>>)
    %c21 = arith.constant 21 : index
    %105 = memref.load %arg0[%c21] : memref<32xi32, #tpu.memory_space<smem>>
    %c21_i32 = arith.constant 21 : i32
    %c0_i32_63 = arith.constant 0 : i32
    %106 = tpu.memref_slice %arg1[%105, %c0_i32_63] : memref<100x50xf32, #tpu.memory_space<any>> -> memref<1x50xf32, #tpu.memory_space<any>>
    %c21_i32_64 = arith.constant 21 : i32
    %c0_i32_65 = arith.constant 0 : i32
    %107 = tpu.memref_slice %arg16[%c21_i32_64, %c0_i32_65] : memref<32x50xf32, #tpu.memory_space<vmem>> -> memref<1x50xf32, #tpu.memory_space<vmem>>
    %108 = tpu.memref_slice %arg17[%c21_i32] : memref<32x!tpu.dma_semaphore, #tpu.memory_space<semaphore_mem>> -> memref<1x!tpu.dma_semaphore, #tpu.memory_space<semaphore_mem>>
    %109 = tpu.memref_squeeze %108 : memref<1x!tpu.dma_semaphore, #tpu.memory_space<semaphore_mem>> -> memref<!tpu.dma_semaphore, #tpu.memory_space<semaphore_mem>>
    tpu.enqueue_dma source(%106 : memref<1x50xf32, #tpu.memory_space<any>>) target(%107 : memref<1x50xf32, #tpu.memory_space<vmem>>) target_semaphore(%109 : memref<!tpu.dma_semaphore, #tpu.memory_space<semaphore_mem>>)
    %c22 = arith.constant 22 : index
    %110 = memref.load %arg0[%c22] : memref<32xi32, #tpu.memory_space<smem>>
    %c22_i32 = arith.constant 22 : i32
    %c0_i32_66 = arith.constant 0 : i32
    %111 = tpu.memref_slice %arg1[%110, %c0_i32_66] : memref<100x50xf32, #tpu.memory_space<any>> -> memref<1x50xf32, #tpu.memory_space<any>>
    %c22_i32_67 = arith.constant 22 : i32
    %c0_i32_68 = arith.constant 0 : i32
    %112 = tpu.memref_slice %arg16[%c22_i32_67, %c0_i32_68] : memref<32x50xf32, #tpu.memory_space<vmem>> -> memref<1x50xf32, #tpu.memory_space<vmem>>
    %113 = tpu.memref_slice %arg17[%c22_i32] : memref<32x!tpu.dma_semaphore, #tpu.memory_space<semaphore_mem>> -> memref<1x!tpu.dma_semaphore, #tpu.memory_space<semaphore_mem>>
    %114 = tpu.memref_squeeze %113 : memref<1x!tpu.dma_semaphore, #tpu.memory_space<semaphore_mem>> -> memref<!tpu.dma_semaphore, #tpu.memory_space<semaphore_mem>>
    tpu.enqueue_dma source(%111 : memref<1x50xf32, #tpu.memory_space<any>>) target(%112 : memref<1x50xf32, #tpu.memory_space<vmem>>) target_semaphore(%114 : memref<!tpu.dma_semaphore, #tpu.memory_space<semaphore_mem>>)
    %c23 = arith.constant 23 : index
    %115 = memref.load %arg0[%c23] : memref<32xi32, #tpu.memory_space<smem>>
    %c23_i32 = arith.constant 23 : i32
    %c0_i32_69 = arith.constant 0 : i32
    %116 = tpu.memref_slice %arg1[%115, %c0_i32_69] : memref<100x50xf32, #tpu.memory_space<any>> -> memref<1x50xf32, #tpu.memory_space<any>>
    %c23_i32_70 = arith.constant 23 : i32
    %c0_i32_71 = arith.constant 0 : i32
    %117 = tpu.memref_slice %arg16[%c23_i32_70, %c0_i32_71] : memref<32x50xf32, #tpu.memory_space<vmem>> -> memref<1x50xf32, #tpu.memory_space<vmem>>
    %118 = tpu.memref_slice %arg17[%c23_i32] : memref<32x!tpu.dma_semaphore, #tpu.memory_space<semaphore_mem>> -> memref<1x!tpu.dma_semaphore, #tpu.memory_space<semaphore_mem>>
    %119 = tpu.memref_squeeze %118 : memref<1x!tpu.dma_semaphore, #tpu.memory_space<semaphore_mem>> -> memref<!tpu.dma_semaphore, #tpu.memory_space<semaphore_mem>>
    tpu.enqueue_dma source(%116 : memref<1x50xf32, #tpu.memory_space<any>>) target(%117 : memref<1x50xf32, #tpu.memory_space<vmem>>) target_semaphore(%119 : memref<!tpu.dma_semaphore, #tpu.memory_space<semaphore_mem>>)
    %c24 = arith.constant 24 : index
    %120 = memref.load %arg0[%c24] : memref<32xi32, #tpu.memory_space<smem>>
    %c24_i32 = arith.constant 24 : i32
    %c0_i32_72 = arith.constant 0 : i32
    %121 = tpu.memref_slice %arg1[%120, %c0_i32_72] : memref<100x50xf32, #tpu.memory_space<any>> -> memref<1x50xf32, #tpu.memory_space<any>>
    %c24_i32_73 = arith.constant 24 : i32
    %c0_i32_74 = arith.constant 0 : i32
    %122 = tpu.memref_slice %arg16[%c24_i32_73, %c0_i32_74] : memref<32x50xf32, #tpu.memory_space<vmem>> -> memref<1x50xf32, #tpu.memory_space<vmem>>
    %123 = tpu.memref_slice %arg17[%c24_i32] : memref<32x!tpu.dma_semaphore, #tpu.memory_space<semaphore_mem>> -> memref<1x!tpu.dma_semaphore, #tpu.memory_space<semaphore_mem>>
    %124 = tpu.memref_squeeze %123 : memref<1x!tpu.dma_semaphore, #tpu.memory_space<semaphore_mem>> -> memref<!tpu.dma_semaphore, #tpu.memory_space<semaphore_mem>>
    tpu.enqueue_dma source(%121 : memref<1x50xf32, #tpu.memory_space<any>>) target(%122 : memref<1x50xf32, #tpu.memory_space<vmem>>) target_semaphore(%124 : memref<!tpu.dma_semaphore, #tpu.memory_space<semaphore_mem>>)
    %c25 = arith.constant 25 : index
    %125 = memref.load %arg0[%c25] : memref<32xi32, #tpu.memory_space<smem>>
    %c25_i32 = arith.constant 25 : i32
    %c0_i32_75 = arith.constant 0 : i32
    %126 = tpu.memref_slice %arg1[%125, %c0_i32_75] : memref<100x50xf32, #tpu.memory_space<any>> -> memref<1x50xf32, #tpu.memory_space<any>>
    %c25_i32_76 = arith.constant 25 : i32
    %c0_i32_77 = arith.constant 0 : i32
    %127 = tpu.memref_slice %arg16[%c25_i32_76, %c0_i32_77] : memref<32x50xf32, #tpu.memory_space<vmem>> -> memref<1x50xf32, #tpu.memory_space<vmem>>
    %128 = tpu.memref_slice %arg17[%c25_i32] : memref<32x!tpu.dma_semaphore, #tpu.memory_space<semaphore_mem>> -> memref<1x!tpu.dma_semaphore, #tpu.memory_space<semaphore_mem>>
    %129 = tpu.memref_squeeze %128 : memref<1x!tpu.dma_semaphore, #tpu.memory_space<semaphore_mem>> -> memref<!tpu.dma_semaphore, #tpu.memory_space<semaphore_mem>>
    tpu.enqueue_dma source(%126 : memref<1x50xf32, #tpu.memory_space<any>>) target(%127 : memref<1x50xf32, #tpu.memory_space<vmem>>) target_semaphore(%129 : memref<!tpu.dma_semaphore, #tpu.memory_space<semaphore_mem>>)
    %c26 = arith.constant 26 : index
    %130 = memref.load %arg0[%c26] : memref<32xi32, #tpu.memory_space<smem>>
    %c26_i32 = arith.constant 26 : i32
    %c0_i32_78 = arith.constant 0 : i32
    %131 = tpu.memref_slice %arg1[%130, %c0_i32_78] : memref<100x50xf32, #tpu.memory_space<any>> -> memref<1x50xf32, #tpu.memory_space<any>>
    %c26_i32_79 = arith.constant 26 : i32
    %c0_i32_80 = arith.constant 0 : i32
    %132 = tpu.memref_slice %arg16[%c26_i32_79, %c0_i32_80] : memref<32x50xf32, #tpu.memory_space<vmem>> -> memref<1x50xf32, #tpu.memory_space<vmem>>
    %133 = tpu.memref_slice %arg17[%c26_i32] : memref<32x!tpu.dma_semaphore, #tpu.memory_space<semaphore_mem>> -> memref<1x!tpu.dma_semaphore, #tpu.memory_space<semaphore_mem>>
    %134 = tpu.memref_squeeze %133 : memref<1x!tpu.dma_semaphore, #tpu.memory_space<semaphore_mem>> -> memref<!tpu.dma_semaphore, #tpu.memory_space<semaphore_mem>>
    tpu.enqueue_dma source(%131 : memref<1x50xf32, #tpu.memory_space<any>>) target(%132 : memref<1x50xf32, #tpu.memory_space<vmem>>) target_semaphore(%134 : memref<!tpu.dma_semaphore, #tpu.memory_space<semaphore_mem>>)
    %c27 = arith.constant 27 : index
    %135 = memref.load %arg0[%c27] : memref<32xi32, #tpu.memory_space<smem>>
    %c27_i32 = arith.constant 27 : i32
    %c0_i32_81 = arith.constant 0 : i32
    %136 = tpu.memref_slice %arg1[%135, %c0_i32_81] : memref<100x50xf32, #tpu.memory_space<any>> -> memref<1x50xf32, #tpu.memory_space<any>>
    %c27_i32_82 = arith.constant 27 : i32
    %c0_i32_83 = arith.constant 0 : i32
    %137 = tpu.memref_slice %arg16[%c27_i32_82, %c0_i32_83] : memref<32x50xf32, #tpu.memory_space<vmem>> -> memref<1x50xf32, #tpu.memory_space<vmem>>
    %138 = tpu.memref_slice %arg17[%c27_i32] : memref<32x!tpu.dma_semaphore, #tpu.memory_space<semaphore_mem>> -> memref<1x!tpu.dma_semaphore, #tpu.memory_space<semaphore_mem>>
    %139 = tpu.memref_squeeze %138 : memref<1x!tpu.dma_semaphore, #tpu.memory_space<semaphore_mem>> -> memref<!tpu.dma_semaphore, #tpu.memory_space<semaphore_mem>>
    tpu.enqueue_dma source(%136 : memref<1x50xf32, #tpu.memory_space<any>>) target(%137 : memref<1x50xf32, #tpu.memory_space<vmem>>) target_semaphore(%139 : memref<!tpu.dma_semaphore, #tpu.memory_space<semaphore_mem>>)
    %c28 = arith.constant 28 : index
    %140 = memref.load %arg0[%c28] : memref<32xi32, #tpu.memory_space<smem>>
    %c28_i32 = arith.constant 28 : i32
    %c0_i32_84 = arith.constant 0 : i32
    %141 = tpu.memref_slice %arg1[%140, %c0_i32_84] : memref<100x50xf32, #tpu.memory_space<any>> -> memref<1x50xf32, #tpu.memory_space<any>>
    %c28_i32_85 = arith.constant 28 : i32
    %c0_i32_86 = arith.constant 0 : i32
    %142 = tpu.memref_slice %arg16[%c28_i32_85, %c0_i32_86] : memref<32x50xf32, #tpu.memory_space<vmem>> -> memref<1x50xf32, #tpu.memory_space<vmem>>
    %143 = tpu.memref_slice %arg17[%c28_i32] : memref<32x!tpu.dma_semaphore, #tpu.memory_space<semaphore_mem>> -> memref<1x!tpu.dma_semaphore, #tpu.memory_space<semaphore_mem>>
    %144 = tpu.memref_squeeze %143 : memref<1x!tpu.dma_semaphore, #tpu.memory_space<semaphore_mem>> -> memref<!tpu.dma_semaphore, #tpu.memory_space<semaphore_mem>>
    tpu.enqueue_dma source(%141 : memref<1x50xf32, #tpu.memory_space<any>>) target(%142 : memref<1x50xf32, #tpu.memory_space<vmem>>) target_semaphore(%144 : memref<!tpu.dma_semaphore, #tpu.memory_space<semaphore_mem>>)
    %c29 = arith.constant 29 : index
    %145 = memref.load %arg0[%c29] : memref<32xi32, #tpu.memory_space<smem>>
    %c29_i32 = arith.constant 29 : i32
    %c0_i32_87 = arith.constant 0 : i32
    %146 = tpu.memref_slice %arg1[%145, %c0_i32_87] : memref<100x50xf32, #tpu.memory_space<any>> -> memref<1x50xf32, #tpu.memory_space<any>>
    %c29_i32_88 = arith.constant 29 : i32
    %c0_i32_89 = arith.constant 0 : i32
    %147 = tpu.memref_slice %arg16[%c29_i32_88, %c0_i32_89] : memref<32x50xf32, #tpu.memory_space<vmem>> -> memref<1x50xf32, #tpu.memory_space<vmem>>
    %148 = tpu.memref_slice %arg17[%c29_i32] : memref<32x!tpu.dma_semaphore, #tpu.memory_space<semaphore_mem>> -> memref<1x!tpu.dma_semaphore, #tpu.memory_space<semaphore_mem>>
    %149 = tpu.memref_squeeze %148 : memref<1x!tpu.dma_semaphore, #tpu.memory_space<semaphore_mem>> -> memref<!tpu.dma_semaphore, #tpu.memory_space<semaphore_mem>>
    tpu.enqueue_dma source(%146 : memref<1x50xf32, #tpu.memory_space<any>>) target(%147 : memref<1x50xf32, #tpu.memory_space<vmem>>) target_semaphore(%149 : memref<!tpu.dma_semaphore, #tpu.memory_space<semaphore_mem>>)
    %c30 = arith.constant 30 : index
    %150 = memref.load %arg0[%c30] : memref<32xi32, #tpu.memory_space<smem>>
    %c30_i32 = arith.constant 30 : i32
    %c0_i32_90 = arith.constant 0 : i32
    %151 = tpu.memref_slice %arg1[%150, %c0_i32_90] : memref<100x50xf32, #tpu.memory_space<any>> -> memref<1x50xf32, #tpu.memory_space<any>>
    %c30_i32_91 = arith.constant 30 : i32
    %c0_i32_92 = arith.constant 0 : i32
    %152 = tpu.memref_slice %arg16[%c30_i32_91, %c0_i32_92] : memref<32x50xf32, #tpu.memory_space<vmem>> -> memref<1x50xf32, #tpu.memory_space<vmem>>
    %153 = tpu.memref_slice %arg17[%c30_i32] : memref<32x!tpu.dma_semaphore, #tpu.memory_space<semaphore_mem>> -> memref<1x!tpu.dma_semaphore, #tpu.memory_space<semaphore_mem>>
    %154 = tpu.memref_squeeze %153 : memref<1x!tpu.dma_semaphore, #tpu.memory_space<semaphore_mem>> -> memref<!tpu.dma_semaphore, #tpu.memory_space<semaphore_mem>>
    tpu.enqueue_dma source(%151 : memref<1x50xf32, #tpu.memory_space<any>>) target(%152 : memref<1x50xf32, #tpu.memory_space<vmem>>) target_semaphore(%154 : memref<!tpu.dma_semaphore, #tpu.memory_space<semaphore_mem>>)
    %c31 = arith.constant 31 : index
    %155 = memref.load %arg0[%c31] : memref<32xi32, #tpu.memory_space<smem>>
    %c31_i32 = arith.constant 31 : i32
    %c0_i32_93 = arith.constant 0 : i32
    %156 = tpu.memref_slice %arg1[%155, %c0_i32_93] : memref<100x50xf32, #tpu.memory_space<any>> -> memref<1x50xf32, #tpu.memory_space<any>>
    %c31_i32_94 = arith.constant 31 : i32
    %c0_i32_95 = arith.constant 0 : i32
    %157 = tpu.memref_slice %arg16[%c31_i32_94, %c0_i32_95] : memref<32x50xf32, #tpu.memory_space<vmem>> -> memref<1x50xf32, #tpu.memory_space<vmem>>
    %158 = tpu.memref_slice %arg17[%c31_i32] : memref<32x!tpu.dma_semaphore, #tpu.memory_space<semaphore_mem>> -> memref<1x!tpu.dma_semaphore, #tpu.memory_space<semaphore_mem>>
    %159 = tpu.memref_squeeze %158 : memref<1x!tpu.dma_semaphore, #tpu.memory_space<semaphore_mem>> -> memref<!tpu.dma_semaphore, #tpu.memory_space<semaphore_mem>>
    tpu.enqueue_dma source(%156 : memref<1x50xf32, #tpu.memory_space<any>>) target(%157 : memref<1x50xf32, #tpu.memory_space<vmem>>) target_semaphore(%159 : memref<!tpu.dma_semaphore, #tpu.memory_space<semaphore_mem>>)
    %c0_i32_96 = arith.constant 0 : i32
    %c0_i32_97 = arith.constant 0 : i32
    %160 = tpu.memref_slice %arg1[%0, %c0_i32_97] : memref<100x50xf32, #tpu.memory_space<any>> -> memref<1x50xf32, #tpu.memory_space<any>>
    %c0_i32_98 = arith.constant 0 : i32
    %c0_i32_99 = arith.constant 0 : i32
    %161 = tpu.memref_slice %arg16[%c0_i32_98, %c0_i32_99] : memref<32x50xf32, #tpu.memory_space<vmem>> -> memref<1x50xf32, #tpu.memory_space<vmem>>
    %162 = tpu.memref_slice %arg17[%c0_i32_96] : memref<32x!tpu.dma_semaphore, #tpu.memory_space<semaphore_mem>> -> memref<1x!tpu.dma_semaphore, #tpu.memory_space<semaphore_mem>>
    %163 = tpu.memref_squeeze %162 : memref<1x!tpu.dma_semaphore, #tpu.memory_space<semaphore_mem>> -> memref<!tpu.dma_semaphore, #tpu.memory_space<semaphore_mem>>
    tpu.wait_dma2 semaphore(%163 : memref<!tpu.dma_semaphore, #tpu.memory_space<semaphore_mem>>) src(%160 : memref<1x50xf32, #tpu.memory_space<any>>) dst(%161 : memref<1x50xf32, #tpu.memory_space<vmem>>)
    %c1_i32_100 = arith.constant 1 : i32
    %c0_i32_101 = arith.constant 0 : i32
    %164 = tpu.memref_slice %arg1[%5, %c0_i32_101] : memref<100x50xf32, #tpu.memory_space<any>> -> memref<1x50xf32, #tpu.memory_space<any>>
    %c1_i32_102 = arith.constant 1 : i32
    %c0_i32_103 = arith.constant 0 : i32
    %165 = tpu.memref_slice %arg16[%c1_i32_102, %c0_i32_103] : memref<32x50xf32, #tpu.memory_space<vmem>> -> memref<1x50xf32, #tpu.memory_space<vmem>>
    %166 = tpu.memref_slice %arg17[%c1_i32_100] : memref<32x!tpu.dma_semaphore, #tpu.memory_space<semaphore_mem>> -> memref<1x!tpu.dma_semaphore, #tpu.memory_space<semaphore_mem>>
    %167 = tpu.memref_squeeze %166 : memref<1x!tpu.dma_semaphore, #tpu.memory_space<semaphore_mem>> -> memref<!tpu.dma_semaphore, #tpu.memory_space<semaphore_mem>>
    tpu.wait_dma2 semaphore(%167 : memref<!tpu.dma_semaphore, #tpu.memory_space<semaphore_mem>>) src(%164 : memref<1x50xf32, #tpu.memory_space<any>>) dst(%165 : memref<1x50xf32, #tpu.memory_space<vmem>>)
    %c2_i32_104 = arith.constant 2 : i32
    %c0_i32_105 = arith.constant 0 : i32
    %168 = tpu.memref_slice %arg1[%10, %c0_i32_105] : memref<100x50xf32, #tpu.memory_space<any>> -> memref<1x50xf32, #tpu.memory_space<any>>
    %c2_i32_106 = arith.constant 2 : i32
    %c0_i32_107 = arith.constant 0 : i32
    %169 = tpu.memref_slice %arg16[%c2_i32_106, %c0_i32_107] : memref<32x50xf32, #tpu.memory_space<vmem>> -> memref<1x50xf32, #tpu.memory_space<vmem>>
    %170 = tpu.memref_slice %arg17[%c2_i32_104] : memref<32x!tpu.dma_semaphore, #tpu.memory_space<semaphore_mem>> -> memref<1x!tpu.dma_semaphore, #tpu.memory_space<semaphore_mem>>
    %171 = tpu.memref_squeeze %170 : memref<1x!tpu.dma_semaphore, #tpu.memory_space<semaphore_mem>> -> memref<!tpu.dma_semaphore, #tpu.memory_space<semaphore_mem>>
    tpu.wait_dma2 semaphore(%171 : memref<!tpu.dma_semaphore, #tpu.memory_space<semaphore_mem>>) src(%168 : memref<1x50xf32, #tpu.memory_space<any>>) dst(%169 : memref<1x50xf32, #tpu.memory_space<vmem>>)
    %c3_i32_108 = arith.constant 3 : i32
    %c0_i32_109 = arith.constant 0 : i32
    %172 = tpu.memref_slice %arg1[%15, %c0_i32_109] : memref<100x50xf32, #tpu.memory_space<any>> -> memref<1x50xf32, #tpu.memory_space<any>>
    %c3_i32_110 = arith.constant 3 : i32
    %c0_i32_111 = arith.constant 0 : i32
    %173 = tpu.memref_slice %arg16[%c3_i32_110, %c0_i32_111] : memref<32x50xf32, #tpu.memory_space<vmem>> -> memref<1x50xf32, #tpu.memory_space<vmem>>
    %174 = tpu.memref_slice %arg17[%c3_i32_108] : memref<32x!tpu.dma_semaphore, #tpu.memory_space<semaphore_mem>> -> memref<1x!tpu.dma_semaphore, #tpu.memory_space<semaphore_mem>>
    %175 = tpu.memref_squeeze %174 : memref<1x!tpu.dma_semaphore, #tpu.memory_space<semaphore_mem>> -> memref<!tpu.dma_semaphore, #tpu.memory_space<semaphore_mem>>
    tpu.wait_dma2 semaphore(%175 : memref<!tpu.dma_semaphore, #tpu.memory_space<semaphore_mem>>) src(%172 : memref<1x50xf32, #tpu.memory_space<any>>) dst(%173 : memref<1x50xf32, #tpu.memory_space<vmem>>)
    %c4_i32_112 = arith.constant 4 : i32
    %c0_i32_113 = arith.constant 0 : i32
    %176 = tpu.memref_slice %arg1[%20, %c0_i32_113] : memref<100x50xf32, #tpu.memory_space<any>> -> memref<1x50xf32, #tpu.memory_space<any>>
    %c4_i32_114 = arith.constant 4 : i32
    %c0_i32_115 = arith.constant 0 : i32
    %177 = tpu.memref_slice %arg16[%c4_i32_114, %c0_i32_115] : memref<32x50xf32, #tpu.memory_space<vmem>> -> memref<1x50xf32, #tpu.memory_space<vmem>>
    %178 = tpu.memref_slice %arg17[%c4_i32_112] : memref<32x!tpu.dma_semaphore, #tpu.memory_space<semaphore_mem>> -> memref<1x!tpu.dma_semaphore, #tpu.memory_space<semaphore_mem>>
    %179 = tpu.memref_squeeze %178 : memref<1x!tpu.dma_semaphore, #tpu.memory_space<semaphore_mem>> -> memref<!tpu.dma_semaphore, #tpu.memory_space<semaphore_mem>>
    tpu.wait_dma2 semaphore(%179 : memref<!tpu.dma_semaphore, #tpu.memory_space<semaphore_mem>>) src(%176 : memref<1x50xf32, #tpu.memory_space<any>>) dst(%177 : memref<1x50xf32, #tpu.memory_space<vmem>>)
    %c5_i32_116 = arith.constant 5 : i32
    %c0_i32_117 = arith.constant 0 : i32
    %180 = tpu.memref_slice %arg1[%25, %c0_i32_117] : memref<100x50xf32, #tpu.memory_space<any>> -> memref<1x50xf32, #tpu.memory_space<any>>
    %c5_i32_118 = arith.constant 5 : i32
    %c0_i32_119 = arith.constant 0 : i32
    %181 = tpu.memref_slice %arg16[%c5_i32_118, %c0_i32_119] : memref<32x50xf32, #tpu.memory_space<vmem>> -> memref<1x50xf32, #tpu.memory_space<vmem>>
    %182 = tpu.memref_slice %arg17[%c5_i32_116] : memref<32x!tpu.dma_semaphore, #tpu.memory_space<semaphore_mem>> -> memref<1x!tpu.dma_semaphore, #tpu.memory_space<semaphore_mem>>
    %183 = tpu.memref_squeeze %182 : memref<1x!tpu.dma_semaphore, #tpu.memory_space<semaphore_mem>> -> memref<!tpu.dma_semaphore, #tpu.memory_space<semaphore_mem>>
    tpu.wait_dma2 semaphore(%183 : memref<!tpu.dma_semaphore, #tpu.memory_space<semaphore_mem>>) src(%180 : memref<1x50xf32, #tpu.memory_space<any>>) dst(%181 : memref<1x50xf32, #tpu.memory_space<vmem>>)
    %c6_i32_120 = arith.constant 6 : i32
    %c0_i32_121 = arith.constant 0 : i32
    %184 = tpu.memref_slice %arg1[%30, %c0_i32_121] : memref<100x50xf32, #tpu.memory_space<any>> -> memref<1x50xf32, #tpu.memory_space<any>>
    %c6_i32_122 = arith.constant 6 : i32
    %c0_i32_123 = arith.constant 0 : i32
    %185 = tpu.memref_slice %arg16[%c6_i32_122, %c0_i32_123] : memref<32x50xf32, #tpu.memory_space<vmem>> -> memref<1x50xf32, #tpu.memory_space<vmem>>
    %186 = tpu.memref_slice %arg17[%c6_i32_120] : memref<32x!tpu.dma_semaphore, #tpu.memory_space<semaphore_mem>> -> memref<1x!tpu.dma_semaphore, #tpu.memory_space<semaphore_mem>>
    %187 = tpu.memref_squeeze %186 : memref<1x!tpu.dma_semaphore, #tpu.memory_space<semaphore_mem>> -> memref<!tpu.dma_semaphore, #tpu.memory_space<semaphore_mem>>
    tpu.wait_dma2 semaphore(%187 : memref<!tpu.dma_semaphore, #tpu.memory_space<semaphore_mem>>) src(%184 : memref<1x50xf32, #tpu.memory_space<any>>) dst(%185 : memref<1x50xf32, #tpu.memory_space<vmem>>)
    %c7_i32_124 = arith.constant 7 : i32
    %c0_i32_125 = arith.constant 0 : i32
    %188 = tpu.memref_slice %arg1[%35, %c0_i32_125] : memref<100x50xf32, #tpu.memory_space<any>> -> memref<1x50xf32, #tpu.memory_space<any>>
    %c7_i32_126 = arith.constant 7 : i32
    %c0_i32_127 = arith.constant 0 : i32
    %189 = tpu.memref_slice %arg16[%c7_i32_126, %c0_i32_127] : memref<32x50xf32, #tpu.memory_space<vmem>> -> memref<1x50xf32, #tpu.memory_space<vmem>>
    %190 = tpu.memref_slice %arg17[%c7_i32_124] : memref<32x!tpu.dma_semaphore, #tpu.memory_space<semaphore_mem>> -> memref<1x!tpu.dma_semaphore, #tpu.memory_space<semaphore_mem>>
    %191 = tpu.memref_squeeze %190 : memref<1x!tpu.dma_semaphore, #tpu.memory_space<semaphore_mem>> -> memref<!tpu.dma_semaphore, #tpu.memory_space<semaphore_mem>>
    tpu.wait_dma2 semaphore(%191 : memref<!tpu.dma_semaphore, #tpu.memory_space<semaphore_mem>>) src(%188 : memref<1x50xf32, #tpu.memory_space<any>>) dst(%189 : memref<1x50xf32, #tpu.memory_space<vmem>>)
    %c8_i32_128 = arith.constant 8 : i32
    %c0_i32_129 = arith.constant 0 : i32
    %192 = tpu.memref_slice %arg1[%40, %c0_i32_129] : memref<100x50xf32, #tpu.memory_space<any>> -> memref<1x50xf32, #tpu.memory_space<any>>
    %c8_i32_130 = arith.constant 8 : i32
    %c0_i32_131 = arith.constant 0 : i32
    %193 = tpu.memref_slice %arg16[%c8_i32_130, %c0_i32_131] : memref<32x50xf32, #tpu.memory_space<vmem>> -> memref<1x50xf32, #tpu.memory_space<vmem>>
    %194 = tpu.memref_slice %arg17[%c8_i32_128] : memref<32x!tpu.dma_semaphore, #tpu.memory_space<semaphore_mem>> -> memref<1x!tpu.dma_semaphore, #tpu.memory_space<semaphore_mem>>
    %195 = tpu.memref_squeeze %194 : memref<1x!tpu.dma_semaphore, #tpu.memory_space<semaphore_mem>> -> memref<!tpu.dma_semaphore, #tpu.memory_space<semaphore_mem>>
    tpu.wait_dma2 semaphore(%195 : memref<!tpu.dma_semaphore, #tpu.memory_space<semaphore_mem>>) src(%192 : memref<1x50xf32, #tpu.memory_space<any>>) dst(%193 : memref<1x50xf32, #tpu.memory_space<vmem>>)
    %c9_i32_132 = arith.constant 9 : i32
    %c0_i32_133 = arith.constant 0 : i32
    %196 = tpu.memref_slice %arg1[%45, %c0_i32_133] : memref<100x50xf32, #tpu.memory_space<any>> -> memref<1x50xf32, #tpu.memory_space<any>>
    %c9_i32_134 = arith.constant 9 : i32
    %c0_i32_135 = arith.constant 0 : i32
    %197 = tpu.memref_slice %arg16[%c9_i32_134, %c0_i32_135] : memref<32x50xf32, #tpu.memory_space<vmem>> -> memref<1x50xf32, #tpu.memory_space<vmem>>
    %198 = tpu.memref_slice %arg17[%c9_i32_132] : memref<32x!tpu.dma_semaphore, #tpu.memory_space<semaphore_mem>> -> memref<1x!tpu.dma_semaphore, #tpu.memory_space<semaphore_mem>>
    %199 = tpu.memref_squeeze %198 : memref<1x!tpu.dma_semaphore, #tpu.memory_space<semaphore_mem>> -> memref<!tpu.dma_semaphore, #tpu.memory_space<semaphore_mem>>
    tpu.wait_dma2 semaphore(%199 : memref<!tpu.dma_semaphore, #tpu.memory_space<semaphore_mem>>) src(%196 : memref<1x50xf32, #tpu.memory_space<any>>) dst(%197 : memref<1x50xf32, #tpu.memory_space<vmem>>)
    %c10_i32_136 = arith.constant 10 : i32
    %c0_i32_137 = arith.constant 0 : i32
    %200 = tpu.memref_slice %arg1[%50, %c0_i32_137] : memref<100x50xf32, #tpu.memory_space<any>> -> memref<1x50xf32, #tpu.memory_space<any>>
    %c10_i32_138 = arith.constant 10 : i32
    %c0_i32_139 = arith.constant 0 : i32
    %201 = tpu.memref_slice %arg16[%c10_i32_138, %c0_i32_139] : memref<32x50xf32, #tpu.memory_space<vmem>> -> memref<1x50xf32, #tpu.memory_space<vmem>>
    %202 = tpu.memref_slice %arg17[%c10_i32_136] : memref<32x!tpu.dma_semaphore, #tpu.memory_space<semaphore_mem>> -> memref<1x!tpu.dma_semaphore, #tpu.memory_space<semaphore_mem>>
    %203 = tpu.memref_squeeze %202 : memref<1x!tpu.dma_semaphore, #tpu.memory_space<semaphore_mem>> -> memref<!tpu.dma_semaphore, #tpu.memory_space<semaphore_mem>>
    tpu.wait_dma2 semaphore(%203 : memref<!tpu.dma_semaphore, #tpu.memory_space<semaphore_mem>>) src(%200 : memref<1x50xf32, #tpu.memory_space<any>>) dst(%201 : memref<1x50xf32, #tpu.memory_space<vmem>>)
    %c11_i32_140 = arith.constant 11 : i32
    %c0_i32_141 = arith.constant 0 : i32
    %204 = tpu.memref_slice %arg1[%55, %c0_i32_141] : memref<100x50xf32, #tpu.memory_space<any>> -> memref<1x50xf32, #tpu.memory_space<any>>
    %c11_i32_142 = arith.constant 11 : i32
    %c0_i32_143 = arith.constant 0 : i32
    %205 = tpu.memref_slice %arg16[%c11_i32_142, %c0_i32_143] : memref<32x50xf32, #tpu.memory_space<vmem>> -> memref<1x50xf32, #tpu.memory_space<vmem>>
    %206 = tpu.memref_slice %arg17[%c11_i32_140] : memref<32x!tpu.dma_semaphore, #tpu.memory_space<semaphore_mem>> -> memref<1x!tpu.dma_semaphore, #tpu.memory_space<semaphore_mem>>
    %207 = tpu.memref_squeeze %206 : memref<1x!tpu.dma_semaphore, #tpu.memory_space<semaphore_mem>> -> memref<!tpu.dma_semaphore, #tpu.memory_space<semaphore_mem>>
    tpu.wait_dma2 semaphore(%207 : memref<!tpu.dma_semaphore, #tpu.memory_space<semaphore_mem>>) src(%204 : memref<1x50xf32, #tpu.memory_space<any>>) dst(%205 : memref<1x50xf32, #tpu.memory_space<vmem>>)
    %c12_i32_144 = arith.constant 12 : i32
    %c0_i32_145 = arith.constant 0 : i32
    %208 = tpu.memref_slice %arg1[%60, %c0_i32_145] : memref<100x50xf32, #tpu.memory_space<any>> -> memref<1x50xf32, #tpu.memory_space<any>>
    %c12_i32_146 = arith.constant 12 : i32
    %c0_i32_147 = arith.constant 0 : i32
    %209 = tpu.memref_slice %arg16[%c12_i32_146, %c0_i32_147] : memref<32x50xf32, #tpu.memory_space<vmem>> -> memref<1x50xf32, #tpu.memory_space<vmem>>
    %210 = tpu.memref_slice %arg17[%c12_i32_144] : memref<32x!tpu.dma_semaphore, #tpu.memory_space<semaphore_mem>> -> memref<1x!tpu.dma_semaphore, #tpu.memory_space<semaphore_mem>>
    %211 = tpu.memref_squeeze %210 : memref<1x!tpu.dma_semaphore, #tpu.memory_space<semaphore_mem>> -> memref<!tpu.dma_semaphore, #tpu.memory_space<semaphore_mem>>
    tpu.wait_dma2 semaphore(%211 : memref<!tpu.dma_semaphore, #tpu.memory_space<semaphore_mem>>) src(%208 : memref<1x50xf32, #tpu.memory_space<any>>) dst(%209 : memref<1x50xf32, #tpu.memory_space<vmem>>)
    %c13_i32_148 = arith.constant 13 : i32
    %c0_i32_149 = arith.constant 0 : i32
    %212 = tpu.memref_slice %arg1[%65, %c0_i32_149] : memref<100x50xf32, #tpu.memory_space<any>> -> memref<1x50xf32, #tpu.memory_space<any>>
    %c13_i32_150 = arith.constant 13 : i32
    %c0_i32_151 = arith.constant 0 : i32
    %213 = tpu.memref_slice %arg16[%c13_i32_150, %c0_i32_151] : memref<32x50xf32, #tpu.memory_space<vmem>> -> memref<1x50xf32, #tpu.memory_space<vmem>>
    %214 = tpu.memref_slice %arg17[%c13_i32_148] : memref<32x!tpu.dma_semaphore, #tpu.memory_space<semaphore_mem>> -> memref<1x!tpu.dma_semaphore, #tpu.memory_space<semaphore_mem>>
    %215 = tpu.memref_squeeze %214 : memref<1x!tpu.dma_semaphore, #tpu.memory_space<semaphore_mem>> -> memref<!tpu.dma_semaphore, #tpu.memory_space<semaphore_mem>>
    tpu.wait_dma2 semaphore(%215 : memref<!tpu.dma_semaphore, #tpu.memory_space<semaphore_mem>>) src(%212 : memref<1x50xf32, #tpu.memory_space<any>>) dst(%213 : memref<1x50xf32, #tpu.memory_space<vmem>>)
    %c14_i32_152 = arith.constant 14 : i32
    %c0_i32_153 = arith.constant 0 : i32
    %216 = tpu.memref_slice %arg1[%70, %c0_i32_153] : memref<100x50xf32, #tpu.memory_space<any>> -> memref<1x50xf32, #tpu.memory_space<any>>
    %c14_i32_154 = arith.constant 14 : i32
    %c0_i32_155 = arith.constant 0 : i32
    %217 = tpu.memref_slice %arg16[%c14_i32_154, %c0_i32_155] : memref<32x50xf32, #tpu.memory_space<vmem>> -> memref<1x50xf32, #tpu.memory_space<vmem>>
    %218 = tpu.memref_slice %arg17[%c14_i32_152] : memref<32x!tpu.dma_semaphore, #tpu.memory_space<semaphore_mem>> -> memref<1x!tpu.dma_semaphore, #tpu.memory_space<semaphore_mem>>
    %219 = tpu.memref_squeeze %218 : memref<1x!tpu.dma_semaphore, #tpu.memory_space<semaphore_mem>> -> memref<!tpu.dma_semaphore, #tpu.memory_space<semaphore_mem>>
    tpu.wait_dma2 semaphore(%219 : memref<!tpu.dma_semaphore, #tpu.memory_space<semaphore_mem>>) src(%216 : memref<1x50xf32, #tpu.memory_space<any>>) dst(%217 : memref<1x50xf32, #tpu.memory_space<vmem>>)
    %c15_i32_156 = arith.constant 15 : i32
    %c0_i32_157 = arith.constant 0 : i32
    %220 = tpu.memref_slice %arg1[%75, %c0_i32_157] : memref<100x50xf32, #tpu.memory_space<any>> -> memref<1x50xf32, #tpu.memory_space<any>>
    %c15_i32_158 = arith.constant 15 : i32
    %c0_i32_159 = arith.constant 0 : i32
    %221 = tpu.memref_slice %arg16[%c15_i32_158, %c0_i32_159] : memref<32x50xf32, #tpu.memory_space<vmem>> -> memref<1x50xf32, #tpu.memory_space<vmem>>
    %222 = tpu.memref_slice %arg17[%c15_i32_156] : memref<32x!tpu.dma_semaphore, #tpu.memory_space<semaphore_mem>> -> memref<1x!tpu.dma_semaphore, #tpu.memory_space<semaphore_mem>>
    %223 = tpu.memref_squeeze %222 : memref<1x!tpu.dma_semaphore, #tpu.memory_space<semaphore_mem>> -> memref<!tpu.dma_semaphore, #tpu.memory_space<semaphore_mem>>
    tpu.wait_dma2 semaphore(%223 : memref<!tpu.dma_semaphore, #tpu.memory_space<semaphore_mem>>) src(%220 : memref<1x50xf32, #tpu.memory_space<any>>) dst(%221 : memref<1x50xf32, #tpu.memory_space<vmem>>)
    %c16_i32_160 = arith.constant 16 : i32
    %c0_i32_161 = arith.constant 0 : i32
    %224 = tpu.memref_slice %arg1[%80, %c0_i32_161] : memref<100x50xf32, #tpu.memory_space<any>> -> memref<1x50xf32, #tpu.memory_space<any>>
    %c16_i32_162 = arith.constant 16 : i32
    %c0_i32_163 = arith.constant 0 : i32
    %225 = tpu.memref_slice %arg16[%c16_i32_162, %c0_i32_163] : memref<32x50xf32, #tpu.memory_space<vmem>> -> memref<1x50xf32, #tpu.memory_space<vmem>>
    %226 = tpu.memref_slice %arg17[%c16_i32_160] : memref<32x!tpu.dma_semaphore, #tpu.memory_space<semaphore_mem>> -> memref<1x!tpu.dma_semaphore, #tpu.memory_space<semaphore_mem>>
    %227 = tpu.memref_squeeze %226 : memref<1x!tpu.dma_semaphore, #tpu.memory_space<semaphore_mem>> -> memref<!tpu.dma_semaphore, #tpu.memory_space<semaphore_mem>>
    tpu.wait_dma2 semaphore(%227 : memref<!tpu.dma_semaphore, #tpu.memory_space<semaphore_mem>>) src(%224 : memref<1x50xf32, #tpu.memory_space<any>>) dst(%225 : memref<1x50xf32, #tpu.memory_space<vmem>>)
    %c17_i32_164 = arith.constant 17 : i32
    %c0_i32_165 = arith.constant 0 : i32
    %228 = tpu.memref_slice %arg1[%85, %c0_i32_165] : memref<100x50xf32, #tpu.memory_space<any>> -> memref<1x50xf32, #tpu.memory_space<any>>
    %c17_i32_166 = arith.constant 17 : i32
    %c0_i32_167 = arith.constant 0 : i32
    %229 = tpu.memref_slice %arg16[%c17_i32_166, %c0_i32_167] : memref<32x50xf32, #tpu.memory_space<vmem>> -> memref<1x50xf32, #tpu.memory_space<vmem>>
    %230 = tpu.memref_slice %arg17[%c17_i32_164] : memref<32x!tpu.dma_semaphore, #tpu.memory_space<semaphore_mem>> -> memref<1x!tpu.dma_semaphore, #tpu.memory_space<semaphore_mem>>
    %231 = tpu.memref_squeeze %230 : memref<1x!tpu.dma_semaphore, #tpu.memory_space<semaphore_mem>> -> memref<!tpu.dma_semaphore, #tpu.memory_space<semaphore_mem>>
    tpu.wait_dma2 semaphore(%231 : memref<!tpu.dma_semaphore, #tpu.memory_space<semaphore_mem>>) src(%228 : memref<1x50xf32, #tpu.memory_space<any>>) dst(%229 : memref<1x50xf32, #tpu.memory_space<vmem>>)
    %c18_i32_168 = arith.constant 18 : i32
    %c0_i32_169 = arith.constant 0 : i32
    %232 = tpu.memref_slice %arg1[%90, %c0_i32_169] : memref<100x50xf32, #tpu.memory_space<any>> -> memref<1x50xf32, #tpu.memory_space<any>>
    %c18_i32_170 = arith.constant 18 : i32
    %c0_i32_171 = arith.constant 0 : i32
    %233 = tpu.memref_slice %arg16[%c18_i32_170, %c0_i32_171] : memref<32x50xf32, #tpu.memory_space<vmem>> -> memref<1x50xf32, #tpu.memory_space<vmem>>
    %234 = tpu.memref_slice %arg17[%c18_i32_168] : memref<32x!tpu.dma_semaphore, #tpu.memory_space<semaphore_mem>> -> memref<1x!tpu.dma_semaphore, #tpu.memory_space<semaphore_mem>>
    %235 = tpu.memref_squeeze %234 : memref<1x!tpu.dma_semaphore, #tpu.memory_space<semaphore_mem>> -> memref<!tpu.dma_semaphore, #tpu.memory_space<semaphore_mem>>
    tpu.wait_dma2 semaphore(%235 : memref<!tpu.dma_semaphore, #tpu.memory_space<semaphore_mem>>) src(%232 : memref<1x50xf32, #tpu.memory_space<any>>) dst(%233 : memref<1x50xf32, #tpu.memory_space<vmem>>)
    %c19_i32_172 = arith.constant 19 : i32
    %c0_i32_173 = arith.constant 0 : i32
    %236 = tpu.memref_slice %arg1[%95, %c0_i32_173] : memref<100x50xf32, #tpu.memory_space<any>> -> memref<1x50xf32, #tpu.memory_space<any>>
    %c19_i32_174 = arith.constant 19 : i32
    %c0_i32_175 = arith.constant 0 : i32
    %237 = tpu.memref_slice %arg16[%c19_i32_174, %c0_i32_175] : memref<32x50xf32, #tpu.memory_space<vmem>> -> memref<1x50xf32, #tpu.memory_space<vmem>>
    %238 = tpu.memref_slice %arg17[%c19_i32_172] : memref<32x!tpu.dma_semaphore, #tpu.memory_space<semaphore_mem>> -> memref<1x!tpu.dma_semaphore, #tpu.memory_space<semaphore_mem>>
    %239 = tpu.memref_squeeze %238 : memref<1x!tpu.dma_semaphore, #tpu.memory_space<semaphore_mem>> -> memref<!tpu.dma_semaphore, #tpu.memory_space<semaphore_mem>>
    tpu.wait_dma2 semaphore(%239 : memref<!tpu.dma_semaphore, #tpu.memory_space<semaphore_mem>>) src(%236 : memref<1x50xf32, #tpu.memory_space<any>>) dst(%237 : memref<1x50xf32, #tpu.memory_space<vmem>>)
    %c20_i32_176 = arith.constant 20 : i32
    %c0_i32_177 = arith.constant 0 : i32
    %240 = tpu.memref_slice %arg1[%100, %c0_i32_177] : memref<100x50xf32, #tpu.memory_space<any>> -> memref<1x50xf32, #tpu.memory_space<any>>
    %c20_i32_178 = arith.constant 20 : i32
    %c0_i32_179 = arith.constant 0 : i32
    %241 = tpu.memref_slice %arg16[%c20_i32_178, %c0_i32_179] : memref<32x50xf32, #tpu.memory_space<vmem>> -> memref<1x50xf32, #tpu.memory_space<vmem>>
    %242 = tpu.memref_slice %arg17[%c20_i32_176] : memref<32x!tpu.dma_semaphore, #tpu.memory_space<semaphore_mem>> -> memref<1x!tpu.dma_semaphore, #tpu.memory_space<semaphore_mem>>
    %243 = tpu.memref_squeeze %242 : memref<1x!tpu.dma_semaphore, #tpu.memory_space<semaphore_mem>> -> memref<!tpu.dma_semaphore, #tpu.memory_space<semaphore_mem>>
    tpu.wait_dma2 semaphore(%243 : memref<!tpu.dma_semaphore, #tpu.memory_space<semaphore_mem>>) src(%240 : memref<1x50xf32, #tpu.memory_space<any>>) dst(%241 : memref<1x50xf32, #tpu.memory_space<vmem>>)
    %c21_i32_180 = arith.constant 21 : i32
    %c0_i32_181 = arith.constant 0 : i32
    %244 = tpu.memref_slice %arg1[%105, %c0_i32_181] : memref<100x50xf32, #tpu.memory_space<any>> -> memref<1x50xf32, #tpu.memory_space<any>>
    %c21_i32_182 = arith.constant 21 : i32
    %c0_i32_183 = arith.constant 0 : i32
    %245 = tpu.memref_slice %arg16[%c21_i32_182, %c0_i32_183] : memref<32x50xf32, #tpu.memory_space<vmem>> -> memref<1x50xf32, #tpu.memory_space<vmem>>
    %246 = tpu.memref_slice %arg17[%c21_i32_180] : memref<32x!tpu.dma_semaphore, #tpu.memory_space<semaphore_mem>> -> memref<1x!tpu.dma_semaphore, #tpu.memory_space<semaphore_mem>>
    %247 = tpu.memref_squeeze %246 : memref<1x!tpu.dma_semaphore, #tpu.memory_space<semaphore_mem>> -> memref<!tpu.dma_semaphore, #tpu.memory_space<semaphore_mem>>
    tpu.wait_dma2 semaphore(%247 : memref<!tpu.dma_semaphore, #tpu.memory_space<semaphore_mem>>) src(%244 : memref<1x50xf32, #tpu.memory_space<any>>) dst(%245 : memref<1x50xf32, #tpu.memory_space<vmem>>)
    %c22_i32_184 = arith.constant 22 : i32
    %c0_i32_185 = arith.constant 0 : i32
    %248 = tpu.memref_slice %arg1[%110, %c0_i32_185] : memref<100x50xf32, #tpu.memory_space<any>> -> memref<1x50xf32, #tpu.memory_space<any>>
    %c22_i32_186 = arith.constant 22 : i32
    %c0_i32_187 = arith.constant 0 : i32
    %249 = tpu.memref_slice %arg16[%c22_i32_186, %c0_i32_187] : memref<32x50xf32, #tpu.memory_space<vmem>> -> memref<1x50xf32, #tpu.memory_space<vmem>>
    %250 = tpu.memref_slice %arg17[%c22_i32_184] : memref<32x!tpu.dma_semaphore, #tpu.memory_space<semaphore_mem>> -> memref<1x!tpu.dma_semaphore, #tpu.memory_space<semaphore_mem>>
    %251 = tpu.memref_squeeze %250 : memref<1x!tpu.dma_semaphore, #tpu.memory_space<semaphore_mem>> -> memref<!tpu.dma_semaphore, #tpu.memory_space<semaphore_mem>>
    tpu.wait_dma2 semaphore(%251 : memref<!tpu.dma_semaphore, #tpu.memory_space<semaphore_mem>>) src(%248 : memref<1x50xf32, #tpu.memory_space<any>>) dst(%249 : memref<1x50xf32, #tpu.memory_space<vmem>>)
    %c23_i32_188 = arith.constant 23 : i32
    %c0_i32_189 = arith.constant 0 : i32
    %252 = tpu.memref_slice %arg1[%115, %c0_i32_189] : memref<100x50xf32, #tpu.memory_space<any>> -> memref<1x50xf32, #tpu.memory_space<any>>
    %c23_i32_190 = arith.constant 23 : i32
    %c0_i32_191 = arith.constant 0 : i32
    %253 = tpu.memref_slice %arg16[%c23_i32_190, %c0_i32_191] : memref<32x50xf32, #tpu.memory_space<vmem>> -> memref<1x50xf32, #tpu.memory_space<vmem>>
    %254 = tpu.memref_slice %arg17[%c23_i32_188] : memref<32x!tpu.dma_semaphore, #tpu.memory_space<semaphore_mem>> -> memref<1x!tpu.dma_semaphore, #tpu.memory_space<semaphore_mem>>
    %255 = tpu.memref_squeeze %254 : memref<1x!tpu.dma_semaphore, #tpu.memory_space<semaphore_mem>> -> memref<!tpu.dma_semaphore, #tpu.memory_space<semaphore_mem>>
    tpu.wait_dma2 semaphore(%255 : memref<!tpu.dma_semaphore, #tpu.memory_space<semaphore_mem>>) src(%252 : memref<1x50xf32, #tpu.memory_space<any>>) dst(%253 : memref<1x50xf32, #tpu.memory_space<vmem>>)
    %c24_i32_192 = arith.constant 24 : i32
    %c0_i32_193 = arith.constant 0 : i32
    %256 = tpu.memref_slice %arg1[%120, %c0_i32_193] : memref<100x50xf32, #tpu.memory_space<any>> -> memref<1x50xf32, #tpu.memory_space<any>>
    %c24_i32_194 = arith.constant 24 : i32
    %c0_i32_195 = arith.constant 0 : i32
    %257 = tpu.memref_slice %arg16[%c24_i32_194, %c0_i32_195] : memref<32x50xf32, #tpu.memory_space<vmem>> -> memref<1x50xf32, #tpu.memory_space<vmem>>
    %258 = tpu.memref_slice %arg17[%c24_i32_192] : memref<32x!tpu.dma_semaphore, #tpu.memory_space<semaphore_mem>> -> memref<1x!tpu.dma_semaphore, #tpu.memory_space<semaphore_mem>>
    %259 = tpu.memref_squeeze %258 : memref<1x!tpu.dma_semaphore, #tpu.memory_space<semaphore_mem>> -> memref<!tpu.dma_semaphore, #tpu.memory_space<semaphore_mem>>
    tpu.wait_dma2 semaphore(%259 : memref<!tpu.dma_semaphore, #tpu.memory_space<semaphore_mem>>) src(%256 : memref<1x50xf32, #tpu.memory_space<any>>) dst(%257 : memref<1x50xf32, #tpu.memory_space<vmem>>)
    %c25_i32_196 = arith.constant 25 : i32
    %c0_i32_197 = arith.constant 0 : i32
    %260 = tpu.memref_slice %arg1[%125, %c0_i32_197] : memref<100x50xf32, #tpu.memory_space<any>> -> memref<1x50xf32, #tpu.memory_space<any>>
    %c25_i32_198 = arith.constant 25 : i32
    %c0_i32_199 = arith.constant 0 : i32
    %261 = tpu.memref_slice %arg16[%c25_i32_198, %c0_i32_199] : memref<32x50xf32, #tpu.memory_space<vmem>> -> memref<1x50xf32, #tpu.memory_space<vmem>>
    %262 = tpu.memref_slice %arg17[%c25_i32_196] : memref<32x!tpu.dma_semaphore, #tpu.memory_space<semaphore_mem>> -> memref<1x!tpu.dma_semaphore, #tpu.memory_space<semaphore_mem>>
    %263 = tpu.memref_squeeze %262 : memref<1x!tpu.dma_semaphore, #tpu.memory_space<semaphore_mem>> -> memref<!tpu.dma_semaphore, #tpu.memory_space<semaphore_mem>>
    tpu.wait_dma2 semaphore(%263 : memref<!tpu.dma_semaphore, #tpu.memory_space<semaphore_mem>>) src(%260 : memref<1x50xf32, #tpu.memory_space<any>>) dst(%261 : memref<1x50xf32, #tpu.memory_space<vmem>>)
    %c26_i32_200 = arith.constant 26 : i32
    %c0_i32_201 = arith.constant 0 : i32
    %264 = tpu.memref_slice %arg1[%130, %c0_i32_201] : memref<100x50xf32, #tpu.memory_space<any>> -> memref<1x50xf32, #tpu.memory_space<any>>
    %c26_i32_202 = arith.constant 26 : i32
    %c0_i32_203 = arith.constant 0 : i32
    %265 = tpu.memref_slice %arg16[%c26_i32_202, %c0_i32_203] : memref<32x50xf32, #tpu.memory_space<vmem>> -> memref<1x50xf32, #tpu.memory_space<vmem>>
    %266 = tpu.memref_slice %arg17[%c26_i32_200] : memref<32x!tpu.dma_semaphore, #tpu.memory_space<semaphore_mem>> -> memref<1x!tpu.dma_semaphore, #tpu.memory_space<semaphore_mem>>
    %267 = tpu.memref_squeeze %266 : memref<1x!tpu.dma_semaphore, #tpu.memory_space<semaphore_mem>> -> memref<!tpu.dma_semaphore, #tpu.memory_space<semaphore_mem>>
    tpu.wait_dma2 semaphore(%267 : memref<!tpu.dma_semaphore, #tpu.memory_space<semaphore_mem>>) src(%264 : memref<1x50xf32, #tpu.memory_space<any>>) dst(%265 : memref<1x50xf32, #tpu.memory_space<vmem>>)
    %c27_i32_204 = arith.constant 27 : i32
    %c0_i32_205 = arith.constant 0 : i32
    %268 = tpu.memref_slice %arg1[%135, %c0_i32_205] : memref<100x50xf32, #tpu.memory_space<any>> -> memref<1x50xf32, #tpu.memory_space<any>>
    %c27_i32_206 = arith.constant 27 : i32
    %c0_i32_207 = arith.constant 0 : i32
    %269 = tpu.memref_slice %arg16[%c27_i32_206, %c0_i32_207] : memref<32x50xf32, #tpu.memory_space<vmem>> -> memref<1x50xf32, #tpu.memory_space<vmem>>
    %270 = tpu.memref_slice %arg17[%c27_i32_204] : memref<32x!tpu.dma_semaphore, #tpu.memory_space<semaphore_mem>> -> memref<1x!tpu.dma_semaphore, #tpu.memory_space<semaphore_mem>>
    %271 = tpu.memref_squeeze %270 : memref<1x!tpu.dma_semaphore, #tpu.memory_space<semaphore_mem>> -> memref<!tpu.dma_semaphore, #tpu.memory_space<semaphore_mem>>
    tpu.wait_dma2 semaphore(%271 : memref<!tpu.dma_semaphore, #tpu.memory_space<semaphore_mem>>) src(%268 : memref<1x50xf32, #tpu.memory_space<any>>) dst(%269 : memref<1x50xf32, #tpu.memory_space<vmem>>)
    %c28_i32_208 = arith.constant 28 : i32
    %c0_i32_209 = arith.constant 0 : i32
    %272 = tpu.memref_slice %arg1[%140, %c0_i32_209] : memref<100x50xf32, #tpu.memory_space<any>> -> memref<1x50xf32, #tpu.memory_space<any>>
    %c28_i32_210 = arith.constant 28 : i32
    %c0_i32_211 = arith.constant 0 : i32
    %273 = tpu.memref_slice %arg16[%c28_i32_210, %c0_i32_211] : memref<32x50xf32, #tpu.memory_space<vmem>> -> memref<1x50xf32, #tpu.memory_space<vmem>>
    %274 = tpu.memref_slice %arg17[%c28_i32_208] : memref<32x!tpu.dma_semaphore, #tpu.memory_space<semaphore_mem>> -> memref<1x!tpu.dma_semaphore, #tpu.memory_space<semaphore_mem>>
    %275 = tpu.memref_squeeze %274 : memref<1x!tpu.dma_semaphore, #tpu.memory_space<semaphore_mem>> -> memref<!tpu.dma_semaphore, #tpu.memory_space<semaphore_mem>>
    tpu.wait_dma2 semaphore(%275 : memref<!tpu.dma_semaphore, #tpu.memory_space<semaphore_mem>>) src(%272 : memref<1x50xf32, #tpu.memory_space<any>>) dst(%273 : memref<1x50xf32, #tpu.memory_space<vmem>>)
    %c29_i32_212 = arith.constant 29 : i32
    %c0_i32_213 = arith.constant 0 : i32
    %276 = tpu.memref_slice %arg1[%145, %c0_i32_213] : memref<100x50xf32, #tpu.memory_space<any>> -> memref<1x50xf32, #tpu.memory_space<any>>
    %c29_i32_214 = arith.constant 29 : i32
    %c0_i32_215 = arith.constant 0 : i32
    %277 = tpu.memref_slice %arg16[%c29_i32_214, %c0_i32_215] : memref<32x50xf32, #tpu.memory_space<vmem>> -> memref<1x50xf32, #tpu.memory_space<vmem>>
    %278 = tpu.memref_slice %arg17[%c29_i32_212] : memref<32x!tpu.dma_semaphore, #tpu.memory_space<semaphore_mem>> -> memref<1x!tpu.dma_semaphore, #tpu.memory_space<semaphore_mem>>
    %279 = tpu.memref_squeeze %278 : memref<1x!tpu.dma_semaphore, #tpu.memory_space<semaphore_mem>> -> memref<!tpu.dma_semaphore, #tpu.memory_space<semaphore_mem>>
    tpu.wait_dma2 semaphore(%279 : memref<!tpu.dma_semaphore, #tpu.memory_space<semaphore_mem>>) src(%276 : memref<1x50xf32, #tpu.memory_space<any>>) dst(%277 : memref<1x50xf32, #tpu.memory_space<vmem>>)
    %c30_i32_216 = arith.constant 30 : i32
    %c0_i32_217 = arith.constant 0 : i32
    %280 = tpu.memref_slice %arg1[%150, %c0_i32_217] : memref<100x50xf32, #tpu.memory_space<any>> -> memref<1x50xf32, #tpu.memory_space<any>>
    %c30_i32_218 = arith.constant 30 : i32
    %c0_i32_219 = arith.constant 0 : i32
    %281 = tpu.memref_slice %arg16[%c30_i32_218, %c0_i32_219] : memref<32x50xf32, #tpu.memory_space<vmem>> -> memref<1x50xf32, #tpu.memory_space<vmem>>
    %282 = tpu.memref_slice %arg17[%c30_i32_216] : memref<32x!tpu.dma_semaphore, #tpu.memory_space<semaphore_mem>> -> memref<1x!tpu.dma_semaphore, #tpu.memory_space<semaphore_mem>>
    %283 = tpu.memref_squeeze %282 : memref<1x!tpu.dma_semaphore, #tpu.memory_space<semaphore_mem>> -> memref<!tpu.dma_semaphore, #tpu.memory_space<semaphore_mem>>
    tpu.wait_dma2 semaphore(%283 : memref<!tpu.dma_semaphore, #tpu.memory_space<semaphore_mem>>) src(%280 : memref<1x50xf32, #tpu.memory_space<any>>) dst(%281 : memref<1x50xf32, #tpu.memory_space<vmem>>)
    %c31_i32_220 = arith.constant 31 : i32
    %c0_i32_221 = arith.constant 0 : i32
    %284 = tpu.memref_slice %arg1[%155, %c0_i32_221] : memref<100x50xf32, #tpu.memory_space<any>> -> memref<1x50xf32, #tpu.memory_space<any>>
    %c31_i32_222 = arith.constant 31 : i32
    %c0_i32_223 = arith.constant 0 : i32
    %285 = tpu.memref_slice %arg16[%c31_i32_222, %c0_i32_223] : memref<32x50xf32, #tpu.memory_space<vmem>> -> memref<1x50xf32, #tpu.memory_space<vmem>>
    %286 = tpu.memref_slice %arg17[%c31_i32_220] : memref<32x!tpu.dma_semaphore, #tpu.memory_space<semaphore_mem>> -> memref<1x!tpu.dma_semaphore, #tpu.memory_space<semaphore_mem>>
    %287 = tpu.memref_squeeze %286 : memref<1x!tpu.dma_semaphore, #tpu.memory_space<semaphore_mem>> -> memref<!tpu.dma_semaphore, #tpu.memory_space<semaphore_mem>>
    tpu.wait_dma2 semaphore(%287 : memref<!tpu.dma_semaphore, #tpu.memory_space<semaphore_mem>>) src(%284 : memref<1x50xf32, #tpu.memory_space<any>>) dst(%285 : memref<1x50xf32, #tpu.memory_space<vmem>>)
    %c0_224 = arith.constant 0 : index
    %c0_225 = arith.constant 0 : index
    %288 = vector.load %arg16[%c0_224, %c0_225] : memref<32x50xf32, #tpu.memory_space<vmem>>, vector<32x50xf32>
    %289 = vector.extract_strided_slice %288 {offsets = [0, 0], sizes = [15, 50], strides = [1, 1]} : vector<32x50xf32> to vector<15x50xf32>
    %290 = vector.extract_strided_slice %288 {offsets = [1, 0], sizes = [15, 50], strides = [1, 1]} : vector<32x50xf32> to vector<15x50xf32>
    %291 = tpu.concatenate %289, %290 in 1 : vector<15x50xf32>, vector<15x50xf32> -> vector<15x100xf32>
    %292 = vector.extract_strided_slice %288 {offsets = [16, 0], sizes = [15, 50], strides = [1, 1]} : vector<32x50xf32> to vector<15x50xf32>
    %293 = vector.extract_strided_slice %288 {offsets = [17, 0], sizes = [15, 50], strides = [1, 1]} : vector<32x50xf32> to vector<15x50xf32>
    %294 = tpu.concatenate %292, %293 in 1 : vector<15x50xf32>, vector<15x50xf32> -> vector<15x100xf32>
    %295 = tpu.concatenate %291, %294 in 0 : vector<15x100xf32>, vector<15x100xf32> -> vector<30x100xf32>
    %c0_226 = arith.constant 0 : index
    %c0_227 = arith.constant 0 : index
    %296 = vector.load %arg2[%c0_226, %c0_227] : memref<100x30xf32, #tpu.memory_space<vmem>>, vector<100x30xf32>
    %cst = arith.constant dense<0.000000e+00> : vector<30x30xf32>
    %297 = tpu.matmul %295, %296, %cst {dimension_numbers = #tpu.dot_dimension_numbers<[1], [0], [0], [1], [0, 0, 1, 1], [], []>} : vector<30x100xf32>, vector<100x30xf32>, vector<30x30xf32> -> vector<30x30xf32>
    %c0_228 = arith.constant 0 : index
    %c0_229 = arith.constant 0 : index
    %298 = vector.load %arg6[%c0_228, %c0_229] : memref<1x30xf32, #tpu.memory_space<vmem>>, vector<1x30xf32>
    %299 = vector.broadcast %298 : vector<1x30xf32> to vector<30x30xf32>
    %300 = arith.addf %297, %299 : vector<30x30xf32>
    %cst_230 = arith.constant 0.000000e+00 : f32
    %301 = vector.broadcast %cst_230 : f32 to vector<30x30xf32>
    %302 = arith.maximumf %300, %301 : vector<30x30xf32>
    %303 = vector.extract_strided_slice %302 {offsets = [0, 0], sizes = [15, 30], strides = [1, 1]} : vector<30x30xf32> to vector<15x30xf32>
    %cst_231 = arith.constant dense<0xFF800000> : vector<30xf32>
    %304 = vector.multi_reduction <maximumf>, %303, %cst_231 [0] : vector<15x30xf32> to vector<30xf32>
    %305 = vector.shape_cast %304 : vector<30xf32> to vector<1x30xf32>
    %306 = vector.extract_strided_slice %302 {offsets = [15, 0], sizes = [15, 30], strides = [1, 1]} : vector<30x30xf32> to vector<15x30xf32>
    %cst_232 = arith.constant dense<0xFF800000> : vector<30xf32>
    %307 = vector.multi_reduction <maximumf>, %306, %cst_232 [0] : vector<15x30xf32> to vector<30xf32>
    %308 = vector.shape_cast %307 : vector<30xf32> to vector<1x30xf32>
    %309 = tpu.concatenate %305, %308 in 0 : vector<1x30xf32>, vector<1x30xf32> -> vector<2x30xf32>
    %c0_233 = arith.constant 0 : index
    %c0_234 = arith.constant 0 : index
    %310 = vector.load %arg10[%c0_233, %c0_234] : memref<30x2xf32, #tpu.memory_space<vmem>>, vector<30x2xf32>
    %cst_235 = arith.constant dense<0.000000e+00> : vector<2x2xf32>
    %311 = tpu.matmul %309, %310, %cst_235 {dimension_numbers = #tpu.dot_dimension_numbers<[1], [0], [0], [1], [0, 0, 1, 1], [], []>} : vector<2x30xf32>, vector<30x2xf32>, vector<2x2xf32> -> vector<2x2xf32>
    %312 = vector.extract_strided_slice %288 {offsets = [0, 0], sizes = [14, 50], strides = [1, 1]} : vector<32x50xf32> to vector<14x50xf32>
    %313 = vector.extract_strided_slice %288 {offsets = [1, 0], sizes = [14, 50], strides = [1, 1]} : vector<32x50xf32> to vector<14x50xf32>
    %314 = vector.extract_strided_slice %288 {offsets = [2, 0], sizes = [14, 50], strides = [1, 1]} : vector<32x50xf32> to vector<14x50xf32>
    %315 = tpu.concatenate %312, %313, %314 in 1 : vector<14x50xf32>, vector<14x50xf32>, vector<14x50xf32> -> vector<14x150xf32>
    %316 = vector.extract_strided_slice %288 {offsets = [16, 0], sizes = [14, 50], strides = [1, 1]} : vector<32x50xf32> to vector<14x50xf32>
    %317 = vector.extract_strided_slice %288 {offsets = [17, 0], sizes = [14, 50], strides = [1, 1]} : vector<32x50xf32> to vector<14x50xf32>
    %318 = vector.extract_strided_slice %288 {offsets = [18, 0], sizes = [14, 50], strides = [1, 1]} : vector<32x50xf32> to vector<14x50xf32>
    %319 = tpu.concatenate %316, %317, %318 in 1 : vector<14x50xf32>, vector<14x50xf32>, vector<14x50xf32> -> vector<14x150xf32>
    %320 = tpu.concatenate %315, %319 in 0 : vector<14x150xf32>, vector<14x150xf32> -> vector<28x150xf32>
    %c0_236 = arith.constant 0 : index
    %c0_237 = arith.constant 0 : index
    %321 = vector.load %arg3[%c0_236, %c0_237] : memref<150x30xf32, #tpu.memory_space<vmem>>, vector<150x30xf32>
    %cst_238 = arith.constant dense<0.000000e+00> : vector<28x30xf32>
    %322 = tpu.matmul %320, %321, %cst_238 {dimension_numbers = #tpu.dot_dimension_numbers<[1], [0], [0], [1], [0, 0, 1, 1], [], []>} : vector<28x150xf32>, vector<150x30xf32>, vector<28x30xf32> -> vector<28x30xf32>
    %c0_239 = arith.constant 0 : index
    %c0_240 = arith.constant 0 : index
    %323 = vector.load %arg7[%c0_239, %c0_240] : memref<1x30xf32, #tpu.memory_space<vmem>>, vector<1x30xf32>
    %324 = vector.broadcast %323 : vector<1x30xf32> to vector<28x30xf32>
    %325 = arith.addf %322, %324 : vector<28x30xf32>
    %cst_241 = arith.constant 0.000000e+00 : f32
    %326 = vector.broadcast %cst_241 : f32 to vector<28x30xf32>
    %327 = arith.maximumf %325, %326 : vector<28x30xf32>
    %328 = vector.extract_strided_slice %327 {offsets = [0, 0], sizes = [14, 30], strides = [1, 1]} : vector<28x30xf32> to vector<14x30xf32>
    %cst_242 = arith.constant dense<0xFF800000> : vector<30xf32>
    %329 = vector.multi_reduction <maximumf>, %328, %cst_242 [0] : vector<14x30xf32> to vector<30xf32>
    %330 = vector.shape_cast %329 : vector<30xf32> to vector<1x30xf32>
    %331 = vector.extract_strided_slice %327 {offsets = [14, 0], sizes = [14, 30], strides = [1, 1]} : vector<28x30xf32> to vector<14x30xf32>
    %cst_243 = arith.constant dense<0xFF800000> : vector<30xf32>
    %332 = vector.multi_reduction <maximumf>, %331, %cst_243 [0] : vector<14x30xf32> to vector<30xf32>
    %333 = vector.shape_cast %332 : vector<30xf32> to vector<1x30xf32>
    %334 = tpu.concatenate %330, %333 in 0 : vector<1x30xf32>, vector<1x30xf32> -> vector<2x30xf32>
    %c0_244 = arith.constant 0 : index
    %c0_245 = arith.constant 0 : index
    %335 = vector.load %arg11[%c0_244, %c0_245] : memref<30x2xf32, #tpu.memory_space<vmem>>, vector<30x2xf32>
    %cst_246 = arith.constant dense<0.000000e+00> : vector<2x2xf32>
    %336 = tpu.matmul %334, %335, %cst_246 {dimension_numbers = #tpu.dot_dimension_numbers<[1], [0], [0], [1], [0, 0, 1, 1], [], []>} : vector<2x30xf32>, vector<30x2xf32>, vector<2x2xf32> -> vector<2x2xf32>
    %337 = arith.addf %311, %336 : vector<2x2xf32>
    %338 = vector.extract_strided_slice %288 {offsets = [0, 0], sizes = [12, 50], strides = [1, 1]} : vector<32x50xf32> to vector<12x50xf32>
    %339 = vector.extract_strided_slice %288 {offsets = [1, 0], sizes = [12, 50], strides = [1, 1]} : vector<32x50xf32> to vector<12x50xf32>
    %340 = vector.extract_strided_slice %288 {offsets = [2, 0], sizes = [12, 50], strides = [1, 1]} : vector<32x50xf32> to vector<12x50xf32>
    %341 = vector.extract_strided_slice %288 {offsets = [3, 0], sizes = [12, 50], strides = [1, 1]} : vector<32x50xf32> to vector<12x50xf32>
    %342 = vector.extract_strided_slice %288 {offsets = [4, 0], sizes = [12, 50], strides = [1, 1]} : vector<32x50xf32> to vector<12x50xf32>
    %343 = tpu.concatenate %338, %339, %340, %341, %342 in 1 : vector<12x50xf32>, vector<12x50xf32>, vector<12x50xf32>, vector<12x50xf32>, vector<12x50xf32> -> vector<12x250xf32>
    %344 = vector.extract_strided_slice %288 {offsets = [16, 0], sizes = [12, 50], strides = [1, 1]} : vector<32x50xf32> to vector<12x50xf32>
    %345 = vector.extract_strided_slice %288 {offsets = [17, 0], sizes = [12, 50], strides = [1, 1]} : vector<32x50xf32> to vector<12x50xf32>
    %346 = vector.extract_strided_slice %288 {offsets = [18, 0], sizes = [12, 50], strides = [1, 1]} : vector<32x50xf32> to vector<12x50xf32>
    %347 = vector.extract_strided_slice %288 {offsets = [19, 0], sizes = [12, 50], strides = [1, 1]} : vector<32x50xf32> to vector<12x50xf32>
    %348 = vector.extract_strided_slice %288 {offsets = [20, 0], sizes = [12, 50], strides = [1, 1]} : vector<32x50xf32> to vector<12x50xf32>
    %349 = tpu.concatenate %344, %345, %346, %347, %348 in 1 : vector<12x50xf32>, vector<12x50xf32>, vector<12x50xf32>, vector<12x50xf32>, vector<12x50xf32> -> vector<12x250xf32>
    %350 = tpu.concatenate %343, %349 in 0 : vector<12x250xf32>, vector<12x250xf32> -> vector<24x250xf32>
    %c0_247 = arith.constant 0 : index
    %c0_248 = arith.constant 0 : index
    %351 = vector.load %arg4[%c0_247, %c0_248] : memref<250x30xf32, #tpu.memory_space<vmem>>, vector<250x30xf32>
    %cst_249 = arith.constant dense<0.000000e+00> : vector<24x30xf32>
    %352 = tpu.matmul %350, %351, %cst_249 {dimension_numbers = #tpu.dot_dimension_numbers<[1], [0], [0], [1], [0, 0, 1, 1], [], []>} : vector<24x250xf32>, vector<250x30xf32>, vector<24x30xf32> -> vector<24x30xf32>
    %c0_250 = arith.constant 0 : index
    %c0_251 = arith.constant 0 : index
    %353 = vector.load %arg8[%c0_250, %c0_251] : memref<1x30xf32, #tpu.memory_space<vmem>>, vector<1x30xf32>
    %354 = vector.broadcast %353 : vector<1x30xf32> to vector<24x30xf32>
    %355 = arith.addf %352, %354 : vector<24x30xf32>
    %cst_252 = arith.constant 0.000000e+00 : f32
    %356 = vector.broadcast %cst_252 : f32 to vector<24x30xf32>
    %357 = arith.maximumf %355, %356 : vector<24x30xf32>
    %358 = vector.extract_strided_slice %357 {offsets = [0, 0], sizes = [12, 30], strides = [1, 1]} : vector<24x30xf32> to vector<12x30xf32>
    %cst_253 = arith.constant dense<0xFF800000> : vector<30xf32>
    %359 = vector.multi_reduction <maximumf>, %358, %cst_253 [0] : vector<12x30xf32> to vector<30xf32>
    %360 = vector.shape_cast %359 : vector<30xf32> to vector<1x30xf32>
    %361 = vector.extract_strided_slice %357 {offsets = [12, 0], sizes = [12, 30], strides = [1, 1]} : vector<24x30xf32> to vector<12x30xf32>
    %cst_254 = arith.constant dense<0xFF800000> : vector<30xf32>
    %362 = vector.multi_reduction <maximumf>, %361, %cst_254 [0] : vector<12x30xf32> to vector<30xf32>
    %363 = vector.shape_cast %362 : vector<30xf32> to vector<1x30xf32>
    %364 = tpu.concatenate %360, %363 in 0 : vector<1x30xf32>, vector<1x30xf32> -> vector<2x30xf32>
    %c0_255 = arith.constant 0 : index
    %c0_256 = arith.constant 0 : index
    %365 = vector.load %arg12[%c0_255, %c0_256] : memref<30x2xf32, #tpu.memory_space<vmem>>, vector<30x2xf32>
    %cst_257 = arith.constant dense<0.000000e+00> : vector<2x2xf32>
    %366 = tpu.matmul %364, %365, %cst_257 {dimension_numbers = #tpu.dot_dimension_numbers<[1], [0], [0], [1], [0, 0, 1, 1], [], []>} : vector<2x30xf32>, vector<30x2xf32>, vector<2x2xf32> -> vector<2x2xf32>
    %367 = arith.addf %337, %366 : vector<2x2xf32>
    %368 = vector.extract_strided_slice %288 {offsets = [0, 0], sizes = [10, 50], strides = [1, 1]} : vector<32x50xf32> to vector<10x50xf32>
    %369 = vector.extract_strided_slice %288 {offsets = [1, 0], sizes = [10, 50], strides = [1, 1]} : vector<32x50xf32> to vector<10x50xf32>
    %370 = vector.extract_strided_slice %288 {offsets = [2, 0], sizes = [10, 50], strides = [1, 1]} : vector<32x50xf32> to vector<10x50xf32>
    %371 = vector.extract_strided_slice %288 {offsets = [3, 0], sizes = [10, 50], strides = [1, 1]} : vector<32x50xf32> to vector<10x50xf32>
    %372 = vector.extract_strided_slice %288 {offsets = [4, 0], sizes = [10, 50], strides = [1, 1]} : vector<32x50xf32> to vector<10x50xf32>
    %373 = vector.extract_strided_slice %288 {offsets = [5, 0], sizes = [10, 50], strides = [1, 1]} : vector<32x50xf32> to vector<10x50xf32>
    %374 = vector.extract_strided_slice %288 {offsets = [6, 0], sizes = [10, 50], strides = [1, 1]} : vector<32x50xf32> to vector<10x50xf32>
    %375 = tpu.concatenate %368, %369, %370, %371, %372, %373, %374 in 1 : vector<10x50xf32>, vector<10x50xf32>, vector<10x50xf32>, vector<10x50xf32>, vector<10x50xf32>, vector<10x50xf32>, vector<10x50xf32> -> vector<10x350xf32>
    %376 = vector.extract_strided_slice %288 {offsets = [16, 0], sizes = [10, 50], strides = [1, 1]} : vector<32x50xf32> to vector<10x50xf32>
    %377 = vector.extract_strided_slice %288 {offsets = [17, 0], sizes = [10, 50], strides = [1, 1]} : vector<32x50xf32> to vector<10x50xf32>
    %378 = vector.extract_strided_slice %288 {offsets = [18, 0], sizes = [10, 50], strides = [1, 1]} : vector<32x50xf32> to vector<10x50xf32>
    %379 = vector.extract_strided_slice %288 {offsets = [19, 0], sizes = [10, 50], strides = [1, 1]} : vector<32x50xf32> to vector<10x50xf32>
    %380 = vector.extract_strided_slice %288 {offsets = [20, 0], sizes = [10, 50], strides = [1, 1]} : vector<32x50xf32> to vector<10x50xf32>
    %381 = vector.extract_strided_slice %288 {offsets = [21, 0], sizes = [10, 50], strides = [1, 1]} : vector<32x50xf32> to vector<10x50xf32>
    %382 = vector.extract_strided_slice %288 {offsets = [22, 0], sizes = [10, 50], strides = [1, 1]} : vector<32x50xf32> to vector<10x50xf32>
    %383 = tpu.concatenate %376, %377, %378, %379, %380, %381, %382 in 1 : vector<10x50xf32>, vector<10x50xf32>, vector<10x50xf32>, vector<10x50xf32>, vector<10x50xf32>, vector<10x50xf32>, vector<10x50xf32> -> vector<10x350xf32>
    %384 = tpu.concatenate %375, %383 in 0 : vector<10x350xf32>, vector<10x350xf32> -> vector<20x350xf32>
    %c0_258 = arith.constant 0 : index
    %c0_259 = arith.constant 0 : index
    %385 = vector.load %arg5[%c0_258, %c0_259] : memref<350x30xf32, #tpu.memory_space<vmem>>, vector<350x30xf32>
    %cst_260 = arith.constant dense<0.000000e+00> : vector<20x30xf32>
    %386 = tpu.matmul %384, %385, %cst_260 {dimension_numbers = #tpu.dot_dimension_numbers<[1], [0], [0], [1], [0, 0, 1, 1], [], []>} : vector<20x350xf32>, vector<350x30xf32>, vector<20x30xf32> -> vector<20x30xf32>
    %c0_261 = arith.constant 0 : index
    %c0_262 = arith.constant 0 : index
    %387 = vector.load %arg9[%c0_261, %c0_262] : memref<1x30xf32, #tpu.memory_space<vmem>>, vector<1x30xf32>
    %388 = vector.broadcast %387 : vector<1x30xf32> to vector<20x30xf32>
    %389 = arith.addf %386, %388 : vector<20x30xf32>
    %cst_263 = arith.constant 0.000000e+00 : f32
    %390 = vector.broadcast %cst_263 : f32 to vector<20x30xf32>
    %391 = arith.maximumf %389, %390 : vector<20x30xf32>
    %392 = vector.extract_strided_slice %391 {offsets = [0, 0], sizes = [10, 30], strides = [1, 1]} : vector<20x30xf32> to vector<10x30xf32>
    %cst_264 = arith.constant dense<0xFF800000> : vector<30xf32>
    %393 = vector.multi_reduction <maximumf>, %392, %cst_264 [0] : vector<10x30xf32> to vector<30xf32>
    %394 = vector.shape_cast %393 : vector<30xf32> to vector<1x30xf32>
    %395 = vector.extract_strided_slice %391 {offsets = [10, 0], sizes = [10, 30], strides = [1, 1]} : vector<20x30xf32> to vector<10x30xf32>
    %cst_265 = arith.constant dense<0xFF800000> : vector<30xf32>
    %396 = vector.multi_reduction <maximumf>, %395, %cst_265 [0] : vector<10x30xf32> to vector<30xf32>
    %397 = vector.shape_cast %396 : vector<30xf32> to vector<1x30xf32>
    %398 = tpu.concatenate %394, %397 in 0 : vector<1x30xf32>, vector<1x30xf32> -> vector<2x30xf32>
    %c0_266 = arith.constant 0 : index
    %c0_267 = arith.constant 0 : index
    %399 = vector.load %arg13[%c0_266, %c0_267] : memref<30x2xf32, #tpu.memory_space<vmem>>, vector<30x2xf32>
    %cst_268 = arith.constant dense<0.000000e+00> : vector<2x2xf32>
    %400 = tpu.matmul %398, %399, %cst_268 {dimension_numbers = #tpu.dot_dimension_numbers<[1], [0], [0], [1], [0, 0, 1, 1], [], []>} : vector<2x30xf32>, vector<30x2xf32>, vector<2x2xf32> -> vector<2x2xf32>
    %401 = arith.addf %367, %400 : vector<2x2xf32>
    %c0_269 = arith.constant 0 : index
    %c0_270 = arith.constant 0 : index
    %402 = vector.load %arg14[%c0_269, %c0_270] : memref<1x2xf32, #tpu.memory_space<vmem>>, vector<1x2xf32>
    %403 = vector.broadcast %402 : vector<1x2xf32> to vector<2x2xf32>
    %404 = arith.addf %401, %403 : vector<2x2xf32>
    %cst_271 = arith.constant dense<0xFF800000> : vector<2xf32>
    %405 = vector.multi_reduction <maximumf>, %404, %cst_271 [1] : vector<2x2xf32> to vector<2xf32>
    %406 = vector.shape_cast %405 : vector<2xf32> to vector<2x1xf32>
    %407 = vector.broadcast %406 : vector<2x1xf32> to vector<2x2xf32>
    %408 = arith.subf %404, %407 : vector<2x2xf32>
    %409 = math.exp %408 : vector<2x2xf32>
    %cst_272 = arith.constant dense<0.000000e+00> : vector<2xf32>
    %410 = vector.multi_reduction <add>, %409, %cst_272 [1] : vector<2x2xf32> to vector<2xf32>
    %411 = vector.shape_cast %410 : vector<2xf32> to vector<2x1xf32>
    %412 = math.log %411 : vector<2x1xf32>
    %413 = arith.addf %406, %412 : vector<2x1xf32>
    %414 = vector.broadcast %413 : vector<2x1xf32> to vector<2x2xf32>
    %415 = arith.subf %404, %414 : vector<2x2xf32>
    %c0_273 = arith.constant 0 : index
    %c0_274 = arith.constant 0 : index
    %416 = vector.load %arg15[%c0_273, %c0_274] : memref<2x2xf32, #tpu.memory_space<vmem>>, vector<2x2xf32>
    tpu.vector_store %arg15[%c0_273, %c0_274], %415 {strides = array<i32>} : memref<2x2xf32, #tpu.memory_space<vmem>>, vector<2x2xf32>,
    return
  }
}

</mosaic_0001>

<bundles_post_ra>
// kernel: textcnn_forward.1
= control target key start
LH: loop header
LB: loop body
LE: loop exit
PB: predicated region body
PF: predicated region fallthrough
CT: control target
= control target key end

     0   :  { %20 = vsyncpa [#allocation6], 0  ;;  %s5002_s0 = inlined_call_operand.vmem [shape: s32[32], index: 0, kind: input, shape index: {}]   ;;  %s5003_s1 = inlined_call_operand.vmem [shape: f32[100,50], index: 1, kind: input, shape index: {}]   ;;  %s5004_s2 = inlined_call_operand.vmem [shape: f32[100,30], index: 2, kind: input, shape index: {}]   ;;  %s5005_s3 = inlined_call_operand.vmem [shape: f32[150,30], index: 3, kind: input, shape index: {}]   ;;  %s5006_s4 = inlined_call_operand.vmem [shape: f32[250,30], index: 4, kind: input, shape index: {}]   ;;  %s5007_s5 = inlined_call_operand.vmem [shape: f32[350,30], index: 5, kind: input, shape index: {}]   ;;  %s5008_s6 = inlined_call_operand.vmem [shape: f32[1,30], index: 6, kind: input, shape index: {}]   ;;  %s5009_s7 = inlined_call_operand.vmem [shape: f32[1,30], index: 7, kind: input, shape index: {}]   ;;  %s5010_s8 = inlined_call_operand.vmem [shape: f32[1,30], index: 8, kind: input, shape index: {}]   ;;  %s5011_s9 = inlined_call_operand.vmem [shape: f32[1,30], index: 9, kind: input, shape index: {}]   ;;  %s5012_s10 = inlined_call_operand.vmem [shape: f32[30,2], index: 10, kind: input, shape index: {}]   ;;  %s5013_s11 = inlined_call_operand.vmem [shape: f32[30,2], index: 11, kind: input, shape index: {}]   ;;  %s5014_s12 = inlined_call_operand.vmem [shape: f32[30,2], index: 12, kind: input, shape index: {}]   ;;  %s5015_s13 = inlined_call_operand.vmem [shape: f32[30,2], index: 13, kind: input, shape index: {}]   ;;  %s5016_s14 = inlined_call_operand.vmem [shape: f32[1,2], index: 14, kind: input, shape index: {}]   ;;  %s5017_s15 = inlined_call_operand.hbm [shape: f32[2,2], index: 15, kind: output, shape index: {}]  }
   0x1   :  { %21 = vsyncpa [#allocation5], 0  ;;  %s28_s20 = sshll.u32 %s5002_s0, 4  ;;  %s29_s20 = int_to_ptr.vmem [resolvable:$true] %s28_s20 }
   0x2   :  { %s4048_s21 = scalar_lea.vmem %s29_s20, 16  ;;  %p4053_p1 = scmp.lt.s32.totalorder %s29_s20, %s29_s20 }
   0x3   :  { %p4049_p0 = scmp.ne.s32.totalorder %s29_s20, %s4048_s21  ;;  %p4054_p2 = scmp.lt.s32.totalorder %s4048_s21, %s4048_s21 }
   0x5   :  { %p4055_p3 = por %p4054_p2, %p4053_p1 }
   0x7   :  { %p4056_p4 = pnand %p4055_p3, %p4049_p0 }
   0x9   :  { %4059 = shalt.err (!%p4056_p4)
}
   0xa   :  { %s4150_s22 = smov [#allocation4]  }
   0xb   :  { %31 = dma.vmem_to_smem %s29_s20, 16, %s4150_s22, [#allocation6]  }
   0xc   :  { %4082 = dma.done.wait [#allocation6], 16  }
   0xd   :  { %4083 = vsyncadd [#allocation6], 4294967280 }
   0xe   :  { %61 = sfence }
   0xf   :  { %s62_s23 = sld [smem:[#allocation4]] }
  0x15   :  { %s63_s26 = scalar_lea.vmem %s5003_s1, %s62_s23 }
  0x16   :  { %v81_v0 = vld [vmem:[%s63_s26] sm:$0x1] }
  0x17   :  { %82 = vst [vmem:[#allocation2] sm:$0x1] %v81_v0 }
  0x18   :  { %107 = vsyncadd [#allocation3], 16  ;;  %s3532_s0 = sld [smem:[#allocation4 + $0x1]] }
  0x1e   :  { %s109_s29 = scalar_lea.vmem %s5003_s1, %s3532_s0 }
  0x1f   :  { %v129_v1 = vld [vmem:[%s109_s29] sm:$0x1] }
  0x20   :  { %130 = vst [vmem:[#allocation2 + $0x1] sm:$0x1] %v129_v1 }
  0x21   :  { %155 = vsyncadd [#allocation3 + $0x1], 16  ;;  %s3533_s30 = sld [smem:[#allocation4 + $0x2]] }
  0x27   :  { %s157_s18 = scalar_lea.vmem %s5003_s1, %s3533_s30 }
  0x28   :  { %v177_v2 = vld [vmem:[%s157_s18] sm:$0x1] }
  0x29   :  { %178 = vst [vmem:[#allocation2 + $0x2] sm:$0x1] %v177_v2 }
  0x2a   :  { %203 = vsyncadd [#allocation3 + $0x2], 16  ;;  %s3534_s19 = sld [smem:[#allocation4 + $0x3]] }
  0x30   :  { %s205_s22 = scalar_lea.vmem %s5003_s1, %s3534_s19 }
  0x31   :  { %v225_v3 = vld [vmem:[%s205_s22] sm:$0x1] }
  0x32   :  { %226 = vst [vmem:[#allocation2 + $0x3] sm:$0x1] %v225_v3 }
  0x33   :  { %251 = vsyncadd [#allocation3 + $0x3], 16  ;;  %s3535_s23 = sld [smem:[#allocation4 + $0x4]] }
  0x39   :  { %s253_s26 = scalar_lea.vmem %s5003_s1, %s3535_s23 }
  0x3a   :  { %v273_v4 = vld [vmem:[%s253_s26] sm:$0x1] }
  0x3b   :  { %274 = vst [vmem:[#allocation2 + $0x4] sm:$0x1] %v273_v4 }
  0x3c   :  { %299 = vsyncadd [#allocation3 + $0x4], 16  ;;  %s3536_s0 = sld [smem:[#allocation4 + $0x5]] }
  0x42   :  { %s301_s29 = scalar_lea.vmem %s5003_s1, %s3536_s0 }
  0x43   :  { %v321_v5 = vld [vmem:[%s301_s29] sm:$0x1] }
  0x44   :  { %322 = vst [vmem:[#allocation2 + $0x5] sm:$0x1] %v321_v5 }
  0x45   :  { %347 = vsyncadd [#allocation3 + $0x5], 16  ;;  %s3537_s30 = sld [smem:[#allocation4 + $0x6]] }
  0x4b   :  { %s349_s18 = scalar_lea.vmem %s5003_s1, %s3537_s30 }
  0x4c   :  { %v369_v6 = vld [vmem:[%s349_s18] sm:$0x1] }
  0x4d   :  { %370 = vst [vmem:[#allocation2 + $0x6] sm:$0x1] %v369_v6 }
  0x4e   :  { %395 = vsyncadd [#allocation3 + $0x6], 16  ;;  %s3538_s19 = sld [smem:[#allocation4 + $0x7]] }
  0x54   :  { %s397_s22 = scalar_lea.vmem %s5003_s1, %s3538_s19 }
  0x55   :  { %v417_v7 = vld [vmem:[%s397_s22] sm:$0x1] }
  0x56   :  { %418 = vst [vmem:[#allocation2 + $0x7] sm:$0x1] %v417_v7 }
  0x57   :  { %443 = vsyncadd [#allocation3 + $0x7], 16  ;;  %s3539_s23 = sld [smem:[#allocation4 + $0x8]] }
  0x5d   :  { %s445_s26 = scalar_lea.vmem %s5003_s1, %s3539_s23 }
  0x5e   :  { %v465_v8 = vld [vmem:[%s445_s26] sm:$0x1] }
  0x5f   :  { %466 = vst [vmem:[#allocation2 + $0x8] sm:$0x1] %v465_v8 }
  0x60   :  { %491 = vsyncadd [#allocation3 + $0x8], 16  ;;  %s3540_s0 = sld [smem:[#allocation4 + $0x9]] }
  0x66   :  { %s493_s29 = scalar_lea.vmem %s5003_s1, %s3540_s0 }
  0x67   :  { %v513_v9 = vld [vmem:[%s493_s29] sm:$0x1] }
  0x68   :  { %514 = vst [vmem:[#allocation2 + $0x9] sm:$0x1] %v513_v9 }
  0x69   :  { %539 = vsyncadd [#allocation3 + $0x9], 16  ;;  %s3541_s30 = sld [smem:[#allocation4 + $0xa]] }
  0x6f   :  { %s541_s18 = scalar_lea.vmem %s5003_s1, %s3541_s30 }
  0x70   :  { %v561_v10 = vld [vmem:[%s541_s18] sm:$0x1] }
  0x71   :  { %562 = vst [vmem:[#allocation2 + $0xa] sm:$0x1] %v561_v10 }
  0x72   :  { %587 = vsyncadd [#allocation3 + $0xa], 16  ;;  %s3542_s19 = sld [smem:[#allocation4 + $0xb]] }
  0x78   :  { %s589_s22 = scalar_lea.vmem %s5003_s1, %s3542_s19 }
  0x79   :  { %v609_v11 = vld [vmem:[%s589_s22] sm:$0x1] }
  0x7a   :  { %610 = vst [vmem:[#allocation2 + $0xb] sm:$0x1] %v609_v11 }
  0x7b   :  { %635 = vsyncadd [#allocation3 + $0xb], 16  ;;  %s3543_s23 = sld [smem:[#allocation4 + $0xc]] }
  0x81   :  { %s637_s26 = scalar_lea.vmem %s5003_s1, %s3543_s23 }
  0x82   :  { %v657_v12 = vld [vmem:[%s637_s26] sm:$0x1] }
  0x83   :  { %658 = vst [vmem:[#allocation2 + $0xc] sm:$0x1] %v657_v12 }
  0x84   :  { %683 = vsyncadd [#allocation3 + $0xc], 16  ;;  %s3544_s0 = sld [smem:[#allocation4 + $0xd]] }
  0x8a   :  { %s685_s29 = scalar_lea.vmem %s5003_s1, %s3544_s0 }
  0x8b   :  { %v705_v13 = vld [vmem:[%s685_s29] sm:$0x1] }
  0x8c   :  { %706 = vst [vmem:[#allocation2 + $0xd] sm:$0x1] %v705_v13 }
  0x8d   :  { %731 = vsyncadd [#allocation3 + $0xd], 16  ;;  %s3545_s30 = sld [smem:[#allocation4 + $0xe]] }
  0x93   :  { %s733_s18 = scalar_lea.vmem %s5003_s1, %s3545_s30 }
  0x94   :  { %v753_v14 = vld [vmem:[%s733_s18] sm:$0x1] }
  0x95   :  { %754 = vst [vmem:[#allocation2 + $0xe] sm:$0x1] %v753_v14 }
  0x96   :  { %779 = vsyncadd [#allocation3 + $0xe], 16  ;;  %s3546_s19 = sld [smem:[#allocation4 + $0xf]] }
  0x9c   :  { %s781_s22 = scalar_lea.vmem %s5003_s1, %s3546_s19 }
  0x9d   :  { %v801_v15 = vld [vmem:[%s781_s22] sm:$0x1] }
  0x9e   :  { %802 = vst [vmem:[#allocation2 + $0xf] sm:$0x1] %v801_v15 }
  0x9f   :  { %827 = vsyncadd [#allocation3 + $0xf], 16  ;;  %s3547_s23 = sld [smem:[#allocation4 + $0x10]] }
  0xa5   :  { %s829_s26 = scalar_lea.vmem %s5003_s1, %s3547_s23 }
  0xa6   :  { %v849_v16 = vld [vmem:[%s829_s26] sm:$0x1] }
  0xa7   :  { %850 = vst [vmem:[#allocation2 + $0x10] sm:$0x1] %v849_v16 }
  0xa8   :  { %875 = vsyncadd [#allocation3 + $0x10], 16  ;;  %s3548_s0 = sld [smem:[#allocation4 + $0x11]] }
  0xae   :  { %s877_s29 = scalar_lea.vmem %s5003_s1, %s3548_s0 }
  0xaf   :  { %v897_v17 = vld [vmem:[%s877_s29] sm:$0x1] }
  0xb0   :  { %898 = vst [vmem:[#allocation2 + $0x11] sm:$0x1] %v897_v17 }
  0xb1   :  { %923 = vsyncadd [#allocation3 + $0x11], 16  ;;  %s3549_s30 = sld [smem:[#allocation4 + $0x12]] }
  0xb7   :  { %s925_s18 = scalar_lea.vmem %s5003_s1, %s3549_s30 }
  0xb8   :  { %v945_v18 = vld [vmem:[%s925_s18] sm:$0x1] }
  0xb9   :  { %946 = vst [vmem:[#allocation2 + $0x12] sm:$0x1] %v945_v18 }
  0xba   :  { %971 = vsyncadd [#allocation3 + $0x12], 16  ;;  %s3550_s19 = sld [smem:[#allocation4 + $0x13]] }
  0xc0   :  { %s973_s22 = scalar_lea.vmem %s5003_s1, %s3550_s19 }
  0xc1   :  { %v993_v19 = vld [vmem:[%s973_s22] sm:$0x1] }
  0xc2   :  { %994 = vst [vmem:[#allocation2 + $0x13] sm:$0x1] %v993_v19 }
  0xc3   :  { %1019 = vsyncadd [#allocation3 + $0x13], 16  ;;  %s3551_s23 = sld [smem:[#allocation4 + $0x14]] }
  0xc9   :  { %s1021_s26 = scalar_lea.vmem %s5003_s1, %s3551_s23 }
  0xca   :  { %v1041_v20 = vld [vmem:[%s1021_s26] sm:$0x1] }
  0xcb   :  { %1042 = vst [vmem:[#allocation2 + $0x14] sm:$0x1] %v1041_v20 }
  0xcc   :  { %1067 = vsyncadd [#allocation3 + $0x14], 16  ;;  %s3552_s0 = sld [smem:[#allocation4 + $0x15]] }
  0xd2   :  { %s1069_s29 = scalar_lea.vmem %s5003_s1, %s3552_s0 }
  0xd3   :  { %v1089_v21 = vld [vmem:[%s1069_s29] sm:$0x1] }
  0xd4   :  { %1090 = vst [vmem:[#allocation2 + $0x15] sm:$0x1] %v1089_v21 }
  0xd5   :  { %1115 = vsyncadd [#allocation3 + $0x15], 16  ;;  %s3553_s30 = sld [smem:[#allocation4 + $0x16]] }
  0xdb   :  { %s1117_s18 = scalar_lea.vmem %s5003_s1, %s3553_s30 }
  0xdc   :  { %v1137_v22 = vld [vmem:[%s1117_s18] sm:$0x1] }
  0xdd   :  { %1138 = vst [vmem:[#allocation2 + $0x16] sm:$0x1] %v1137_v22 }
  0xde   :  { %1163 = vsyncadd [#allocation3 + $0x16], 16  ;;  %s3554_s19 = sld [smem:[#allocation4 + $0x17]] }
  0xe4   :  { %s1165_s22 = scalar_lea.vmem %s5003_s1, %s3554_s19 }
  0xe5   :  { %v1185_v23 = vld [vmem:[%s1165_s22] sm:$0x1] }
  0xe6   :  { %1186 = vst [vmem:[#allocation2 + $0x17] sm:$0x1] %v1185_v23 }
  0xe7   :  { %1211 = vsyncadd [#allocation3 + $0x17], 16  ;;  %s3555_s23 = sld [smem:[#allocation4 + $0x18]] }
  0xed   :  { %s1213_s26 = scalar_lea.vmem %s5003_s1, %s3555_s23 }
  0xee   :  { %v1233_v24 = vld [vmem:[%s1213_s26] sm:$0x1] }
  0xef   :  { %1234 = vst [vmem:[#allocation2 + $0x18] sm:$0x1] %v1233_v24 }
  0xf0   :  { %1259 = vsyncadd [#allocation3 + $0x18], 16  ;;  %s3556_s0 = sld [smem:[#allocation4 + $0x19]] }
  0xf6   :  { %s1261_s29 = scalar_lea.vmem %s5003_s1, %s3556_s0 }
  0xf7   :  { %v1281_v25 = vld [vmem:[%s1261_s29] sm:$0x1] }
  0xf8   :  { %1282 = vst [vmem:[#allocation2 + $0x19] sm:$0x1] %v1281_v25 }
  0xf9   :  { %1307 = vsyncadd [#allocation3 + $0x19], 16  ;;  %s3557_s30 = sld [smem:[#allocation4 + $0x1a]] }
  0xff   :  { %s1309_s18 = scalar_lea.vmem %s5003_s1, %s3557_s30 }
 0x100   :  { %v1329_v26 = vld [vmem:[%s1309_s18] sm:$0x1] }
 0x101   :  { %1330 = vst [vmem:[#allocation2 + $0x1a] sm:$0x1] %v1329_v26 }
 0x102   :  { %1355 = vsyncadd [#allocation3 + $0x1a], 16  ;;  %s3558_s19 = sld [smem:[#allocation4 + $0x1b]] }
 0x108   :  { %s1357_s22 = scalar_lea.vmem %s5003_s1, %s3558_s19 }
 0x109   :  { %v1377_v27 = vld [vmem:[%s1357_s22] sm:$0x1] }
 0x10a   :  { %1378 = vst [vmem:[#allocation2 + $0x1b] sm:$0x1] %v1377_v27 }
 0x10b   :  { %1403 = vsyncadd [#allocation3 + $0x1b], 16  ;;  %s3559_s23 = sld [smem:[#allocation4 + $0x1c]] }
 0x111   :  { %s1405_s26 = scalar_lea.vmem %s5003_s1, %s3559_s23 }
 0x112   :  { %v1425_v28 = vld [vmem:[%s1405_s26] sm:$0x1] }
 0x113   :  { %1426 = vst [vmem:[#allocation2 + $0x1c] sm:$0x1] %v1425_v28 }
 0x114   :  { %1451 = vsyncadd [#allocation3 + $0x1c], 16  ;;  %s3560_s0 = sld [smem:[#allocation4 + $0x1d]] }
 0x11a   :  { %s1453_s29 = scalar_lea.vmem %s5003_s1, %s3560_s0 }
 0x11b   :  { %v1473_v29 = vld [vmem:[%s1453_s29] sm:$0x1] }
 0x11c   :  { %1474 = vst [vmem:[#allocation2 + $0x1d] sm:$0x1] %v1473_v29 }
 0x11d   :  { %1499 = vsyncadd [#allocation3 + $0x1d], 16  ;;  %s3561_s30 = sld [smem:[#allocation4 + $0x1e]] }
 0x123   :  { %s1501_s18 = scalar_lea.vmem %s5003_s1, %s3561_s30 }
 0x124   :  { %v1521_v30 = vld [vmem:[%s1501_s18] sm:$0x1] }
 0x125   :  { %1522 = vst [vmem:[#allocation2 + $0x1e] sm:$0x1] %v1521_v30 }
 0x126   :  { %1547 = vsyncadd [#allocation3 + $0x1e], 16  ;;  %s3562_s19 = sld [smem:[#allocation4 + $0x1f]] }
 0x12c   :  { %s1549_s22 = scalar_lea.vmem %s5003_s1, %s3562_s19 }
 0x12d   :  { %v1569_v31 = vld [vmem:[%s1549_s22] sm:$0x1] }
 0x12e   :  { %1570 = vst [vmem:[#allocation2 + $0x1f] sm:$0x1] %v1569_v31 }
 0x12f   :  { %1595 = vsyncadd [#allocation3 + $0x1f], 16 }
 0x130   :  { %4084 = dma.done.wait [#allocation3], 16 }
 0x131   :  { %4085 = vsyncadd [#allocation3], 4294967280 }
 0x132   :  { %4086 = dma.done.wait [#allocation3 + $0x1], 16 }
 0x133   :  { %4087 = vsyncadd [#allocation3 + $0x1], 4294967280 }
 0x134   :  { %4088 = dma.done.wait [#allocation3 + $0x2], 16 }
 0x135   :  { %4089 = vsyncadd [#allocation3 + $0x2], 4294967280 }
 0x136   :  { %4090 = dma.done.wait [#allocation3 + $0x3], 16 }
 0x137   :  { %4091 = vsyncadd [#allocation3 + $0x3], 4294967280 }
 0x138   :  { %4092 = dma.done.wait [#allocation3 + $0x4], 16 }
 0x139   :  { %4093 = vsyncadd [#allocation3 + $0x4], 4294967280 }
 0x13a   :  { %4094 = dma.done.wait [#allocation3 + $0x5], 16 }
 0x13b   :  { %4095 = vsyncadd [#allocation3 + $0x5], 4294967280 }
 0x13c   :  { %4096 = dma.done.wait [#allocation3 + $0x6], 16 }
 0x13d   :  { %4097 = vsyncadd [#allocation3 + $0x6], 4294967280 }
 0x13e   :  { %4098 = dma.done.wait [#allocation3 + $0x7], 16 }
 0x13f   :  { %4099 = vsyncadd [#allocation3 + $0x7], 4294967280 }
 0x140   :  { %4100 = dma.done.wait [#allocation3 + $0x8], 16 }
 0x141   :  { %4101 = vsyncadd [#allocation3 + $0x8], 4294967280 }
 0x142   :  { %4102 = dma.done.wait [#allocation3 + $0x9], 16 }
 0x143   :  { %4103 = vsyncadd [#allocation3 + $0x9], 4294967280 }
 0x144   :  { %4104 = dma.done.wait [#allocation3 + $0xa], 16 }
 0x145   :  { %4105 = vsyncadd [#allocation3 + $0xa], 4294967280 }
 0x146   :  { %4106 = dma.done.wait [#allocation3 + $0xb], 16 }
 0x147   :  { %4107 = vsyncadd [#allocation3 + $0xb], 4294967280 }
 0x148   :  { %4108 = dma.done.wait [#allocation3 + $0xc], 16 }
 0x149   :  { %4109 = vsyncadd [#allocation3 + $0xc], 4294967280 }
 0x14a   :  { %4110 = dma.done.wait [#allocation3 + $0xd], 16 }
 0x14b   :  { %4111 = vsyncadd [#allocation3 + $0xd], 4294967280 }
 0x14c   :  { %4112 = dma.done.wait [#allocation3 + $0xe], 16 }
 0x14d   :  { %4113 = vsyncadd [#allocation3 + $0xe], 4294967280 }
 0x14e   :  { %4114 = dma.done.wait [#allocation3 + $0xf], 16 }
 0x14f   :  { %4115 = vsyncadd [#allocation3 + $0xf], 4294967280 }
 0x150   :  { %4116 = dma.done.wait [#allocation3 + $0x10], 16 }
 0x151   :  { %4117 = vsyncadd [#allocation3 + $0x10], 4294967280 }
 0x152   :  { %4118 = dma.done.wait [#allocation3 + $0x11], 16 }
 0x153   :  { %4119 = vsyncadd [#allocation3 + $0x11], 4294967280 }
 0x154   :  { %4120 = dma.done.wait [#allocation3 + $0x12], 16 }
 0x155   :  { %4121 = vsyncadd [#allocation3 + $0x12], 4294967280 }
 0x156   :  { %4122 = dma.done.wait [#allocation3 + $0x13], 16 }
 0x157   :  { %4123 = vsyncadd [#allocation3 + $0x13], 4294967280 }
 0x158   :  { %4124 = dma.done.wait [#allocation3 + $0x14], 16 }
 0x159   :  { %4125 = vsyncadd [#allocation3 + $0x14], 4294967280 }
 0x15a   :  { %4126 = dma.done.wait [#allocation3 + $0x15], 16 }
 0x15b   :  { %4127 = vsyncadd [#allocation3 + $0x15], 4294967280 }
 0x15c   :  { %4128 = dma.done.wait [#allocation3 + $0x16], 16 }
 0x15d   :  { %4129 = vsyncadd [#allocation3 + $0x16], 4294967280 }
 0x15e   :  { %4130 = dma.done.wait [#allocation3 + $0x17], 16 }
 0x15f   :  { %4131 = vsyncadd [#allocation3 + $0x17], 4294967280 }
 0x160   :  { %4132 = dma.done.wait [#allocation3 + $0x18], 16 }
 0x161   :  { %4133 = vsyncadd [#allocation3 + $0x18], 4294967280 }
 0x162   :  { %4134 = dma.done.wait [#allocation3 + $0x19], 16 }
 0x163   :  { %4135 = vsyncadd [#allocation3 + $0x19], 4294967280 }
 0x164   :  { %4136 = dma.done.wait [#allocation3 + $0x1a], 16 }
 0x165   :  { %4137 = vsyncadd [#allocation3 + $0x1a], 4294967280 }
 0x166   :  { %4138 = dma.done.wait [#allocation3 + $0x1b], 16 }
 0x167   :  { %4139 = vsyncadd [#allocation3 + $0x1b], 4294967280 }
 0x168   :  { %4140 = dma.done.wait [#allocation3 + $0x1c], 16 }
 0x169   :  { %4141 = vsyncadd [#allocation3 + $0x1c], 4294967280 }
 0x16a   :  { %4142 = dma.done.wait [#allocation3 + $0x1d], 16 }
 0x16b   :  { %4143 = vsyncadd [#allocation3 + $0x1d], 4294967280 }
 0x16c   :  { %4144 = dma.done.wait [#allocation3 + $0x1e], 16 }
 0x16d   :  { %4145 = vsyncadd [#allocation3 + $0x1e], 4294967280 }
 0x16e   :  { %4146 = dma.done.wait [#allocation3 + $0x1f], 16 }
 0x16f   :  { %4147 = vsyncadd [#allocation3 + $0x1f], 4294967280  ;;  %v4151_v32 = vmov 0.0|0.0   ;;  %v4342_v33 = vld [vmem:[#allocation2 + $0x8] sm:$0xff]  ;;  %v4344_v34 = vld [vmem:[#allocation2] sm:$0xff]  ;;  %vm1667_vm0 = vcmask 1046528  }
 0x170   :  { %3893 = vmatprep.subr.bf16.mxu1 %v4151_v32  ;;  %v4346_v35 = vld [vmem:[#allocation2 + $0x10] sm:$0xff]  ;;  %v1856_v36 = vrot.slane %v4342_v33, 2  ;;  %v1668_v37 = vrot.slane %v4344_v34, 1  ;;  %v1669_v38 = vrot.slane %v4342_v33, 1  ;;  %v4351_v39 = vld [vmem:[#allocation2 + $0x18] sm:$0xff]  ;;  %vm1854_vm1 = vcmask 1045504  }
 0x171   :  { %v1682_v40 = vrot.slane %v4346_v35, 1  ;;  %v1683_v41 = vrot.slane %v4351_v39, 1  ;;  %v1855_v42 = vrot.slane %v4344_v34, 2  ;;  %s4152_s1 = smov 100   ;;  %s4153_s23 = smov 50   ;;  %v1866_v45 = vrot.slane %v4346_v35, 2 }
 0x172   :  { %1860 = vrot.lane.b32.xlu1 %v1856_v36, %s4152_s1  ;;  %v1670_v43 = vsel %vm1667_vm0, %v1668_v37, %v1669_v38  ;;  %v1867_v46 = vrot.slane %v4351_v39, 2  ;;  %v1891_v47 = vld [vmem:[%s5005_s3] sm:$0xff]  ;;  %v1892_v48 = vld [vmem:[%s5005_s3 + $0x8] sm:$0xff]  ;;  %v1893_v50 = vld [vmem:[%s5005_s3 + $0x10] sm:$0xff]  ;;  %vm1731_vm2 = vcmask 1043456   ;;  %v2208_v1 = vrot.slane %v4344_v34, 4 }
 0x173   :  { %1671 = vrot.lane.b32.xlu0 %v1670_v43, %s4153_s23  ;;  %v1684_v44 = vsel %vm1667_vm0, %v1682_v40, %v1683_v41  ;;  %v1857_v49 = vsel %vm1854_vm1, %v1855_v42, %v1856_v36  ;;  %v1894_v51 = vld [vmem:[%s5005_s3 + $0x18] sm:$0xff]  ;;  %v1700_v52 = vld [vmem:[%s5004_s2] sm:$0xff]  ;;  %v1701_v53 = vld [vmem:[%s5004_s2 + $0x8] sm:$0xff]  ;;  %v3894_v54 = vpack.c.bf16 %v1892_v48, %v1891_v47  ;;  %v2209_v2 = vrot.slane %v4342_v33, 4  ;;  %s4154_s16 = smov 72   ;;  %s4155_s17 = smov 22  }
 0x174   :  { %v1702_v55 = vld [vmem:[%s5004_s2 + $0x10] sm:$0xff]  ;;  %v1703_v56 = vld [vmem:[%s5004_s2 + $0x18] sm:$0xff]  ;;  %v1868_v57 = vsel %vm1854_vm1, %v1866_v45, %v1867_v46  ;;  %v3897_v58 = vpack.c.bf16 %v1894_v51, %v1893_v50  ;;  %v1895_v59 = vld [vmem:[%s5005_s3 + $0x20] sm:$0xff]  ;;  %v3869_v60 = vpack.c.bf16 %v1701_v53, %v1700_v52  ;;  %v2199_v3 = vrot.slane %v4344_v34, 3  ;;  %s4158_s27 = smov 44  }
 0x175   :  { %3895 = vmatpush1.bf16.msra.mxu1 %v3894_v54  ;;  %v1896_v61 = vld [vmem:[%s5005_s3 + $0x28] sm:$0xff]  ;;  %v3873_v62 = vpack.c.bf16 %v1703_v56, %v1702_v55  ;;  %v1704_v63 = vld [vmem:[%s5004_s2 + $0x20] sm:$0xff]  ;;  %v2200_v4 = vrot.slane %v4342_v33, 3  ;;  %v1897_v6 = vld [vmem:[%s5005_s3 + $0x30] sm:$0xff]  ;;  %vm2198_vm3 = vcmask 1044480   ;;  %v2210_v11 = vsel %vm1731_vm2, %v2208_v1, %v2209_v2 }
 0x176   :  { %1685 = vrot.lane.b32.xlu1 %v1684_v44, %s4153_s23  ;;  %3896 = vmatprep.subr.bf16.mxu1 %v4151_v32  ;;  %v1705_v0 = vld [vmem:[%s5004_s2 + $0x28] sm:$0xff]  ;;  %v3900_v5 = vpack.c.bf16 %v1896_v61, %v1895_v59  ;;  %v1898_v8 = vld [vmem:[%s5005_s3 + $0x38] sm:$0xff]  ;;  %v1706_v9 = vld [vmem:[%s5004_s2 + $0x30] sm:$0xff]  ;;  %v2231_v12 = vrot.slane %v4346_v35, 4  ;;  %v2232_v13 = vrot.slane %v4351_v39, 4  ;;  %v2222_v14 = vrot.slane %v4346_v35, 3 }
 0x177   :  { %1858 = vrot.lane.b32.xlu0 %v1857_v49, %s4152_s1  ;;  %3870 = vmatprep.subr.bf16.mxu0 %v3869_v60  ;;  %v3877_v7 = vpack.c.bf16 %v1705_v0, %v1704_v63  ;;  %v1707_v10 = vld [vmem:[%s5004_s2 + $0x38] sm:$0xff]  ;;  %v2201_v15 = vsel %vm2198_vm3, %v2199_v3, %v2200_v4  ;;  %v2223_v16 = vrot.slane %v4351_v39, 3  ;;  %v3903_v17 = vpack.c.bf16 %v1898_v8, %v1897_v6  ;;  %v1899_v18 = vld [vmem:[%s5005_s3 + $0x40] sm:$0xff]  ;;  %v1900_v20 = vld [vmem:[%s5005_s3 + $0x48] sm:$0xff] }
 0x178   :  { %3872 = vmatpush3.bf16.msra.mxu0 %v3869_v60  ;;  %v3881_v19 = vpack.c.bf16 %v1707_v10, %v1706_v9  ;;  %v1708_v21 = vld [vmem:[%s5004_s2 + $0x40] sm:$0xff]  ;;  %v1709_v22 = vld [vmem:[%s5004_s2 + $0x48] sm:$0xff]  ;;  %v2233_v23 = vsel %vm1731_vm2, %v2231_v12, %v2232_v13  ;;  %v3906_v25 = vpack.c.bf16 %v1900_v20, %v1899_v18  ;;  %v1901_v26 = vld [vmem:[%s5005_s3 + $0x50] sm:$0xff]  ;;  %v2517_v40 = vrot.slane %v4346_v35, 5 }
 0x179   :  { %3898 = vmatpush1.bf16.msra.mxu1 %v3897_v58  ;;  %3874 = vmatprep.subr.bf16.mxu0 %v3873_v62  ;;  %v2224_v24 = vsel %vm2198_vm3, %v2222_v14, %v2223_v16  ;;  %v3885_v27 = vpack.c.bf16 %v1709_v22, %v1708_v21  ;;  %v1902_v28 = vld [vmem:[%s5005_s3 + $0x58] sm:$0xff]  ;;  %v1710_v29 = vld [vmem:[%s5004_s2 + $0x50] sm:$0xff]  ;;  %v1903_v37 = vld [vmem:[%s5005_s3 + $0x60] sm:$0xff]  ;;  %vm2493_vm4 = vcmask 1042432   ;;  %v2494_v42 = vrot.slane %v4344_v34, 5 }
 0x17a   :  { %1869 = vrot.lane.b32.xlu1 %v1868_v57, %s4152_s1  ;;  %3899 = vmatprep.subr.bf16.mxu1 %v4151_v32  ;;  %v1711_v30 = vld [vmem:[%s5004_s2 + $0x58] sm:$0xff]  ;;  %v3909_v31 = vpack.c.bf16 %v1902_v28, %v1901_v26  ;;  %v2495_v43 = vrot.slane %v4342_v33, 5  ;;  %v1905_v45 = vld [vmem:[%s5005_s3 + $0x70] sm:$0xff]  ;;  %v1712_v47 = vld [vmem:[%s5004_s2 + $0x60] sm:$0xf]  ;;  %s4156_s2 = smov 122  }
 0x17b   :  { %1673 = vrot.lane.b32.xlu0 %v1669_v38, %s4153_s23  ;;  %v3889_v36 = vpack.c.bf16 %v1711_v30, %v1710_v29  ;;  %v1904_v38 = vld [vmem:[%s5005_s3 + $0x68] sm:$0xff]  ;;  %v1907_v51 = vld [vmem:[%s5005_s3 + $0x80] sm:$0xff]  ;;  %v2526_v53 = vrot.slane %v4346_v35, 6  ;;  %v2527_v54 = vrot.slane %v4351_v39, 6  ;;  %v2503_v56 = vrot.slane %v4344_v34, 6  ;;  %v2275_v6 = vld [vmem:[%s5006_s4 + $0x90] sm:$0xff] }
 0x17c   :  { %3876 = vmatpush3.bf16.msra.mxu0 %v3873_v62  ;;  %v3912_v44 = vpack.c.bf16 %v1904_v38, %v1903_v37  ;;  %v2496_v49 = vsel %vm2493_vm4, %v2494_v42, %v2495_v43  ;;  %v1908_v52 = vld [vmem:[%s5005_s3 + $0x88] sm:$0xff]  ;;  %v2504_v57 = vrot.slane %v4342_v33, 6  ;;  %v2273_v58 = vld [vmem:[%s5006_s4 + $0x80] sm:$0xff]  ;;  %vm2305_vm5 = vcmask 1041408   ;;  %v1909_v63 = vld [vmem:[%s5005_s3 + $0x90] sm:$0x3f] }
 0x17d   :  { %3901 = vmatpush1.bf16.msra.mxu1 %v3900_v5  ;;  %3878 = vmatprep.subr.bf16.mxu0 %v3877_v7  ;;  %v3918_v55 = vpack.c.bf16 %v1908_v52, %v1907_v51  ;;  %v2274_v59 = vld [vmem:[%s5006_s4 + $0x88] sm:$0xff]  ;;  %v2528_v60 = vsel %vm2305_vm5, %v2526_v53, %v2527_v54  ;;  %v4157_v62 = vmov 0.0   ;;  %vm1677_vm6 = vcmask 408576   ;;  %v2257_v3 = vld [vmem:[%s5006_s4] sm:$0xff]  ;;  %v2260_v12 = vld [vmem:[%s5006_s4 + $0x18] sm:$0xff] }
 0x17e   :  { %1871 = vrot.lane.b32.xlu1 %v1867_v46, %s4152_s1  ;;  %3902 = vmatprep.subr.bf16.mxu1 %v4151_v32  ;;  %v1906_v46 = vld [vmem:[%s5005_s3 + $0x78] sm:$0xff]  ;;  %v2505_v61 = vsel %vm2305_vm5, %v2503_v56, %v2504_v57  ;;  %v3934_v0 = vpack.c.bf16 %v2274_v59, %v2273_v58  ;;  %vm1720_vm7 = vcmask 818176   ;;  %vm1917_vm8 = vcmask 179200   ;;  %v2261_v22 = vld [vmem:[%s5006_s4 + $0x20] sm:$0xff]  ;;  %v2279_v28 = vld [vmem:[%s5006_s4 + $0xb0] sm:$0xff] }
 0x17f   :  { %1687 = vrot.lane.b32.xlu0 %v1683_v41, %s4153_s23  ;;  %v2518_v41 = vrot.slane %v4351_v39, 5  ;;  %v3915_v50 = vpack.c.bf16 %v1906_v46, %v1905_v45  ;;  %v2280_v29 = vld [vmem:[%s5006_s4 + $0xb8] sm:$0xff]  ;;  %v2265_v58 = vld [vmem:[%s5006_s4 + $0x40] sm:$0xff]  ;;  %v2266_v59 = vld [vmem:[%s5006_s4 + $0x48] sm:$0xff]  ;;  %vm2219_vm9 = vcmask 588800   ;;  %vm2296_vm10 = vcmask 998400  }
 0x180   :  { %3880 = vmatpush3.bf16.msra.mxu0 %v3877_v7  ;;  %v2276_v7 = vld [vmem:[%s5006_s4 + $0x98] sm:$0xff]  ;;  %vm4159_vm11 = vmmov 1   ;;  %vm4160_vm14 = vmmov 0   ;;  %vm2514_vm15 = vcmask 359424   ;;  %vm1826_vm3 = vcmask 243712  }
 0x181   :  { %3904 = vmatpush1.bf16.msra.mxu1 %v3903_v17  ;;  %3882 = vmatprep.subr.bf16.mxu0 %v3881_v19  ;;  %v2519_v48 = vsel %vm2493_vm4, %v2517_v40, %v2518_v41  ;;  %v2278_v17 = vld [vmem:[%s5006_s4 + $0xa8] sm:$0xff]  ;;  %v2264_v45 = vld [vmem:[%s5006_s4 + $0x38] sm:$0xff]  ;;  %vm3963_vm12 = vmpackc.low %vm2305_vm5, %vm4159_vm11  ;;  %vm1835_vm4 = vcmask 244743  }
 0x182   :  { %2211 = vrot.lane.b32.xlu1 %v2210_v11, %s4154_s16  ;;  %3905 = vmatprep.subr.bf16.mxu1 %v4151_v32  ;;  %v3938_v11 = vpack.c.bf16 %v2276_v7, %v2275_v6  ;;  %v2267_v7 = vld [vmem:[%s5006_s4 + $0x50] sm:$0xff]  ;;  %vm4726_vm13 = vmpackc.low %vm1854_vm1, %vm4159_vm11  ;;  %vm2896_vm11 = vcmask 9216  }
 0x183   :  { %2202 = vrot.lane.b32.xlu0 %v2201_v15, %s4155_s17 }
 0x184   :  { %3884 = vmatpush3.bf16.msra.mxu0 %v3881_v19 }
 0x185   :  { %3907 = vmatpush1.bf16.msra.mxu1 %v3906_v25  ;;  %3886 = vmatprep.subr.bf16.mxu0 %v3885_v27 }
 0x186   :  { %2234 = vrot.lane.b32.xlu1 %v2233_v23, %s4154_s16  ;;  %3908 = vmatprep.subr.bf16.mxu1 %v4151_v32  ;;  %v2262_v23 = vld [vmem:[%s5006_s4 + $0x28] sm:$0xff] }
 0x187   :  { %2225 = vrot.lane.b32.xlu0 %v2224_v24, %s4155_s17  ;;  %v3944_v38 = vpack.c.bf16 %v2262_v23, %v2261_v22 }
 0x188   :  { %3888 = vmatpush3.bf16.msra.mxu0 %v3885_v27 }
 0x189   :  { %3910 = vmatpush1.bf16.msra.mxu1 %v3909_v31  ;;  %3890 = vmatprep.subr.bf16.mxu0 %v3889_v36 }
 0x18a   :  { %2213 = vrot.lane.b32.xlu1 %v2209_v2, %s4154_s16  ;;  %3911 = vmatprep.subr.bf16.mxu1 %v4151_v32 }
 0x18b   :  { %2204 = vrot.lane.b32.xlu0 %v2200_v4, %s4155_s17  ;;  %v2258_v4 = vld [vmem:[%s5006_s4 + $0x8] sm:$0xff] }
 0x18c   :  { %3892 = vmatpush3.bf16.msra.mxu0 %v3889_v36  ;;  %v3936_v9 = vpack.c.bf16 %v2258_v4, %v2257_v3  ;;  %v3952_v4 = vpack.c.bf16 %v2266_v59, %v2265_v58  ;;  %v2043_v58 = vld [vmem:[%s5013_s11 + $0x8] sm:$0xff] }
 0x18d   :  { %3913 = vmatpush1.bf16.msra.mxu1 %v3912_v44  ;;  %3784 = vmatprep.subr.msk.mxu0 %vm1731_vm2, %v1712_v47  ;;  %v2263_v44 = vld [vmem:[%s5006_s4 + $0x30] sm:$0xff] }
 0x18e   :  { %2236 = vrot.lane.b32.xlu1 %v2232_v13, %s4154_s16  ;;  %3914 = vmatprep.subr.bf16.mxu1 %v4151_v32  ;;  %v3948_v53 = vpack.c.bf16 %v2264_v45, %v2263_v44 }
 0x18f   :  { %2227 = vrot.lane.b32.xlu0 %v2223_v16, %s4155_s17  ;;  %v2277_v16 = vld [vmem:[%s5006_s4 + $0xa0] sm:$0xff] }
 0x190   :  { %3785 = vmatpush3.msk.msra.mxu0 %vm1731_vm2, %v1712_v47  ;;  %v3942_v27 = vpack.c.bf16 %v2278_v17, %v2277_v16  ;;  %v2281_v47 = vld [vmem:[%s5006_s4 + $0xc0] sm:$0xff]  ;;  %v2270_v17 = vld [vmem:[%s5006_s4 + $0x68] sm:$0xff] }
 0x191   :  { %3916 = vmatpush1.bf16.msra.mxu1 %v3915_v50  ;;  %3920 = vmatprep.subr.bf16.mxu0 %v4151_v32  ;;  %v2269_v16 = vld [vmem:[%s5006_s4 + $0x60] sm:$0xff] }
 0x192   :  { %2520 = vrot.lane.b32.xlu1 %v2519_v48, %s4156_s2  ;;  %3917 = vmatprep.subr.bf16.mxu1 %v4151_v32  ;;  %v2282_v48 = vld [vmem:[%s5006_s4 + $0xc8] sm:$0xff]  ;;  %v3960_v22 = vpack.c.bf16 %v2270_v17, %v2269_v16  ;;  %v2602_v16 = vld [vmem:[%s5007_s5 + $0x150] sm:$0xff]  ;;  %v2603_v17 = vld [vmem:[%s5007_s5 + $0x158] sm:$0x3f] }
 0x193   :  { %2497 = vrot.lane.b32.xlu0 %v2496_v49, %s4156_s2 }
 0x195   :  { %3919 = vmatpush1.bf16.msra.mxu1 %v3918_v55 }
 0x196   :  { %2522 = vrot.lane.b32.xlu1 %v2518_v41, %s4156_s2  ;;  %1966 = vmatprep.subr.mxu1 %v4157_v62 }
 0x197   :  { %2499 = vrot.lane.b32.xlu0 %v2495_v43, %s4156_s2  ;;  %v3946_v43 = vpack.c.bf16 %v2280_v29, %v2279_v28 }
 0x199   :  { %3570 = vmatpush1.msk.msra.mxu1 %vm1854_vm1, %v1909_v63  ;;  %v2284_v63 = vld [vmem:[%s5006_s4 + $0xd8] sm:$0xff] }
 0x19a   :  { %2529 = vrot.lane.b32.xlu1 %v2528_v60, %s4158_s27  ;;  %3935 = vmatprep.subr.bf16.mxu1 %v3934_v0 }
 0x19b   :  { %2506 = vrot.lane.b32.xlu0 %v2505_v61, %s4158_s27  ;;  %v2283_v61 = vld [vmem:[%s5006_s4 + $0xd0] sm:$0xff] }
 0x19c   :  { %v3954_v6 = vpack.c.bf16 %v2284_v63, %v2283_v61  ;;  %v2592_v63 = vld [vmem:[%s5007_s5 + $0x100] sm:$0xff] }
 0x19e   :  { %2531 = vrot.lane.b32.xlu1 %v2527_v54, %s4158_s27 }
 0x19f   :  { %2508 = vrot.lane.b32.xlu0 %v2504_v57, %s4158_s27  ;;  %v3950_v57 = vpack.c.bf16 %v2282_v48, %v2281_v47 }
 0x1e4   :  { %v4515_v1 = vpop.permute.xlu1 %1860 }
 0x1e5   :  { %v1672_v2 = vpop.permute.xlu0 %1671 }
 0x1e6   :  { %v1678_v5 = vsel %vm1677_vm6, %v4344_v34, %v1672_v2  ;;  %v2259_v34 = vld [vmem:[%s5006_s4 + $0x10] sm:$0xff] }
 0x1e7   :  { %3786 = vmatprep.mubr.msk.f32.mxu0 %vm1720_vm7, %v1678_v5  ;;  %v3940_v18 = vpack.c.bf16 %v2260_v12, %v2259_v34 }
 0x1e8   :  { %v1686_v8 = vpop.permute.xlu1 %1685 }
 0x1e9   :  { %v4532_v10 = vpop.permute.xlu0 %1858  ;;  %v1691_v13 = vsel %vm1677_vm6, %v4346_v35, %v1686_v8  ;;  %v2268_v8 = vld [vmem:[%s5006_s4 + $0x58] sm:$0xff] }
 0x1ea   :  { %3571 = vmatprep.mubr.msk.f32.mxu1 %vm1917_vm8, %v4532_v10  ;;  %v4546_v14 = vsel %vm1720_vm7, %v1678_v5, %v4532_v10  ;;  %v1695_v15 = vrot.slane %v1691_v13, 1  ;;  %v3956_v12 = vpack.c.bf16 %v2268_v8, %v2267_v7  ;;  %v2596_v7 = vld [vmem:[%s5007_s5 + $0x120] sm:$0xff]  ;;  %v2597_v8 = vld [vmem:[%s5007_s5 + $0x128] sm:$0xff] }
 0x1eb   :  { %1995 = vmatmul.mubr.f32.vlgmr.msra.gmra.mrb[0].mxu1 %v4546_v14 }
 0x1ec   :  { %3937 = vmatpush3.bf16.msra.mxu1 %v3936_v9  ;;  %v4555_v35 = vpop.permute.xlu1 %1869  ;;  %v2285_v9 = vld [vmem:[%s5006_s4 + $0xe0] sm:$0xff] }
 0x1ed   :  { %v4559_v19 = vsel %vm1720_vm7, %v1691_v13, %v4555_v35  ;;  %v1880_v20 = vrot.slane %v4555_v35, 2  ;;  %v1674_v21 = vpop.permute.xlu0 %1673  ;;  %3939 = vmatprep.subr.bf16.mxu1 %v3938_v11 }
 0x1ee   :  { %v1879_v24 = vrot.slane %v4559_v19, 2  ;;  %v2543_v25 = vrot.slane %v4559_v19, 6  ;;  %v1679_v26 = vsel %vm1677_vm6, %v4342_v33, %v1674_v21  ;;  %v2246_v47 = vrot.slane %v4559_v19, 4 }
 0x1ef   :  { %v1890_v30 = vsel %vm1854_vm1, %v4515_v1, %v1880_v20  ;;  %v4582_v31 = vsel %vm1720_vm7, %v1679_v26, %v4515_v1  ;;  %v1699_v36 = vsel %vm1667_vm0, %v1679_v26, %v1695_v15  ;;  %v2271_v26 = vld [vmem:[%s5006_s4 + $0x70] sm:$0xff] }
 0x1f0   :  { %3941 = vmatpush3.bf16.msra.mxu1 %v3940_v18  ;;  %v4585_v33 = vpop.permute.xlu1 %1871  ;;  %3572 = vmatprep.mubr.msk.f32.mxu1 %vm1917_vm8, %v1890_v30  ;;  %v1889_v37 = vsel %vm1854_vm1, %v4582_v31, %v1879_v24  ;;  %v4592_v40 = vsel %vm2305_vm5, %v4582_v31, %v2543_v25  ;;  %v2287_v18 = vld [vmem:[%s5006_s4 + $0xf0] sm:$0xff]  ;;  %v2255_v19 = vsel %vm1731_vm2, %v4582_v31, %v2246_v47 }
 0x1f1   :  { %v1883_v41 = vrot.slane %v4585_v33, 2  ;;  %2000 = vmatmul.mubr.f32.gmra.mrb[2].mxu1 %v1889_v37  ;;  %v1688_v42 = vpop.permute.xlu0 %1687  ;;  %3787 = vmatmul.mubr.msk.f32.vlgmr.msra.gmra.mrb[0].mxu0 %vm1720_vm7, %v1699_v36 }
 0x1f2   :  { %v1692_v46 = vsel %vm1677_vm6, %v4351_v39, %v1688_v42  ;;  %3943 = vmatprep.subr.bf16.mxu1 %v3942_v27  ;;  %v2272_v27 = vld [vmem:[%s5006_s4 + $0x78] sm:$0xff]  ;;  %vm2031_vm6 = vcmask 240640  }
 0x1f3   :  { %v1696_v49 = vrot.slane %v1692_v46, 1  ;;  %v4612_v50 = vsel %vm1720_vm7, %v1692_v46, %v4585_v33  ;;  %v1884_v51 = vsel %vm1854_vm1, %v1880_v20, %v1883_v41  ;;  %v2288_v20 = vld [vmem:[%s5006_s4 + $0xf8] sm:$0x3]  ;;  %v3965_v29 = vpack.c.bf16 %v2272_v27, %v2271_v26 }
 0x1f4   :  { %3945 = vmatpush3.bf16.msra.mxu1 %v3944_v38  ;;  %v2212_v52 = vpop.permute.xlu1 %2211  ;;  %3573 = vmatprep.mubr.msk.f32.mxu1 %vm1917_vm8, %v1884_v51  ;;  %v1881_v39 = vrot.slane %v4612_v50, 2  ;;  %v2546_v54 = vrot.slane %v4612_v50, 6 }
 0x1f5   :  { %v2203_v55 = vpop.permute.xlu0 %2202  ;;  %v1697_v56 = vsel %vm1667_vm0, %v1695_v15, %v1696_v49  ;;  %3947 = vmatprep.subr.bf16.mxu1 %v3946_v43  ;;  %vm2611_vm0 = vcmask 769024  }
 0x1f6   :  { %3789 = vmatprep.mubr.msk.f32.mxu0 %vm1720_vm7, %v1697_v56  ;;  %v1882_v60 = vsel %vm1854_vm1, %v1879_v24, %v1881_v39  ;;  %v4634_v0 = vsel %vm2305_vm5, %v2543_v25, %v2546_v54  ;;  %v2217_v2 = vsel %vm1917_vm8, %v4532_v10, %v2203_v55  ;;  %v2286_v10 = vld [vmem:[%s5006_s4 + $0xe8] sm:$0xff]  ;;  %v3962_v25 = vpack.c.bf16 %v2288_v20, %v2287_v18 }
 0x1f7   :  { %3790 = vmatmul.mubr.msk.f32.gmra.mrb[2].mxu0 %vm1720_vm7, %v1696_v49  ;;  %2005 = vmatmul.mubr.f32.gmra.mrb[4].mxu1 %v1882_v60  ;;  %v2220_v11 = vsel %vm2219_vm9, %v2217_v2, %v2212_v52  ;;  %v3958_v15 = vpack.c.bf16 %v2286_v10, %v2285_v9  ;;  %v2248_v54 = vrot.slane %v4612_v50, 4  ;;  %v2044_v50 = vld [vmem:[%s5013_s11 + $0x10] sm:$0xff]  ;;  %v2045_v60 = vld [vmem:[%s5013_s11 + $0x18] sm:$0x3f]  ;;  %v2593_v2 = vld [vmem:[%s5007_s5 + $0x108] sm:$0xff]  ;;  %v4013_v9 = vpack.c.bf16 %v2597_v8, %v2596_v7 }
 0x1f8   :  { %3949 = vmatpush3.bf16.msra.mxu1 %v3948_v53  ;;  %v2235_v3 = vpop.permute.xlu1 %2234  ;;  %3574 = vmatprep.mubr.msk.f32.mxu1 %vm1917_vm8, %v1883_v41  ;;  %v3924_v61 = vpack.c.bf16 %v2045_v60, %v2044_v50  ;;  %v2598_v10 = vld [vmem:[%s5007_s5 + $0x130] sm:$0xff]  ;;  %v4022_v18 = vpack.c.bf16 %v2603_v17, %v2602_v16  ;;  %vm1824_vm1 = vcmask 244736   ;;  %vm1848_vm7 = vcmask 1040384  }
 0x1f9   :  { %v2226_v5 = vpop.permute.xlu0 %2225  ;;  %3951 = vmatprep.subr.bf16.mxu1 %v3950_v57  ;;  %v2249_v56 = vsel %vm1731_vm2, %v2246_v47, %v2248_v54  ;;  %v2042_v57 = vld [vmem:[%s5013_s11] sm:$0xff]  ;;  %3800 = vmatprep.mubr.msk.f32.mxu0 %vm4160_vm14, %v4157_v62 }
 0x1fa   :  { %v2240_v23 = vsel %vm1917_vm8, %v4555_v35, %v2226_v5  ;;  %v3921_v59 = vpack.c.bf16 %v2043_v58, %v2042_v57  ;;  %v2595_v5 = vld [vmem:[%s5007_s5 + $0x118] sm:$0xff] }
 0x1fb   :  { %2010 = vmatmul.mubr.f32.gmra.mrb[6].mxu1 %v1881_v39  ;;  %v2242_v35 = vsel %vm2219_vm9, %v2240_v23, %v2235_v3  ;;  %v4007_v3 = vpack.c.bf16 %v2593_v2, %v2592_v63 }
 0x1fc   :  { %3953 = vmatpush3.bf16.msra.mxu1 %v3952_v4  ;;  %v2214_v34 = vpop.permute.xlu1 %2213  ;;  %3581 = vmatprep.mubr.msk.f32.mxu1 %vm2296_vm10, %v2220_v11  ;;  %v2247_v44 = vrot.slane %v2242_v35, 4  ;;  %v2594_v4 = vld [vmem:[%s5007_s5 + $0x110] sm:$0xff] }
 0x1fd   :  { %v2205_v13 = vpop.permute.xlu0 %2204  ;;  %3955 = vmatprep.subr.bf16.mxu1 %v3954_v6  ;;  %3922 = vmatpush3.bf16.msra.mxu0 %v3921_v59  ;;  %v4010_v6 = vpack.c.bf16 %v2595_v5, %v2594_v4 }
 0x1fe   :  { %v2218_v30 = vsel %vm1917_vm8, %v4515_v1, %v2205_v13  ;;  %3923 = vmatprep.subr.bf16.mxu0 %v4151_v32  ;;  %v2601_v13 = vld [vmem:[%s5007_s5 + $0x148] sm:$0xff] }
 0x1ff   :  { %v2221_v1 = vsel %vm2219_vm9, %v2218_v30, %v2214_v34 }
 0x200   :  { %3957 = vmatpush3.bf16.msra.mxu1 %v3956_v12  ;;  %v2237_v21 = vpop.permute.xlu1 %2236  ;;  %v2256_v52 = vsel %vm1731_vm2, %v2221_v1, %v2247_v44  ;;  %v2600_v12 = vld [vmem:[%s5007_s5 + $0x140] sm:$0xff] }
 0x201   :  { %v2228_v24 = vpop.permute.xlu0 %2227  ;;  %3959 = vmatprep.subr.bf16.mxu1 %v3958_v15  ;;  %3926 = vmatpush3.bf16.msk.msra.mxu0 %vm4726_vm13, %v3924_v61  ;;  %v4019_v15 = vpack.c.bf16 %v2601_v13, %v2600_v12 }
 0x202   :  { %v2241_v36 = vsel %vm1917_vm8, %v4585_v33, %v2228_v24  ;;  %3927 = vmatprep.subr.bf16.mxu0 %v4151_v32  ;;  %vm2401_vm8 = vcmask 244740  }
 0x203   :  { %v2243_v43 = vsel %vm2219_vm9, %v2241_v36, %v2237_v21  ;;  %v3569_v36 = vld [vmem:[%s5009_s7] ss:$0 sm:$0xff]  ;;  %vm2787_vm9 = vcmask 238592  }
 0x204   :  { %3961 = vmatpush3.bf16.msra.mxu1 %v3960_v22  ;;  %v4676_v28 = vpop.permute.xlu1 %2520  ;;  %v2250_v51 = vrot.slane %v2243_v43, 4 }
 0x205   :  { %v2535_v37 = vsel %vm2296_vm10, %v2242_v35, %v4676_v28  ;;  %v4685_v38 = vpop.permute.xlu0 %2497  ;;  %3964 = vmatprep.subr.msk.bf16.mxu1 %vm3963_vm12, %v3962_v25 }
 0x206   :  { %v4689_v41 = vsel %vm2296_vm10, %v2220_v11, %v4685_v38  ;;  %v2544_v45 = vrot.slane %v2535_v37, 6  ;;  %v2251_v55 = vsel %vm1731_vm2, %v2247_v44, %v2250_v51  ;;  %v2599_v11 = vld [vmem:[%s5007_s5 + $0x138] sm:$0xff]  ;;  %vm1838_vm2 = vcmask 242688  }
 0x207   :  { %v4016_v34 = vpack.c.bf16 %v2599_v11, %v2598_v10 }
 0x208   :  { %3966 = vmatpush3.bf16.msra.mxu1 %v3965_v29  ;;  %v4691_v42 = vpop.permute.xlu1 %2522 }
 0x209   :  { %v2536_v33 = vsel %vm2296_vm10, %v2243_v43, %v4691_v42  ;;  %v4697_v46 = vpop.permute.xlu0 %2499  ;;  %4006 = vmatprep.subr.bf16.mxu1 %v4151_v32  ;;  %v3563_v43 = vld [vmem:[%s5008_s6] ss:$0 sm:$0xff] }
 0x20a   :  { %v2548_v48 = vrot.slane %v2536_v33, 6  ;;  %v2513_v49 = vsel %vm2296_vm10, %v2221_v1, %v4697_v46 }
 0x20b   :  { %2374 = vmatmul.mubr.f32.vlgmr.msra.gmra.mrb[8].mxu1 %v4546_v14  ;;  %v4706_v39 = vsel %vm2305_vm5, %v2513_v49, %v2544_v45 }
 0x20c   :  { %3582 = vmatprep.mubr.msk.f32.mxu1 %vm2296_vm10, %v2256_v52  ;;  %v4710_v53 = vsel %vm2305_vm5, %v2544_v45, %v2548_v48  ;;  %4008 = vmatpush3.bf16.msra.mxu1 %v4007_v3  ;;  %v2530_v21 = vpop.permute.xlu1 %2529 }
 0x20d   :  { %4009 = vmatprep.subr.bf16.mxu1 %v4151_v32  ;;  %v2507_v20 = vpop.permute.xlu0 %2506  ;;  %v2537_v23 = vsel %vm2514_vm15, %v4676_v28, %v2530_v21 }
 0x20e   :  { %v2515_v22 = vsel %vm2514_vm15, %v4685_v38, %v2507_v20  ;;  %v2545_v24 = vrot.slane %v2537_v23, 6 }
 0x20f   :  { %2379 = vmatmul.mubr.f32.gmra.mrb[10].mxu1 %v2255_v19 }
 0x210   :  { %3583 = vmatprep.mubr.msk.f32.mxu1 %vm2296_vm10, %v2251_v55  ;;  %4011 = vmatpush3.bf16.msra.mxu1 %v4010_v6  ;;  %v2532_v26 = vpop.permute.xlu1 %2531  ;;  %vm2796_vm10 = vcmask 244738  }
 0x211   :  { %4012 = vmatprep.subr.bf16.mxu1 %v4151_v32  ;;  %v2509_v25 = vpop.permute.xlu0 %2508  ;;  %v2538_v35 = vsel %vm2514_vm15, %v4691_v42, %v2532_v26 }
 0x212   :  { %v2516_v27 = vsel %vm2514_vm15, %v4697_v46, %v2509_v25  ;;  %v2550_v29 = vrot.slane %v2538_v35, 6 }
 0x213   :  { %2384 = vmatmul.mubr.f32.gmra.mrb[12].mxu1 %v2249_v56  ;;  %v2559_v30 = vsel %vm2305_vm5, %v2516_v27, %v2545_v24 }
 0x214   :  { %3849 = vmatprep.mubr.msk.f32.mxu1 %vm4160_vm14, %v4157_v62  ;;  %4014 = vmatpush3.bf16.msra.mxu1 %v4013_v9  ;;  %v2551_v28 = vsel %vm2305_vm5, %v2545_v24, %v2550_v29  ;;  %vm2028_vm5 = vcmask 244742  }
 0x215   :  { %4015 = vmatprep.subr.bf16.mxu1 %v4151_v32 }
 0x218   :  { %4017 = vmatpush3.bf16.msra.mxu1 %v4016_v34 }
 0x219   :  { %4018 = vmatprep.subr.bf16.mxu1 %v4151_v32 }
 0x21c   :  { %4020 = vmatpush3.bf16.msra.mxu1 %v4019_v15 }
 0x21d   :  { %4021 = vmatprep.subr.bf16.mxu1 %v4151_v32 }
 0x220   :  { %4024 = vmatpush3.bf16.msk.msra.mxu1 %vm4726_vm13, %v4022_v18 }
 0x223   :  { %3850 = vmatmul.mubr.msk.f32.vlgmr.msra.gmra.mrb[14].mxu1 %vm2611_vm0, %v2515_v22 }
 0x224   :  { %3852 = vmatprep.mubr.msk.f32.mxu1 %vm4160_vm14, %v4157_v62 }
 0x227   :  { %3853 = vmatmul.mubr.msk.f32.gmra.mrb[16].mxu1 %vm2611_vm0, %v2559_v30 }
 0x228   :  { %3855 = vmatprep.mubr.msk.f32.mxu1 %vm4160_vm14, %v4157_v62 }
 0x22b   :  { %3856 = vmatmul.mubr.msk.f32.gmra.mrb[18].mxu1 %vm2611_vm0, %v2551_v28 }
 0x2be   :  { %v1996_v37 = vpop.f32.mrb[0].mxu1 }
 0x2bf   :  { %v1998_v38 = vpop.f32.mrb[1].mxu1  ;;  %v1997_v42 = vadd.f32 %v3569_v36, %v1996_v37 }
 0x2c1   :  { %v2015_v45 = vmax.f32 %v1997_v42, 0.0 }
 0x2c3   :  { %v2019_v54 = vsel %vm1824_vm1, %v2015_v45, -inf }
 0x2c4   :  { %v2001_v1 = vpop.f32.mrb[2].mxu1  ;;  %v3788_v44 = vpop.f32.mrb[0].mxu0 }
 0x2c5   :  { %v2002_v33 = vadd.f32 %v3569_v36, %v2001_v1  ;;  %v1807_v46 = vadd.f32 %v3788_v44, %v3563_v43  ;;  %v1801_v47 = vpop.f32.mrb[1].mxu0  ;;  %v2003_v48 = vpop.f32.mrb[3].mxu1 }
 0x2c6   :  { %v1802_v49 = vadd.f32 %v3563_v43, %v1801_v47  ;;  %v1850_v47 = vld [vmem:[%s5012_s10] sm:$0xff]  ;;  %v1851_v48 = vld [vmem:[%s5012_s10 + $0x8] sm:$0xff] }
 0x2c7   :  { %v2016_v51 = vmax.f32 %v2002_v33, 0.0  ;;  %v1821_v52 = vmax.f32 %v1807_v46, 0.0 }
 0x2c8   :  { %v1820_v19 = vmax.f32 %v1802_v49, 0.0 }
 0x2c9   :  { %v2020_v55 = vsel %vm1838_vm2, %v2016_v51, -inf  ;;  %v1827_v56 = vsel %vm1826_vm3, %v1821_v52, -inf  ;;  %v1836_v9 = vsel %vm1835_vm4, %v1821_v52, -inf  ;;  %v2029_v34 = vsel %vm2028_vm5, %v2016_v51, -inf }
 0x2ca   :  { %v2021_v57 = vmax.f32 %v2019_v54, %v2020_v55  ;;  %v1825_v58 = vsel %vm1824_vm1, %v1820_v19, -inf  ;;  %v3791_v59 = vpop.f32.mrb[2].mxu0  ;;  %v2006_v50 = vpop.f32.mrb[4].mxu1  ;;  %v3579_v19 = vld [vmem:[%s5010_s8] ss:$0 sm:$0xff] }
 0x2cb   :  { %v1828_v60 = vmax.f32 %v1825_v58, %v1827_v56  ;;  %v1817_v61 = vadd.f32 %v3791_v59, %v3563_v43  ;;  %v2007_v63 = vadd.f32 %v3569_v36, %v2006_v50  ;;  %v1811_v2 = vpop.f32.mrb[3].mxu0  ;;  %v2008_v3 = vpop.f32.mrb[5].mxu1  ;;  %v3928_v59 = vpack.c.bf16 %v1851_v48, %v1850_v47  ;;  %v1852_v50 = vld [vmem:[%s5012_s10 + $0x10] sm:$0xff] }
 0x2cc   :  { %v2022_v4 = vrot.slane %v2021_v57, 4  ;;  %v1812_v5 = vadd.f32 %v3563_v43, %v1811_v2  ;;  %v2578_v48 = vld [vmem:[%s5007_s5 + $0x90] sm:$0xff] }
 0x2cd   :  { %v1829_v6 = vrot.slane %v1828_v60, 4  ;;  %v1823_v7 = vmax.f32 %v1817_v61, 0.0  ;;  %v2017_v8 = vmax.f32 %v2007_v63, 0.0 }
 0x2ce   :  { %v1822_v10 = vmax.f32 %v1812_v5, 0.0  ;;  %v2011_v11 = vpop.f32.mrb[6].mxu1  ;;  %v2023_v17 = vmax.f32 %v2021_v57, %v2022_v4 }
 0x2cf   :  { %v1830_v12 = vmax.f32 %v1828_v60, %v1829_v6  ;;  %v2030_v13 = vsel %vm1824_vm1, %v2017_v8, -inf  ;;  %v2012_v15 = vadd.f32 %v3569_v36, %v2011_v11  ;;  %v2013_v16 = vpop.f32.mrb[7].mxu1  ;;  %v1839_v18 = vsel %vm1838_vm2, %v1823_v7, -inf  ;;  %v1853_v60 = vld [vmem:[%s5012_s10 + $0x18] sm:$0x3f]  ;;  %v2412_v7 = vld [vmem:[%s5014_s12] sm:$0xff] }
 0x2d0   :  { %v2033_v20 = vmax.f32 %v2029_v34, %v2030_v13  ;;  %v1837_v21 = vsel %vm1824_vm1, %v1822_v10, -inf  ;;  %v2024_v27 = vrot.slane %v2023_v17, 2  ;;  %v3931_v6 = vpack.c.bf16 %v1853_v60, %v1852_v50  ;;  %v2413_v8 = vld [vmem:[%s5014_s12 + $0x8] sm:$0xff]  ;;  %v2414_v16 = vld [vmem:[%s5014_s12 + $0x10] sm:$0xff] }
 0x2d1   :  { %v1840_v22 = vmax.f32 %v1836_v9, %v1837_v21  ;;  %v2018_v23 = vmax.f32 %v2012_v15, 0.0  ;;  %v1831_v24 = vrot.slane %v1830_v12, 2  ;;  %v3968_v15 = vpack.c.bf16 %v2413_v8, %v2412_v7  ;;  %v2584_v7 = vld [vmem:[%s5007_s5 + $0xc0] sm:$0xff]  ;;  %v2585_v8 = vld [vmem:[%s5007_s5 + $0xc8] sm:$0xff] }
 0x2d2   :  { %v2025_v36 = vmax.f32 %v2023_v17, %v2024_v27  ;;  %v2415_v17 = vld [vmem:[%s5014_s12 + $0x18] sm:$0x3f] }
 0x2d3   :  { %v1841_v25 = vmax.f32 %v1840_v22, %v1839_v18  ;;  %v2032_v26 = vsel %vm2031_vm6, %v2018_v23, -inf  ;;  %v1832_v28 = vmax.f32 %v1830_v12, %v1831_v24  ;;  %v2576_v22 = vld [vmem:[%s5007_s5 + $0x80] sm:$0xff]  ;;  %v2577_v23 = vld [vmem:[%s5007_s5 + $0x88] sm:$0xff] }
 0x2d4   :  { %v2034_v35 = vmax.f32 %v2033_v20, %v2032_v26  ;;  %v2026_v45 = vrot.slane %v2025_v36, 1  ;;  %v3971_v26 = vpack.c.bf16 %v2415_v17, %v2414_v16  ;;  %v2570_v17 = vld [vmem:[%s5007_s5 + $0x50] sm:$0xff] }
 0x2d5   :  { %v1842_v29 = vrot.slane %v1841_v25, 4  ;;  %v1833_v1 = vrot.slane %v1832_v28, 1 }
 0x2d6   :  { %v2035_v30 = vrot.slane %v2034_v35, 4  ;;  %v2027_v56 = vmax.f32 %v2025_v36, %v2026_v45 }
 0x2d7   :  { %v1843_v37 = vmax.f32 %v1841_v25, %v1842_v29  ;;  %v1834_v52 = vmax.f32 %v1832_v28, %v1833_v1 }
 0x2d8   :  { %v2036_v38 = vmax.f32 %v2034_v35, %v2035_v30  ;;  %v3974_v35 = vpack.c.bf16 %v2577_v23, %v2576_v22 }
 0x2d9   :  { %v1844_v42 = vrot.slane %v1843_v37, 2 }
 0x2da   :  { %v2037_v43 = vrot.slane %v2036_v38, 2 }
 0x2db   :  { %v1845_v44 = vmax.f32 %v1843_v37, %v1844_v42 }
 0x2dc   :  { %v2038_v33 = vmax.f32 %v2036_v38, %v2037_v43 }
 0x2dd   :  { %v1846_v46 = vrot.slane %v1845_v44, 1 }
 0x2de   :  { %v2039_v49 = vrot.slane %v2038_v33, 1  ;;  %v3685_v51 = vpop.f32.mrb[8].mxu1 }
 0x2df   :  { %v3686_v54 = vpop.f32.mrb[9].mxu1  ;;  %v1847_v55 = vmax.f32 %v1845_v44, %v1846_v46  ;;  %v2561_v46 = vld [vmem:[%s5007_s5 + $0x8] sm:$0xff] }
 0x2e0   :  { %v2040_v57 = vmax.f32 %v2038_v33, %v2039_v49  ;;  %v3687_v58 = vadd.f32 %v3686_v54, %v3685_v51  ;;  %v2560_v33 = vld [vmem:[%s5007_s5] sm:$0xff]  ;;  %v2579_v49 = vld [vmem:[%s5007_s5 + $0x98] sm:$0xff] }
 0x2e1   :  { %v1849_v61 = vsel %vm1848_vm7, %v1834_v52, %v1847_v55  ;;  %v3978_v54 = vpack.c.bf16 %v2579_v49, %v2578_v48  ;;  %v2562_v55 = vld [vmem:[%s5007_s5 + $0x10] sm:$0xff] }
 0x2e2   :  { %v2376_v63 = vadd.f32 %v3687_v58, %v3579_v19  ;;  %v3688_v2 = vpop.f32.mrb[10].mxu1  ;;  %v2041_v3 = vsel %vm1848_vm7, %v2027_v56, %v2040_v57  ;;  %v2563_v56 = vld [vmem:[%s5007_s5 + $0x18] sm:$0xff]  ;;  %v2580_v58 = vld [vmem:[%s5007_s5 + $0xa0] sm:$0xff] }
 0x2e3   :  { %v3689_v4 = vpop.f32.mrb[11].mxu1  ;;  %3801 = vmatmul.mubr.msk.f32.vlgmr.msra.gmra.mrb[4].mxu0 %vm1824_vm1, %v2041_v3  ;;  %v3980_v50 = vpack.c.bf16 %v2563_v56, %v2562_v55  ;;  %v2583_v3 = vld [vmem:[%s5007_s5 + $0xb8] sm:$0xff] }
 0x2e4   :  { %v3690_v5 = vadd.f32 %v3689_v4, %v3688_v2  ;;  %3929 = vmatpush3.bf16.msra.mxu0 %v3928_v59  ;;  %3811 = vmatprep.mubr.msk.f32.mxu0 %vm4160_vm14, %v4157_v62  ;;  %v2389_v9 = vmax.f32 %v2376_v63, 0.0  ;;  %v2581_v59 = vld [vmem:[%s5007_s5 + $0xa8] sm:$0xff]  ;;  %v2582_v2 = vld [vmem:[%s5007_s5 + $0xb0] sm:$0xff] }
 0x2e5   :  { %3930 = vmatprep.subr.bf16.mxu0 %v4151_v32  ;;  %v3982_v60 = vpack.c.bf16 %v2581_v59, %v2580_v58  ;;  %v2565_v63 = vld [vmem:[%s5007_s5 + $0x28] sm:$0xff]  ;;  %v3986_v4 = vpack.c.bf16 %v2583_v3, %v2582_v2 }
 0x2e6   :  { %v2381_v10 = vadd.f32 %v3690_v5, %v3579_v19  ;;  %v3691_v11 = vpop.f32.mrb[12].mxu1  ;;  %v2392_v18 = vsel %vm1824_vm1, %v2389_v9, -inf  ;;  %v2566_v5 = vld [vmem:[%s5007_s5 + $0x30] sm:$0xff] }
 0x2e7   :  { %v3692_v34 = vpop.f32.mrb[13].mxu1 }
 0x2e8   :  { %v2390_v12 = vmax.f32 %v2381_v10, 0.0  ;;  %v3693_v13 = vadd.f32 %v3692_v34, %v3691_v11  ;;  %3933 = vmatpush3.bf16.msk.msra.mxu0 %vm4726_vm13, %v3931_v6  ;;  %v2567_v6 = vld [vmem:[%s5007_s5 + $0x38] sm:$0xff]  ;;  %v3990_v10 = vpack.c.bf16 %v2585_v8, %v2584_v7  ;;  %v2568_v11 = vld [vmem:[%s5007_s5 + $0x40] sm:$0xff]  ;;  %v2569_v34 = vld [vmem:[%s5007_s5 + $0x48] sm:$0xff] }
 0x2e9   :  { %3967 = vmatprep.subr.bf16.mxu0 %v4151_v32  ;;  %v3988_v9 = vpack.c.bf16 %v2567_v6, %v2566_v5 }
 0x2ea   :  { %v2393_v20 = vsel %vm2031_vm6, %v2390_v12, -inf  ;;  %v2386_v21 = vadd.f32 %v3693_v13, %v3579_v19  ;;  %v2402_v29 = vsel %vm2401_vm8, %v2390_v12, -inf  ;;  %v3976_v19 = vpack.c.bf16 %v2561_v46, %v2560_v33  ;;  %v2586_v12 = vld [vmem:[%s5007_s5 + $0xd0] sm:$0xff]  ;;  %v2587_v13 = vld [vmem:[%s5007_s5 + $0xd8] sm:$0xff] }
 0x2eb   :  { %v2394_v24 = vmax.f32 %v2392_v18, %v2393_v20  ;;  %3812 = vmatmul.mubr.msk.f32.vlgmr.msra.gmra.mrb[6].mxu0 %vm1824_vm1, %v1849_v61  ;;  %v2564_v61 = vld [vmem:[%s5007_s5 + $0x20] sm:$0xff]  ;;  %v3994_v16 = vpack.c.bf16 %v2587_v13, %v2586_v12  ;;  %v2571_v18 = vld [vmem:[%s5007_s5 + $0x58] sm:$0xff] }
 0x2ec   :  { %v2391_v25 = vmax.f32 %v2386_v21, 0.0  ;;  %3969 = vmatpush3.bf16.msra.mxu0 %v3968_v15  ;;  %3822 = vmatprep.mubr.msk.f32.mxu0 %vm4160_vm14, %v4157_v62  ;;  %v3992_v15 = vpack.c.bf16 %v2569_v34, %v2568_v11  ;;  %v2588_v20 = vld [vmem:[%s5007_s5 + $0xe0] sm:$0xff]  ;;  %v2589_v21 = vld [vmem:[%s5007_s5 + $0xe8] sm:$0xff]  ;;  %v3996_v22 = vpack.c.bf16 %v2571_v18, %v2570_v17 }
 0x2ed   :  { %v2395_v27 = vrot.slane %v2394_v24, 4  ;;  %3970 = vmatprep.subr.bf16.mxu0 %v4151_v32  ;;  %v3998_v23 = vpack.c.bf16 %v2589_v21, %v2588_v20 }
 0x2ee   :  { %v2403_v30 = vsel %vm1824_vm1, %v2391_v25, -inf  ;;  %v2573_v25 = vld [vmem:[%s5007_s5 + $0x68] sm:$0xff] }
 0x2ef   :  { %v2396_v28 = vmax.f32 %v2394_v24, %v2395_v27  ;;  %v2404_v37 = vmax.f32 %v2402_v29, %v2403_v30  ;;  %v2572_v24 = vld [vmem:[%s5007_s5 + $0x60] sm:$0xff]  ;;  %v2591_v27 = vld [vmem:[%s5007_s5 + $0xf8] sm:$0xff]  ;;  %v2574_v30 = vld [vmem:[%s5007_s5 + $0x70] sm:$0xff] }
 0x2f0   :  { %3973 = vmatpush3.bf16.msk.msra.mxu0 %vm4726_vm13, %v3971_v26  ;;  %v2590_v26 = vld [vmem:[%s5007_s5 + $0xf0] sm:$0xff] }
 0x2f1   :  { %v2397_v36 = vrot.slane %v2396_v28, 2  ;;  %v2405_v38 = vrot.slane %v2404_v37, 4  ;;  %3975 = vmatprep.subr.bf16.mxu0 %v3974_v35  ;;  %v4000_v35 = vpack.c.bf16 %v2573_v25, %v2572_v24  ;;  %v4002_v29 = vpack.c.bf16 %v2591_v27, %v2590_v26 }
 0x2f3   :  { %v2398_v42 = vmax.f32 %v2396_v28, %v2397_v36  ;;  %v2406_v43 = vmax.f32 %v2404_v37, %v2405_v38  ;;  %v2575_v28 = vld [vmem:[%s5007_s5 + $0x78] sm:$0xff] }
 0x2f4   :  { %v4004_v37 = vpack.c.bf16 %v2575_v28, %v2574_v30 }
 0x2f5   :  { %v2407_v1 = vrot.slane %v2406_v43, 2  ;;  %v2399_v44 = vrot.slane %v2398_v42, 1 }
 0x2f6   :  { %v2769_v36 = vpop.f32.mrb[14].mxu1 }
 0x2f7   :  { %v2408_v45 = vmax.f32 %v2406_v43, %v2407_v1  ;;  %v2400_v51 = vmax.f32 %v2398_v42, %v2399_v44  ;;  %v3851_v38 = vpop.f32.mrb[15].mxu1 }
 0x2f9   :  { %v2409_v47 = vrot.slane %v2408_v45, 1 }
 0x2fa   :  { %v2774_v42 = vpop.f32.mrb[16].mxu1 }
 0x2fb   :  { %v2410_v52 = vmax.f32 %v2408_v45, %v2409_v47  ;;  %v3854_v43 = vpop.f32.mrb[17].mxu1 }
 0x2fd   :  { %v2411_v57 = vsel %vm1848_vm7, %v2400_v51, %v2410_v52 }
 0x2fe   :  { %3823 = vmatmul.mubr.msk.f32.vlgmr.msra.gmra.mrb[8].mxu0 %vm1824_vm1, %v2411_v57  ;;  %v2779_v1 = vpop.f32.mrb[18].mxu1 }
 0x2ff   :  { %3977 = vmatpush3.bf16.msra.mxu0 %v3976_v19  ;;  %2687 = vmatprep.mubr.f32.mxu0 %v4689_v41  ;;  %v3984_v41 = vpack.c.bf16 %v2565_v63, %v2564_v61  ;;  %v3857_v44 = vpop.f32.mrb[19].mxu1  ;;  %v3586_v19 = vld [vmem:[%s5011_s9] ss:$0 sm:$0xff] }
 0x300   :  { %3979 = vmatprep.subr.bf16.mxu0 %v3978_v54 }
 0x303   :  { %3981 = vmatpush3.bf16.msra.mxu0 %v3980_v50 }
 0x304   :  { %3983 = vmatprep.subr.bf16.mxu0 %v3982_v60 }
 0x307   :  { %3985 = vmatpush3.bf16.msra.mxu0 %v3984_v41 }
 0x308   :  { %3987 = vmatprep.subr.bf16.mxu0 %v3986_v4 }
 0x30b   :  { %3989 = vmatpush3.bf16.msra.mxu0 %v3988_v9 }
 0x30c   :  { %3991 = vmatprep.subr.bf16.mxu0 %v3990_v10 }
 0x30f   :  { %3993 = vmatpush3.bf16.msra.mxu0 %v3992_v15 }
 0x310   :  { %3995 = vmatprep.subr.bf16.mxu0 %v3994_v16 }
 0x313   :  { %3997 = vmatpush3.bf16.msra.mxu0 %v3996_v22 }
 0x314   :  { %3999 = vmatprep.subr.bf16.mxu0 %v3998_v23 }
 0x317   :  { %4001 = vmatpush3.bf16.msra.mxu0 %v4000_v35  ;;  %v3593_v35 = vld [vmem:[%s5016_s14] ss:$0 sm:$0xff]  ;;  %s4161_s14 = smov [#allocation7]  }
 0x318   :  { %4003 = vmatprep.subr.bf16.mxu0 %v4002_v29  ;;  %s2917_s19 = sshll.u32 %s4161_s14, 4  ;;  %s2918_s19 = int_to_ptr.vmem [resolvable:$true] %s2917_s19 }
 0x319   :  { %s4060_s20 = scalar_lea.vmem %s2918_s19, 32  ;;  %p4065_p6 = scmp.lt.s32.totalorder %s2918_s19, %s2918_s19 }
 0x31a   :  { %p4061_p5 = scmp.ne.s32.totalorder %s2918_s19, %s4060_s20  ;;  %p4066_p7 = scmp.lt.s32.totalorder %s4060_s20, %s4060_s20 }
 0x31b   :  { %4005 = vmatpush3.bf16.msra.mxu0 %v4004_v37 }
 0x31c   :  { %4025 = vmatprep.subr.bf16.mxu0 %v4151_v32  ;;  %p4067_p8 = por %p4066_p7, %p4065_p6 }
 0x31e   :  { %2688 = vmatmul.mubr.f32.vlgmr.msra.gmra.mrb[10].mxu0 %v4546_v14  ;;  %v2807_v14 = vld [vmem:[%s5015_s13] sm:$0xff]  ;;  %p4068_p9 = pnand %p4067_p8, %p4061_p5 }
 0x31f   :  { %2692 = vmatprep.mubr.f32.mxu0 %v4706_v39 }
 0x322   :  { %2693 = vmatmul.mubr.f32.gmra.mrb[12].mxu0 %v4592_v40  ;;  %v2808_v40 = vld [vmem:[%s5015_s13 + $0x8] sm:$0xff] }
 0x323   :  { %2697 = vmatprep.mubr.f32.mxu0 %v4710_v53  ;;  %v4026_v39 = vpack.c.bf16 %v2808_v40, %v2807_v14 }
 0x325   :  { %4027 = vmatpush3.bf16.msra.mxu0 %v4026_v39 }
 0x326   :  { %2698 = vmatmul.mubr.f32.gmra.mrb[14].mxu0 %v4634_v0  ;;  %4028 = vmatprep.subr.bf16.mxu0 %v4151_v32  ;;  %v2810_v0 = vld [vmem:[%s5015_s13 + $0x18] sm:$0x3f] }
 0x327   :  { %3866 = vmatprep.mubr.msk.f32.mxu0 %vm4160_vm14, %v4157_v62  ;;  %v2809_v62 = vld [vmem:[%s5015_s13 + $0x10] sm:$0xff] }
 0x328   :  { %v4029_v53 = vpack.c.bf16 %v2810_v0, %v2809_v62 }
 0x32a   :  { %4031 = vmatpush3.bf16.msk.msra.mxu0 %vm4726_vm13, %v4029_v53 }
 0x3b6   :  { %v2118_v45 = vpop.f32.mrb[4].mxu0 }
 0x3b7   :  { %v3802_v33 = vpop.f32.mrb[5].mxu0 }
 0x3be   :  { %v2194_v46 = vpop.f32.mrb[6].mxu0 }
 0x3bf   :  { %v2195_v47 = vadd.f32 %v2194_v46, %v2118_v45  ;;  %v3813_v48 = vpop.f32.mrb[7].mxu0 }
 0x3d1   :  { %v2488_v49 = vpop.f32.mrb[8].mxu0 }
 0x3d2   :  { %v2492_v51 = vadd.f32 %v2488_v49, %v2195_v47  ;;  %v3824_v32 = vpop.f32.mrb[9].mxu0 }
 0x3f1   :  { %v3731_v52 = vpop.f32.mrb[10].mxu0 }
 0x3f2   :  { %v3732_v54 = vpop.f32.mrb[11].mxu0 }
 0x3f3   :  { %v3733_v55 = vadd.f32 %v3732_v54, %v3731_v52 }
 0x3f5   :  { %v2690_v56 = vadd.f32 %v3733_v55, %v3586_v19  ;;  %v3734_v57 = vpop.f32.mrb[12].mxu0 }
 0x3f6   :  { %v3735_v58 = vpop.f32.mrb[13].mxu0 }
 0x3f7   :  { %v2770_v31 = vadd.f32 %v2769_v36, %v2690_v56  ;;  %v3736_v59 = vadd.f32 %v3735_v58, %v3734_v57 }
 0x3f9   :  { %v2695_v50 = vadd.f32 %v3736_v59, %v3586_v19  ;;  %v3737_v60 = vpop.f32.mrb[14].mxu0  ;;  %v2783_v63 = vmax.f32 %v2770_v31, 0.0 }
 0x3fa   :  { %v3738_v61 = vpop.f32.mrb[15].mxu0 }
 0x3fb   :  { %v2775_v2 = vadd.f32 %v2774_v42, %v2695_v50  ;;  %v3739_v3 = vadd.f32 %v3738_v61, %v3737_v60  ;;  %v2786_v5 = vsel %vm1824_vm1, %v2783_v63, -inf }
 0x3fd   :  { %v2784_v41 = vmax.f32 %v2775_v2, 0.0  ;;  %v2700_v4 = vadd.f32 %v3739_v3, %v3586_v19 }
 0x3ff   :  { %v2788_v6 = vsel %vm2787_vm9, %v2784_v41, -inf  ;;  %v2780_v7 = vadd.f32 %v2779_v1, %v2700_v4  ;;  %v2797_v11 = vsel %vm2796_vm10, %v2784_v41, -inf }
 0x400   :  { %v2789_v8 = vmax.f32 %v2786_v5, %v2788_v6 }
 0x401   :  { %v2785_v9 = vmax.f32 %v2780_v7, 0.0 }
 0x402   :  { %v2790_v10 = vrot.slane %v2789_v8, 4 }
 0x403   :  { %v2798_v34 = vsel %vm2031_vm6, %v2785_v9, -inf }
 0x404   :  { %v2791_v12 = vmax.f32 %v2789_v8, %v2790_v10  ;;  %v2799_v13 = vmax.f32 %v2797_v11, %v2798_v34 }
 0x406   :  { %v2792_v15 = vrot.slane %v2791_v12, 2  ;;  %v2800_v16 = vrot.slane %v2799_v13, 4 }
 0x408   :  { %v2793_v17 = vmax.f32 %v2791_v12, %v2792_v15  ;;  %v2801_v18 = vmax.f32 %v2799_v13, %v2800_v16 }
 0x40a   :  { %v2802_v20 = vrot.slane %v2801_v18, 2  ;;  %v2794_v21 = vrot.slane %v2793_v17, 1 }
 0x40c   :  { %v2803_v22 = vmax.f32 %v2801_v18, %v2802_v20  ;;  %v2795_v24 = vmax.f32 %v2793_v17, %v2794_v21 }
 0x40e   :  { %v2804_v23 = vrot.slane %v2803_v22, 1 }
 0x410   :  { %v2805_v25 = vmax.f32 %v2803_v22, %v2804_v23 }
 0x412   :  { %v2806_v26 = vsel %vm1848_vm7, %v2795_v24, %v2805_v25 }
 0x413   :  { %3867 = vmatmul.mubr.msk.f32.vlgmr.msra.gmra.mrb[16].mxu0 %vm1824_vm1, %v2806_v26 }
 0x4e6   :  { %v2883_v27 = vpop.f32.mrb[16].mxu0 }
 0x4e7   :  { %v2887_v29 = vadd.f32 %v2883_v27, %v2492_v51  ;;  %v3868_v30 = vpop.f32.mrb[17].mxu0 }
 0x4e9   :  { %v2895_v28 = vadd.f32 %v3593_v35, %v2887_v29 }
 0x4eb   :  { %v2897_v37 = vsel %vm2896_vm11, %v2895_v28, -inf }
 0x4ec   :  { %2898 = vmax.xlane.f32.xlu0 %v2897_v37 }
 0x579   :  { %v2899_v36 = vpop.xlane.xlu0 %2898 }
 0x57a   :  { %v2900_v38 = vsub.f32 %v2895_v28, %v2899_v36 }
 0x57c   :  { %v2901_v42 = vmul.f32 1.442695, %v2900_v38 }
 0x57e   :  { %4044 = vpow2.f32 %v2901_v42 }
 0x588   :  { %v4045_v43 = vpop.eup %4044 }
 0x589   :  { %v2903_v1 = vsel %vm2896_vm11, %v4045_v43, 0.0 }
 0x58a   :  { %2904 = vadd.xlane.f32.xlu1 %v2903_v1 }
 0x617   :  { %v2905_v44 = vpop.xlane.xlu1 %2904 }
 0x618   :  { %4046 = vlog2.f32 %v2905_v44 }
 0x622   :  { %v4047_v14 = vpop.eup %4046 }
 0x623   :  { %v2907_v40 = vmul.f32 0.6931472, %v4047_v14 }
 0x625   :  { %v2908_v39 = vadd.f32 %v2907_v40, %v2899_v36 }
 0x627   :  { %v2909_v62 = vsub.f32 %v2895_v28, %v2908_v39 }
 0x629   :  { %2910 = vst.msk [vmem:[#allocation7] sm:$0x3] %vm2896_vm11, %v2909_v62 }
 0x62a   :  { %4071 = shalt.err (!%p4068_p9)
}
 0x62b   :  { %s4072_s24 = scalar_lea.hbm %s5017_s15, 32 }
 0x62c   :  { %p4073_p10 = scmp.ne.s32.totalorder %s5017_s15, %s4072_s24  ;;  %p4076_p11 = scmp.lt.u32.totalorder %s4072_s24, %s5017_s15 }
 0x62e   :  { %p4078_p12 = pnand %p4076_p11, %p4073_p10 }
 0x630   :  { %4081 = shalt.err (!%p4078_p12)
}
 0x631   :  { %2920 = dma.vmem_to_hbm [thread:$0]  %s2918_s19, 32, %s5017_s15, [#allocation5]  }
 0x632   :  { %4148 = dma.done.wait [#allocation5], 32  }
 0x633   :  { %4149 = vsyncadd [#allocation5], 4294967264 }
 0x634   :  { %2924 = vsyncpa [#allocation5], 1 }
 0x635   :  { %2925 = vsyncpa [#allocation6], 1 }
 0x636   :  { %2926 = vsyncmov [#allocation3] }
 0x639   :  { %s2927_s26 = vpop.sfrf %2926 }
 0x63a   :  { %p3594_p13 = scmp.ne.s32.totalorder %s2927_s26, 0 }
 0x63c   :  { %2931 = shalt.err (%p3594_p13)  }
 0x63d   :  { %2933 = vsyncmov [#allocation3 + $0x1] }
 0x640   :  { %s2934_s0 = vpop.sfrf %2933 }
 0x641   :  { %p3595_p0 = scmp.ne.s32.totalorder %s2934_s0, 0 }
 0x643   :  { %2938 = shalt.err (%p3595_p0)  }
 0x644   :  { %2940 = vsyncmov [#allocation3 + $0x2] }
 0x647   :  { %s2941_s6 = vpop.sfrf %2940 }
 0x648   :  { %p3596_p1 = scmp.ne.s32.totalorder %s2941_s6, 0 }
 0x64a   :  { %2945 = shalt.err (%p3596_p1)  }
 0x64b   :  { %2947 = vsyncmov [#allocation3 + $0x3] }
 0x64e   :  { %s2948_s7 = vpop.sfrf %2947 }
 0x64f   :  { %p3597_p2 = scmp.ne.s32.totalorder %s2948_s7, 0 }
 0x651   :  { %2952 = shalt.err (%p3597_p2)  }
 0x652   :  { %2954 = vsyncmov [#allocation3 + $0x4] }
 0x655   :  { %s2955_s15 = vpop.sfrf %2954 }
 0x656   :  { %p3598_p3 = scmp.ne.s32.totalorder %s2955_s15, 0 }
 0x658   :  { %2959 = shalt.err (%p3598_p3)  }
 0x659   :  { %2961 = vsyncmov [#allocation3 + $0x5] }
 0x65c   :  { %s2962_s1 = vpop.sfrf %2961 }
 0x65d   :  { %p3599_p4 = scmp.ne.s32.totalorder %s2962_s1, 0 }
 0x65f   :  { %2966 = shalt.err (%p3599_p4)  }
 0x660   :  { %2968 = vsyncmov [#allocation3 + $0x6] }
 0x663   :  { %s2969_s23 = vpop.sfrf %2968 }
 0x664   :  { %p3600_p5 = scmp.ne.s32.totalorder %s2969_s23, 0 }
 0x666   :  { %2973 = shalt.err (%p3600_p5)  }
 0x667   :  { %2975 = vsyncmov [#allocation3 + $0x7] }
 0x66a   :  { %s2976_s5 = vpop.sfrf %2975 }
 0x66b   :  { %p3601_p6 = scmp.ne.s32.totalorder %s2976_s5, 0 }
 0x66d   :  { %2980 = shalt.err (%p3601_p6)  }
 0x66e   :  { %2982 = vsyncmov [#allocation3 + $0x8] }
 0x671   :  { %s2983_s27 = vpop.sfrf %2982 }
 0x672   :  { %p3602_p7 = scmp.ne.s32.totalorder %s2983_s27, 0 }
 0x674   :  { %2987 = shalt.err (%p3602_p7)  }
 0x675   :  { %2989 = vsyncmov [#allocation3 + $0x9] }
 0x678   :  { %s2990_s28 = vpop.sfrf %2989 }
 0x679   :  { %p3603_p8 = scmp.ne.s32.totalorder %s2990_s28, 0 }
 0x67b   :  { %2994 = shalt.err (%p3603_p8)  }
 0x67c   :  { %2996 = vsyncmov [#allocation3 + $0xa] }
 0x67f   :  { %s2997_s29 = vpop.sfrf %2996 }
 0x680   :  { %p3604_p9 = scmp.ne.s32.totalorder %s2997_s29, 0 }
 0x682   :  { %3001 = shalt.err (%p3604_p9)  }
 0x683   :  { %3003 = vsyncmov [#allocation3 + $0xb] }
 0x686   :  { %s3004_s30 = vpop.sfrf %3003 }
 0x687   :  { %p3605_p10 = scmp.ne.s32.totalorder %s3004_s30, 0 }
 0x689   :  { %3008 = shalt.err (%p3605_p10)  }
 0x68a   :  { %3010 = vsyncmov [#allocation3 + $0xc] }
 0x68d   :  { %s3011_s4 = vpop.sfrf %3010 }
 0x68e   :  { %p3606_p11 = scmp.ne.s32.totalorder %s3011_s4, 0 }
 0x690   :  { %3015 = shalt.err (%p3606_p11)  }
 0x691   :  { %3017 = vsyncmov [#allocation3 + $0xd] }
 0x694   :  { %s3018_s3 = vpop.sfrf %3017 }
 0x695   :  { %p3607_p12 = scmp.ne.s32.totalorder %s3018_s3, 0 }
 0x697   :  { %3022 = shalt.err (%p3607_p12)  }
 0x698   :  { %3024 = vsyncmov [#allocation3 + $0xe] }
 0x69b   :  { %s3025_s8 = vpop.sfrf %3024 }
 0x69c   :  { %p3608_p13 = scmp.ne.s32.totalorder %s3025_s8, 0 }
 0x69e   :  { %3029 = shalt.err (%p3608_p13)  }
 0x69f   :  { %3031 = vsyncmov [#allocation3 + $0xf] }
 0x6a2   :  { %s3032_s18 = vpop.sfrf %3031 }
 0x6a3   :  { %p3609_p0 = scmp.ne.s32.totalorder %s3032_s18, 0 }
 0x6a5   :  { %3036 = shalt.err (%p3609_p0)  }
 0x6a6   :  { %3038 = vsyncmov [#allocation3 + $0x10] }
 0x6a9   :  { %s3039_s10 = vpop.sfrf %3038 }
 0x6aa   :  { %p3610_p1 = scmp.ne.s32.totalorder %s3039_s10, 0 }
 0x6ac   :  { %3043 = shalt.err (%p3610_p1)  }
 0x6ad   :  { %3045 = vsyncmov [#allocation3 + $0x11] }
 0x6b0   :  { %s3046_s9 = vpop.sfrf %3045 }
 0x6b1   :  { %p3611_p2 = scmp.ne.s32.totalorder %s3046_s9, 0 }
 0x6b3   :  { %3050 = shalt.err (%p3611_p2)  }
 0x6b4   :  { %3052 = vsyncmov [#allocation3 + $0x12] }
 0x6b7   :  { %s3053_s13 = vpop.sfrf %3052 }
 0x6b8   :  { %p3612_p3 = scmp.ne.s32.totalorder %s3053_s13, 0 }
 0x6ba   :  { %3057 = shalt.err (%p3612_p3)  }
 0x6bb   :  { %3059 = vsyncmov [#allocation3 + $0x13] }
 0x6be   :  { %s3060_s14 = vpop.sfrf %3059 }
 0x6bf   :  { %p3613_p4 = scmp.ne.s32.totalorder %s3060_s14, 0 }
 0x6c1   :  { %3064 = shalt.err (%p3613_p4)  }
 0x6c2   :  { %3066 = vsyncmov [#allocation3 + $0x14] }
 0x6c5   :  { %s3067_s19 = vpop.sfrf %3066 }
 0x6c6   :  { %p3614_p5 = scmp.ne.s32.totalorder %s3067_s19, 0 }
 0x6c8   :  { %3071 = shalt.err (%p3614_p5)  }
 0x6c9   :  { %3073 = vsyncmov [#allocation3 + $0x15] }
 0x6cc   :  { %s3074_s20 = vpop.sfrf %3073 }
 0x6cd   :  { %p3615_p6 = scmp.ne.s32.totalorder %s3074_s20, 0 }
 0x6cf   :  { %3078 = shalt.err (%p3615_p6)  }
 0x6d0   :  { %3080 = vsyncmov [#allocation3 + $0x16] }
 0x6d3   :  { %s3081_s21 = vpop.sfrf %3080 }
 0x6d4   :  { %p3616_p7 = scmp.ne.s32.totalorder %s3081_s21, 0 }
 0x6d6   :  { %3085 = shalt.err (%p3616_p7)  }
 0x6d7   :  { %3087 = vsyncmov [#allocation3 + $0x17] }
 0x6da   :  { %s3088_s22 = vpop.sfrf %3087 }
 0x6db   :  { %p3617_p8 = scmp.ne.s32.totalorder %s3088_s22, 0 }
 0x6dd   :  { %3092 = shalt.err (%p3617_p8)  }
 0x6de   :  { %3094 = vsyncmov [#allocation3 + $0x18] }
 0x6e1   :  { %s3095_s24 = vpop.sfrf %3094 }
 0x6e2   :  { %p3618_p9 = scmp.ne.s32.totalorder %s3095_s24, 0 }
 0x6e4   :  { %3099 = shalt.err (%p3618_p9)  }
 0x6e5   :  { %3101 = vsyncmov [#allocation3 + $0x19] }
 0x6e8   :  { %s3102_s25 = vpop.sfrf %3101 }
 0x6e9   :  { %p3619_p10 = scmp.ne.s32.totalorder %s3102_s25, 0 }
 0x6eb   :  { %3106 = shalt.err (%p3619_p10)  }
 0x6ec   :  { %3108 = vsyncmov [#allocation3 + $0x1a] }
 0x6ef   :  { %s3109_s2 = vpop.sfrf %3108 }
 0x6f0   :  { %p3620_p11 = scmp.ne.s32.totalorder %s3109_s2, 0 }
 0x6f2   :  { %3113 = shalt.err (%p3620_p11)  }
 0x6f3   :  { %3115 = vsyncmov [#allocation3 + $0x1b] }
 0x6f6   :  { %s3116_s16 = vpop.sfrf %3115 }
 0x6f7   :  { %p3621_p12 = scmp.ne.s32.totalorder %s3116_s16, 0 }
 0x6f9   :  { %3120 = shalt.err (%p3621_p12)  }
 0x6fa   :  { %3122 = vsyncmov [#allocation3 + $0x1c] }
 0x6fd   :  { %s3123_s17 = vpop.sfrf %3122 }
 0x6fe   :  { %p3622_p13 = scmp.ne.s32.totalorder %s3123_s17, 0 }
 0x700   :  { %3127 = shalt.err (%p3622_p13)  }
 0x701   :  { %3129 = vsyncmov [#allocation3 + $0x1d] }
 0x704   :  { %s3130_s12 = vpop.sfrf %3129 }
 0x705   :  { %p3623_p0 = scmp.ne.s32.totalorder %s3130_s12, 0 }
 0x707   :  { %3134 = shalt.err (%p3623_p0)  }
 0x708   :  { %3136 = vsyncmov [#allocation3 + $0x1e] }
 0x70b   :  { %s3137_s11 = vpop.sfrf %3136 }
 0x70c   :  { %p3624_p1 = scmp.ne.s32.totalorder %s3137_s11, 0 }
 0x70e   :  { %3141 = shalt.err (%p3624_p1)  }
 0x70f   :  { %3143 = vsyncmov [#allocation3 + $0x1f] }
 0x712   :  { %s3144_s26 = vpop.sfrf %3143 }
 0x713   :  { %p3625_p2 = scmp.ne.s32.totalorder %s3144_s26, 0 }
 0x715   :  { %3148 = shalt.err (%p3625_p2)  }

</bundles_post_ra>
